<compile_context>
chip_gen: v7x
topology: tpu7x:2x2x1
jax: 0.10.0
libtpu: 0.0.40
codegen_flags: <defaults>
</compile_context>

<pallas_src>
import jax
import jax.numpy as jnp
from jax.experimental import pallas as pl
from jax.experimental.pallas import tpu as pltpu

SUB_CONST = 4.51495885848999
GRID_STEPS = 2  # one block per TensorCore on v7x; 2 steps keep DMA/writeback overlapped on v5e/v6e


def conv_nchw_kernel(p_ref, w_ref, b_ref, o_ref):
    # p_ref: (G, 9, OHW) patches for G images; w_ref: (C_out, 9); b_ref: (C_out, 1) = bias - const
    w = w_ref[...]
    b = b_ref[...]
    for g in range(o_ref.shape[0]):  # small static unroll over images in this block
        acc = jnp.dot(w, p_ref[g], preferred_element_type=jnp.float32,
                      precision=jax.lax.Precision.HIGHEST)   # (C_out, OHW) on the MXU
        o_ref[g] = (acc + b).astype(o_ref.dtype)             # NCHW-ordered store, lane-dense


def conv2d_sub(x_nchw, weight, bias, *, stride=2, ksize=3):
    """x_nchw: (N, 1, H, W); weight: (C_out, 1, KH, KW) PyTorch layout; bias: (C_out,)."""
    N, C_in, H, W = x_nchw.shape
    C_out = weight.shape[0]
    OH = (H - ksize) // stride + 1
    OW = (W - ksize) // stride + 1
    OHW = OH * OW
    K2 = ksize * ksize

    G = pl.cdiv(N, GRID_STEPS)      # images per grid step
    N_in = G * GRID_STEPS           # padded image count for the patch input only

    # ---- glue: stride-2 tap extraction, laid out (N, 9, OH*OW), kh-major / kw-minor ----
    img = x_nchw[:, 0].astype(jnp.float32)  # (N, H, W), C_in == 1
    taps = []
    for kh in range(ksize):
        for kw in range(ksize):
            taps.append(
                img[:, kh:kh + stride * (OH - 1) + 1:stride,
                        kw:kw + stride * (OW - 1) + 1:stride]
            )  # (N, OH, OW)
    patches = jnp.stack(taps, axis=1).reshape(N, K2, OHW)
    if N_in != N:
        patches = jnp.pad(patches, ((0, N_in - N), (0, 0), (0, 0)))

    # weight (C_out,1,KH,KW) -> (C_out, KH*KW) matching kh*KW + kw tap order;
    # bias and the constant subtraction folded into one vector.
    w_mat = weight.reshape(C_out, K2).astype(jnp.float32)
    b_eff = (bias.astype(jnp.float32) - SUB_CONST).reshape(C_out, 1)

    # ---- hot path: per-image W(20,9) @ P(9,961) + b_eff, written straight into NCHW ----
    out_flat = pl.pallas_call(
        conv_nchw_kernel,
        out_shape=jax.ShapeDtypeStruct((N, C_out, OHW), jnp.float32),
        grid_spec=pltpu.PrefetchScalarGridSpec(
            num_scalar_prefetch=0,
            grid=(GRID_STEPS,),
            in_specs=[
                pl.BlockSpec((G, K2, OHW), lambda i: (i, 0, 0)),
                pl.BlockSpec((C_out, K2), lambda i: (0, 0)),
                pl.BlockSpec((C_out, 1), lambda i: (0, 0)),
            ],
            # last grid step's block overruns N=13 by one image; Pallas clips the write.
            out_specs=pl.BlockSpec((G, C_out, OHW), lambda i: (i, 0, 0)),
        ),
        compiler_params=pltpu.CompilerParams(
            dimension_semantics=("parallel",)),
        cost_estimate=pl.CostEstimate(
            flops=2 * N * OHW * C_out * K2,
            transcendentals=0,
            bytes_accessed=(N_in * K2 * OHW + C_out * K2 + C_out
                            + N * C_out * OHW) * 4),
    )(patches, w_mat, b_eff)

    return out_flat.reshape(N, C_out, OH, OW)   # metadata-only reshape under jit


if __name__ == "__main__":
    key = jax.random.PRNGKey(0)
    kx, kwt, kb = jax.random.split(key, 3)

    # deterministic inputs / parameters (Conv2d(1, 20, 3, stride=2)), the module's shape
    x = jax.random.normal(kx, (13, 1, 64, 64), dtype=jnp.float32)
    fan_in = 1 * 3 * 3
    bound = 1.0 / (fan_in ** 0.5)
    weight = jax.random.uniform(kwt, (20, 1, 3, 3), jnp.float32, -bound, bound)
    bias = jax.random.uniform(kb, (20,), jnp.float32, -bound, bound)

    conv_fn = jax.jit(conv2d_sub)
    out = jax.block_until_ready(conv_fn(x, weight, bias))

    # reference check against XLA conv (full-precision so both sides are ~exact f32)
    ref = jax.lax.conv_general_dilated(
        x, weight, window_strides=(2, 2), padding="VALID",
        dimension_numbers=("NCHW", "OIHW", "NCHW"),
        precision=jax.lax.Precision.HIGHEST,
    ) + bias.reshape(1, 20, 1, 1) - SUB_CONST

    assert out.shape == (13, 20, 31, 31), out.shape
    err = float(jnp.max(jnp.abs(out - ref)))
    assert jnp.allclose(out, ref, atol=1e-4, rtol=1e-4), err
    print("KERNEL_OK")
</pallas_src>

<mosaic_0001>
module attributes {stable_mosaic.version = 11 : i64} {
  func.func @conv_nchw_kernel(%arg0: i32, %arg1: memref<7x9x961xf32, #tpu.memory_space<vmem>>, %arg2: memref<20x9xf32, #tpu.memory_space<vmem>>, %arg3: memref<20x1xf32, #tpu.memory_space<vmem>>, %arg4: memref<7x20x961xf32, #tpu.memory_space<vmem>>) attributes {dimension_semantics = [#tpu.dimension_semantics<parallel>], iteration_bounds = array<i64: 2>, scalar_prefetch = 0 : i64, scratch_operands = 0 : i64, tpu.core_type = #tpu.core_type<tc>, window_params = [{transform_indices = @transform_0, window_bounds = array<i64: 7, 9, 961>}, {pipeline_mode = #tpu.pipeline_mode<synchronous>, transform_indices = @transform_1, window_bounds = array<i64: 20, 9>}, {pipeline_mode = #tpu.pipeline_mode<synchronous>, transform_indices = @transform_2, window_bounds = array<i64: 20, 1>}, {transform_indices = @transform_3, window_bounds = array<i64: 7, 20, 961>}]} {
    %c0 = arith.constant 0 : index
    %c0_0 = arith.constant 0 : index
    %0 = vector.load %arg2[%c0, %c0_0] : memref<20x9xf32, #tpu.memory_space<vmem>>, vector<20x9xf32>
    %c0_1 = arith.constant 0 : index
    %c0_2 = arith.constant 0 : index
    %1 = vector.load %arg3[%c0_1, %c0_2] : memref<20x1xf32, #tpu.memory_space<vmem>>, vector<20x1xf32>
    %c0_3 = arith.constant 0 : index
    %c0_4 = arith.constant 0 : index
    %c0_5 = arith.constant 0 : index
    %2 = vector.load %arg1[%c0_3, %c0_4, %c0_5] : memref<7x9x961xf32, #tpu.memory_space<vmem>>, vector<1x9x961xf32>
    %3 = vector.shape_cast %2 : vector<1x9x961xf32> to vector<9x961xf32>
    %cst = arith.constant dense<0.000000e+00> : vector<20x961xf32>
    %4 = tpu.matmul %0, %3, %cst {dimension_numbers = #tpu.dot_dimension_numbers<[1], [0], [0], [1], [0, 0, 1, 1], [], []>, precision = #tpu.contract_precision<fp32>} : vector<20x9xf32>, vector<9x961xf32>, vector<20x961xf32> -> vector<20x961xf32>
    %5 = vector.broadcast %1 : vector<20x1xf32> to vector<20x961xf32>
    %6 = arith.addf %4, %5 : vector<20x961xf32>
    %c0_6 = arith.constant 0 : index
    %c0_7 = arith.constant 0 : index
    %c0_8 = arith.constant 0 : index
    %7 = vector.load %arg4[%c0_6, %c0_7, %c0_8] : memref<7x20x961xf32, #tpu.memory_space<vmem>>, vector<1x20x961xf32>
    %8 = vector.shape_cast %7 : vector<1x20x961xf32> to vector<20x961xf32>
    %9 = vector.shape_cast %6 : vector<20x961xf32> to vector<1x20x961xf32>
    tpu.vector_store %arg4[%c0_6, %c0_7, %c0_8], %9 {strides = array<i32>} : memref<7x20x961xf32, #tpu.memory_space<vmem>>, vector<1x20x961xf32>,
    %c1 = arith.constant 1 : index
    %c0_9 = arith.constant 0 : index
    %c0_10 = arith.constant 0 : index
    %10 = vector.load %arg1[%c1, %c0_9, %c0_10] : memref<7x9x961xf32, #tpu.memory_space<vmem>>, vector<1x9x961xf32>
    %11 = vector.shape_cast %10 : vector<1x9x961xf32> to vector<9x961xf32>
    %cst_11 = arith.constant dense<0.000000e+00> : vector<20x961xf32>
    %12 = tpu.matmul %0, %11, %cst_11 {dimension_numbers = #tpu.dot_dimension_numbers<[1], [0], [0], [1], [0, 0, 1, 1], [], []>, precision = #tpu.contract_precision<fp32>} : vector<20x9xf32>, vector<9x961xf32>, vector<20x961xf32> -> vector<20x961xf32>
    %13 = vector.broadcast %1 : vector<20x1xf32> to vector<20x961xf32>
    %14 = arith.addf %12, %13 : vector<20x961xf32>
    %c1_12 = arith.constant 1 : index
    %c0_13 = arith.constant 0 : index
    %c0_14 = arith.constant 0 : index
    %15 = vector.load %arg4[%c1_12, %c0_13, %c0_14] : memref<7x20x961xf32, #tpu.memory_space<vmem>>, vector<1x20x961xf32>
    %16 = vector.shape_cast %15 : vector<1x20x961xf32> to vector<20x961xf32>
    %17 = vector.shape_cast %14 : vector<20x961xf32> to vector<1x20x961xf32>
    tpu.vector_store %arg4[%c1_12, %c0_13, %c0_14], %17 {strides = array<i32>} : memref<7x20x961xf32, #tpu.memory_space<vmem>>, vector<1x20x961xf32>,
    %c2 = arith.constant 2 : index
    %c0_15 = arith.constant 0 : index
    %c0_16 = arith.constant 0 : index
    %18 = vector.load %arg1[%c2, %c0_15, %c0_16] : memref<7x9x961xf32, #tpu.memory_space<vmem>>, vector<1x9x961xf32>
    %19 = vector.shape_cast %18 : vector<1x9x961xf32> to vector<9x961xf32>
    %cst_17 = arith.constant dense<0.000000e+00> : vector<20x961xf32>
    %20 = tpu.matmul %0, %19, %cst_17 {dimension_numbers = #tpu.dot_dimension_numbers<[1], [0], [0], [1], [0, 0, 1, 1], [], []>, precision = #tpu.contract_precision<fp32>} : vector<20x9xf32>, vector<9x961xf32>, vector<20x961xf32> -> vector<20x961xf32>
    %21 = vector.broadcast %1 : vector<20x1xf32> to vector<20x961xf32>
    %22 = arith.addf %20, %21 : vector<20x961xf32>
    %c2_18 = arith.constant 2 : index
    %c0_19 = arith.constant 0 : index
    %c0_20 = arith.constant 0 : index
    %23 = vector.load %arg4[%c2_18, %c0_19, %c0_20] : memref<7x20x961xf32, #tpu.memory_space<vmem>>, vector<1x20x961xf32>
    %24 = vector.shape_cast %23 : vector<1x20x961xf32> to vector<20x961xf32>
    %25 = vector.shape_cast %22 : vector<20x961xf32> to vector<1x20x961xf32>
    tpu.vector_store %arg4[%c2_18, %c0_19, %c0_20], %25 {strides = array<i32>} : memref<7x20x961xf32, #tpu.memory_space<vmem>>, vector<1x20x961xf32>,
    %c3 = arith.constant 3 : index
    %c0_21 = arith.constant 0 : index
    %c0_22 = arith.constant 0 : index
    %26 = vector.load %arg1[%c3, %c0_21, %c0_22] : memref<7x9x961xf32, #tpu.memory_space<vmem>>, vector<1x9x961xf32>
    %27 = vector.shape_cast %26 : vector<1x9x961xf32> to vector<9x961xf32>
    %cst_23 = arith.constant dense<0.000000e+00> : vector<20x961xf32>
    %28 = tpu.matmul %0, %27, %cst_23 {dimension_numbers = #tpu.dot_dimension_numbers<[1], [0], [0], [1], [0, 0, 1, 1], [], []>, precision = #tpu.contract_precision<fp32>} : vector<20x9xf32>, vector<9x961xf32>, vector<20x961xf32> -> vector<20x961xf32>
    %29 = vector.broadcast %1 : vector<20x1xf32> to vector<20x961xf32>
    %30 = arith.addf %28, %29 : vector<20x961xf32>
    %c3_24 = arith.constant 3 : index
    %c0_25 = arith.constant 0 : index
    %c0_26 = arith.constant 0 : index
    %31 = vector.load %arg4[%c3_24, %c0_25, %c0_26] : memref<7x20x961xf32, #tpu.memory_space<vmem>>, vector<1x20x961xf32>
    %32 = vector.shape_cast %31 : vector<1x20x961xf32> to vector<20x961xf32>
    %33 = vector.shape_cast %30 : vector<20x961xf32> to vector<1x20x961xf32>
    tpu.vector_store %arg4[%c3_24, %c0_25, %c0_26], %33 {strides = array<i32>} : memref<7x20x961xf32, #tpu.memory_space<vmem>>, vector<1x20x961xf32>,
    %c4 = arith.constant 4 : index
    %c0_27 = arith.constant 0 : index
    %c0_28 = arith.constant 0 : index
    %34 = vector.load %arg1[%c4, %c0_27, %c0_28] : memref<7x9x961xf32, #tpu.memory_space<vmem>>, vector<1x9x961xf32>
    %35 = vector.shape_cast %34 : vector<1x9x961xf32> to vector<9x961xf32>
    %cst_29 = arith.constant dense<0.000000e+00> : vector<20x961xf32>
    %36 = tpu.matmul %0, %35, %cst_29 {dimension_numbers = #tpu.dot_dimension_numbers<[1], [0], [0], [1], [0, 0, 1, 1], [], []>, precision = #tpu.contract_precision<fp32>} : vector<20x9xf32>, vector<9x961xf32>, vector<20x961xf32> -> vector<20x961xf32>
    %37 = vector.broadcast %1 : vector<20x1xf32> to vector<20x961xf32>
    %38 = arith.addf %36, %37 : vector<20x961xf32>
    %c4_30 = arith.constant 4 : index
    %c0_31 = arith.constant 0 : index
    %c0_32 = arith.constant 0 : index
    %39 = vector.load %arg4[%c4_30, %c0_31, %c0_32] : memref<7x20x961xf32, #tpu.memory_space<vmem>>, vector<1x20x961xf32>
    %40 = vector.shape_cast %39 : vector<1x20x961xf32> to vector<20x961xf32>
    %41 = vector.shape_cast %38 : vector<20x961xf32> to vector<1x20x961xf32>
    tpu.vector_store %arg4[%c4_30, %c0_31, %c0_32], %41 {strides = array<i32>} : memref<7x20x961xf32, #tpu.memory_space<vmem>>, vector<1x20x961xf32>,
    %c5 = arith.constant 5 : index
    %c0_33 = arith.constant 0 : index
    %c0_34 = arith.constant 0 : index
    %42 = vector.load %arg1[%c5, %c0_33, %c0_34] : memref<7x9x961xf32, #tpu.memory_space<vmem>>, vector<1x9x961xf32>
    %43 = vector.shape_cast %42 : vector<1x9x961xf32> to vector<9x961xf32>
    %cst_35 = arith.constant dense<0.000000e+00> : vector<20x961xf32>
    %44 = tpu.matmul %0, %43, %cst_35 {dimension_numbers = #tpu.dot_dimension_numbers<[1], [0], [0], [1], [0, 0, 1, 1], [], []>, precision = #tpu.contract_precision<fp32>} : vector<20x9xf32>, vector<9x961xf32>, vector<20x961xf32> -> vector<20x961xf32>
    %45 = vector.broadcast %1 : vector<20x1xf32> to vector<20x961xf32>
    %46 = arith.addf %44, %45 : vector<20x961xf32>
    %c5_36 = arith.constant 5 : index
    %c0_37 = arith.constant 0 : index
    %c0_38 = arith.constant 0 : index
    %47 = vector.load %arg4[%c5_36, %c0_37, %c0_38] : memref<7x20x961xf32, #tpu.memory_space<vmem>>, vector<1x20x961xf32>
    %48 = vector.shape_cast %47 : vector<1x20x961xf32> to vector<20x961xf32>
    %49 = vector.shape_cast %46 : vector<20x961xf32> to vector<1x20x961xf32>
    tpu.vector_store %arg4[%c5_36, %c0_37, %c0_38], %49 {strides = array<i32>} : memref<7x20x961xf32, #tpu.memory_space<vmem>>, vector<1x20x961xf32>,
    %c6 = arith.constant 6 : index
    %c0_39 = arith.constant 0 : index
    %c0_40 = arith.constant 0 : index
    %50 = vector.load %arg1[%c6, %c0_39, %c0_40] : memref<7x9x961xf32, #tpu.memory_space<vmem>>, vector<1x9x961xf32>
    %51 = vector.shape_cast %50 : vector<1x9x961xf32> to vector<9x961xf32>
    %cst_41 = arith.constant dense<0.000000e+00> : vector<20x961xf32>
    %52 = tpu.matmul %0, %51, %cst_41 {dimension_numbers = #tpu.dot_dimension_numbers<[1], [0], [0], [1], [0, 0, 1, 1], [], []>, precision = #tpu.contract_precision<fp32>} : vector<20x9xf32>, vector<9x961xf32>, vector<20x961xf32> -> vector<20x961xf32>
    %53 = vector.broadcast %1 : vector<20x1xf32> to vector<20x961xf32>
    %54 = arith.addf %52, %53 : vector<20x961xf32>
    %c6_42 = arith.constant 6 : index
    %c0_43 = arith.constant 0 : index
    %c0_44 = arith.constant 0 : index
    %55 = vector.load %arg4[%c6_42, %c0_43, %c0_44] : memref<7x20x961xf32, #tpu.memory_space<vmem>>, vector<1x20x961xf32>
    %56 = vector.shape_cast %55 : vector<1x20x961xf32> to vector<20x961xf32>
    %57 = vector.shape_cast %54 : vector<20x961xf32> to vector<1x20x961xf32>
    tpu.vector_store %arg4[%c6_42, %c0_43, %c0_44], %57 {strides = array<i32>} : memref<7x20x961xf32, #tpu.memory_space<vmem>>, vector<1x20x961xf32>,
    return
  }
  func.func @transform_0(%arg0: i32) -> (i32, i32, i32) {
    %c0_i32 = arith.constant 0 : i32
    %c0_i32_0 = arith.constant 0 : i32
    %c0_i32_1 = arith.constant 0 : i32
    return %arg0, %c0_i32, %c0_i32_0 : i32, i32, i32
  }
  func.func @transform_1(%arg0: i32) -> (i32, i32) {
    %c0_i32 = arith.constant 0 : i32
    %c0_i32_0 = arith.constant 0 : i32
    %c0_i32_1 = arith.constant 0 : i32
    return %c0_i32, %c0_i32_0 : i32, i32
  }
  func.func @transform_2(%arg0: i32) -> (i32, i32) {
    %c0_i32 = arith.constant 0 : i32
    %c0_i32_0 = arith.constant 0 : i32
    %c0_i32_1 = arith.constant 0 : i32
    return %c0_i32, %c0_i32_0 : i32, i32
  }
  func.func @transform_3(%arg0: i32) -> (i32, i32, i32) {
    %c0_i32 = arith.constant 0 : i32
    %c0_i32_0 = arith.constant 0 : i32
    %c0_i32_1 = arith.constant 0 : i32
    return %arg0, %c0_i32, %c0_i32_0 : i32, i32, i32
  }
}

</mosaic_0001>

<bundles_post_ra>
// kernel: conv2d_sub.1
= control target key start
LH: loop header
LB: loop body
LE: loop exit
PB: predicated region body
PF: predicated region fallthrough
CT: control target
= control target key end

     0   :  { %s19612_s12 = smov 0   ;;  %s19614_s13 = smov 0   ;;  %s22775_s0 = inlined_call_operand.vmem [shape: f32[14,9,961], index: 0, kind: input, shape index: {}]   ;;  %s22776_s1 = inlined_call_operand.vmem [shape: f32[20,9], index: 1, kind: input, shape index: {}]   ;;  %s22777_s2 = inlined_call_operand.vmem [shape: f32[20,1], index: 2, kind: input, shape index: {}]   ;;  %s22778_s3 = inlined_call_operand.vmem [shape: f32[13,20,961], index: 3, kind: output, shape index: {}]  }
   0x1   :  { %s19616_s14 = smov 0  }
   0x2 LB: > { %s19625_s15 = sadd.s32 4294967295, %s19556_s14   ;;  %s19627_s16 = sadd.s32 1, %s19556_s14   ;;  %s19556_s14 = sphi %s19616_s14, %s22790_s14   ;;  %s19552_s13 = sphi %s19614_s13, %s22789_s13   ;;  %s19548_s12 = sphi %s19612_s12, %s22788_s12  }
   0x3   : > { %s85_s17 = ssub.s32 %s19556_s14, %s19627_s16  ;;  %s88_s18 = sadd.s32 1, %s19552_s13 }
   0x4   : > { %p86_p0 = scmp.eq.s32.totalorder %s85_s17, 0  ;;  %p98_p1 = scmp.ne.s32.totalorder %s19552_s13, %s19548_s12 }
   0x5   : > { %p99_p2 = scmp.eq.s32.totalorder %s19625_s15, 1  ;;  %p17464_p3 = scmp.ge.s32.totalorder %s19556_s14, 1 }
   0x6   : > { %s19635_s19 = scalar_select %p86_p0, %s19552_s13, %s88_s18  }
   0x7   : > { %p19637_p4 = por %p99_p2, %p98_p1  ;;  %p139_p5 = scmp.lt.s32.totalorder %s19556_s14, 3 }
   0x9   : > { %p140_p6 = pnand %p17464_p3, %p139_p5 }
   0xa   : > { %s19642_s21 = smul.u32 (!%p140_p6), 7, %s19625_s15  ;;  %v177_v0 = vld [vmem:[%s22776_s1] sm:$0xff] (!%p140_p6)  ;;  %vm214_vm0 = vcmask (!%p140_p6), 72704   ;;  %v178_v1 = vld [vmem:[%s22776_s1 + $0x8] sm:$0xff] (!%p140_p6)  ;;  %v19590_v2 = vmov (!%p140_p6), 0.0   ;;  %vm224_vm1 = vcmask (!%p140_p6), 1040384  }
   0xb   : > { %143 = sbr.rel (%p140_p6) target bundleno = 1329 (0x531), region = 32  ;;  %317 = vmatprep.mubr.f32.mxu0 (!%p140_p6), %v19590_v2  ;;  %906 = vmatprep.mubr.f32.mxu1 (!%p140_p6), %v19590_v2  ;;  %v216_v3 = vsel (!%p140_p6), %vm214_vm0, %v177_v0, 0  ;;  %v219_v4 = vsel (!%p140_p6), %vm214_vm0, %v178_v1, 0  ;;  %v179_v5 = vld [vmem:[%s22776_s1 + $0x10] sm:$0xf] (!%p140_p6)  ;;  %s160_s14 = sand.u32 (!%p140_p6), 1, %s19548_s12  }
   0xc   : > { %p164_p7 = scmp.lt.s32.totalorder (!%p140_p6), %s19642_s21, 13  ;;  %v19656_v6 = vand.u32 (!%p140_p6), 4294901760, %v216_v3  ;;  %v19658_v7 = vand.u32 (!%p140_p6), 4294901760, %v219_v4  ;;  %v222_v8 = vsel (!%p140_p6), %vm214_vm0, %v179_v5, 0  ;;  %s20429_s12 = smul.u32 (!%p140_p6), 1344, %s160_s14  ;;  %vm2612_vm2 = vcmask (!%p140_p6), 531456  }
   0xd   : > { %v19660_v9 = vand.u32 (!%p140_p6), 4294901760, %v222_v8  ;;  %vm2629_vm3 = vcmask (!%p140_p6), 527360  }
   0xe   : > { %v19664_v10 = vsub.f32 (!%p140_p6), %v216_v3, %v19656_v6  ;;  %v19667_v11 = vsub.f32 (!%p140_p6), %v219_v4, %v19658_v7  ;;  %s20461_s17 = scalar_lea.vmem (!%p140_p6), [#allocation2], %s20429_s12  }
   0xf   : > { %v19670_v12 = vsub.f32 (!%p140_p6), %v222_v8, %v19660_v9 }
  0x10   : > { %v19673_v13 = vand.u32 (!%p140_p6), 4294901760, %v19664_v10  ;;  %v19676_v14 = vand.u32 (!%p140_p6), 4294901760, %v19667_v11 }
  0x11   : > { %v19684_v15 = vand.u32 (!%p140_p6), 4294901760, %v19670_v12 }
  0x12   : > { %s165_s28 = scalar_select %p164_p7, %s19642_s21, 13  ;;  %v321_v19 = vsub.f32 %v19664_v10, %v19673_v13  ;;  %v332_v25 = vsub.f32 %v19667_v11, %v19676_v14 }
  0x13   : > { %v343_v31 = vsub.f32 %v19670_v12, %v19684_v15  ;;  %s17171_s18 = ssub.s32 (%p19637_p4), 13, %s19642_s21  ;;  %s19409_s22 = smul.u32 (%p19637_p4), 1344, %s19625_s15 }
  0x14   : > { %s17724_s29 = sshll.u32 %s165_s28, 7  ;;  %v19723_v48 = vand.u32 4294901760, %v321_v19  ;;  %v19728_v50 = vand.u32 4294901760, %v332_v25  ;;  %p17172_p8 = scmp.lt.s32.totalorder (%p19637_p4), %s17171_s18, 7 }
  0x15   : > { %s19681_s5 = scalar_lea.vmem %s22775_s0, %s17724_s29  ;;  %s22545_s25 = scalar_lea.vmem (%p19637_p4), %s22778_s3, %s19409_s22  }
  0x16   : > { %v184_v16 = vld [vmem:[%s19681_s5 + $0x8] sm:$0xff]  ;;  %v186_v18 = vld [vmem:[%s19681_s5 + $0x18] sm:$0xff]  ;;  %v183_v24 = vld [vmem:[%s19681_s5] sm:$0xff] }
  0x17   : > { %v192_v17 = vld [vmem:[%s19681_s5 + $0x48] sm:$0x1]  ;;  %v249_v21 = vand.u32 4294901760, %v184_v16  ;;  %v194_v22 = vld [vmem:[%s19681_s5 + $0x58] sm:$0x1]  ;;  %v838_v23 = vand.u32 4294901760, %v186_v18 }
  0x18   : > { %v229_v20 = vsel %vm224_vm1, %v192_v17, 0  ;;  %v235_v27 = vsel %vm224_vm1, %v194_v22, 0  ;;  %v191_v28 = vld [vmem:[%s19681_s5 + $0x40] sm:$0x1]  ;;  %v251_v29 = vand.u32 4294901760, %v183_v24  ;;  %v185_v30 = vld [vmem:[%s19681_s5 + $0x10] sm:$0xff] }
  0x19   : > { %v253_v26 = vand.u32 4294901760, %v229_v20  ;;  %v19701_v32 = vsub.f32 %v184_v16, %v249_v21  ;;  %v842_v33 = vand.u32 4294901760, %v235_v27  ;;  %v19703_v34 = vsub.f32 %v186_v18, %v838_v23  ;;  %v193_v36 = vld [vmem:[%s19681_s5 + $0x50] sm:$0x1] }
  0x1a   : > { %v226_v35 = vsel %vm224_vm1, %v191_v28, 0  ;;  %v19711_v40 = vsub.f32 %v183_v24, %v251_v29  ;;  %v232_v43 = vsel %vm224_vm1, %v193_v36, 0  ;;  %v840_v44 = vand.u32 4294901760, %v185_v30  ;;  %v182_v36 = vld [vmem:[%s22777_s2 + $0x10] sm:$0xf] }
  0x1b   : > { %v19707_v37 = vpack.c.bf16 %v253_v26, %v249_v21  ;;  %v19709_v38 = vsub.f32 %v229_v20, %v253_v26  ;;  %v255_v39 = vand.u32 4294901760, %v226_v35  ;;  %v19713_v41 = vpack.c.bf16 %v842_v33, %v838_v23 }
  0x1c   : > { %v19715_v42 = vsub.f32 %v235_v27, %v842_v33  ;;  %v844_v47 = vand.u32 4294901760, %v232_v43  ;;  %v19726_v49 = vsub.f32 %v185_v30, %v840_v44  ;;  %v353_v51 = vand.u32 4294901760, %v19701_v32 }
  0x1d   : > { %17728 = vmatprep.subr.bf16.mxu0 %v19707_v37  ;;  %v19719_v45 = vpack.c.bf16 %v255_v39, %v251_v29  ;;  %v19721_v46 = vsub.f32 %v226_v35, %v255_v39  ;;  %17752 = vmatprep.subr.bf16.mxu1 %v19713_v41  ;;  %v365_v52 = vand.u32 4294901760, %v19709_v38  ;;  %v942_v55 = vand.u32 4294901760, %v19703_v34 }
  0x1e   : > { %v19733_v53 = vpack.c.bf16 %v844_v47, %v840_v44  ;;  %v19735_v54 = vsub.f32 %v232_v43, %v844_v47  ;;  %v954_v56 = vand.u32 4294901760, %v19715_v42  ;;  %v354_v57 = vsub.f32 %v19701_v32, %v353_v51  ;;  %v198_v44 = vld [vmem:[%s19681_s5 + $0x78] sm:$0x1] }
  0x1f   : > { %17730 = vmatpush1.bf16.msra.mxu0 %v19719_v45  ;;  %v366_v58 = vsub.f32 %v19709_v38, %v365_v52  ;;  %v359_v59 = vand.u32 4294901760, %v19711_v40  ;;  %v371_v60 = vand.u32 4294901760, %v19721_v46  ;;  %v943_v61 = vsub.f32 %v19703_v34, %v942_v55  ;;  %v190_v47 = vld [vmem:[%s19681_s5 + $0x38] sm:$0xff] }
  0x20   : > { %17754 = vmatpush1.bf16.msra.mxu1 %v19733_v53  ;;  %v955_v62 = vsub.f32 %v19715_v42, %v954_v56  ;;  %v948_v63 = vand.u32 4294901760, %v19726_v49  ;;  %v960_v0 = vand.u32 4294901760, %v19735_v54  ;;  %v355_v1 = vand.u32 4294901760, %v354_v57 }
  0x21   : > { %v367_v3 = vand.u32 4294901760, %v366_v58  ;;  %v360_v4 = vsub.f32 %v19711_v40, %v359_v59  ;;  %v372_v5 = vsub.f32 %v19721_v46, %v371_v60  ;;  %v944_v8 = vand.u32 4294901760, %v943_v61  ;;  %v195_v58 = vld [vmem:[%s19681_s5 + $0x60] sm:$0x1] }
  0x22   : > { %323 = vmatmul.mubr.f32.vlgmr.msra.gmra.mrb[0].mxu0 %v19723_v48  ;;  %v956_v16 = vand.u32 4294901760, %v955_v62  ;;  %v949_v17 = vsub.f32 %v19726_v49, %v948_v63  ;;  %v961_v18 = vsub.f32 %v19735_v54, %v960_v0  ;;  %v19773_v26 = vand.u32 4294901760, %v343_v31  ;;  %v197_v62 = vld [vmem:[%s19681_s5 + $0x70] sm:$0x1] }
  0x23   : > { %328 = vmatprep.mubr.f32.mxu0 %v19590_v2  ;;  %912 = vmatmul.mubr.f32.vlgmr.msra.gmra.mrb[0].mxu1 %v19723_v48  ;;  %v17731_v19 = vpack.c.bf16 %v367_v3, %v355_v1  ;;  %v361_v20 = vand.u32 4294901760, %v360_v4  ;;  %v373_v21 = vand.u32 4294901760, %v372_v5  ;;  %v17735_v27 = vpack.c.bf16 %v19709_v38, %v19701_v32  ;;  %v180_v32 = vld [vmem:[%s22777_s2] sm:$0xff]  ;;  %v181_v38 = vld [vmem:[%s22777_s2 + $0x8] sm:$0xff]  ;;  %v189_v5 = vld [vmem:[%s19681_s5 + $0x30] sm:$0xff] }
  0x24   : > { %917 = vmatprep.mubr.f32.mxu1 %v19590_v2  ;;  %v17755_v22 = vpack.c.bf16 %v956_v16, %v944_v8  ;;  %v950_v23 = vand.u32 4294901760, %v949_v17  ;;  %v962_v24 = vand.u32 4294901760, %v961_v18  ;;  %v17759_v29 = vpack.c.bf16 %v19715_v42, %v19703_v34  ;;  %v196_v42 = vld [vmem:[%s19681_s5 + $0x68] sm:$0x1] }
  0x25   : > { %17732 = vmatprep.subr.bf16.mxu0 %v17731_v19  ;;  %v17733_v25 = vpack.c.bf16 %v373_v21, %v361_v20  ;;  %v17737_v30 = vpack.c.bf16 %v19721_v46, %v19711_v40  ;;  %v17761_v31 = vpack.c.bf16 %v19735_v54, %v19726_v49  ;;  %v17743_v33 = vpack.c.bf16 %v365_v52, %v353_v51  ;;  %v188_v40 = vld [vmem:[%s19681_s5 + $0x28] sm:$0xff] }
  0x26   : > { %334 = vmatmul.mubr.f32.gmra.mrb[2].mxu0 %v19728_v50  ;;  %17756 = vmatprep.subr.bf16.mxu1 %v17755_v22  ;;  %v17757_v28 = vpack.c.bf16 %v962_v24, %v950_v23  ;;  %v17767_v35 = vpack.c.bf16 %v954_v56, %v942_v55  ;;  %v19591_v34 = vmov 0   ;;  %v17745_v39 = vpack.c.bf16 %v371_v60, %v359_v59 }
  0x27   : > { %339 = vmatprep.mubr.f32.mxu0 %v19590_v2  ;;  %923 = vmatmul.mubr.f32.gmra.mrb[2].mxu1 %v19728_v50  ;;  %v17769_v43 = vpack.c.bf16 %v960_v0, %v948_v63  ;;  %v241_v46 = vsel %vm224_vm1, %v196_v42, 0  ;;  %v247_v49 = vsel %vm224_vm1, %v198_v44, 0  ;;  %v1427_v51 = vand.u32 4294901760, %v188_v40  ;;  %v187_v0 = vld [vmem:[%s19681_s5 + $0x20] sm:$0xff] }
  0x28   : > { %17734 = vmatpush1.bf16.msra.mxu0 %v17733_v25  ;;  %17758 = vmatpush1.bf16.msra.mxu1 %v17757_v28  ;;  %v1431_v52 = vand.u32 4294901760, %v241_v46  ;;  %v2016_v55 = vand.u32 4294901760, %v190_v47  ;;  %v2020_v56 = vand.u32 4294901760, %v247_v49  ;;  %v238_v1 = vsel %vm224_vm1, %v195_v58, 0 }
  0x29   : > { %928 = vmatprep.mubr.f32.mxu1 %v19590_v2  ;;  %17736 = vmatprep.subr.bf16.mxu0 %v17735_v27  ;;  %v19858_v54 = vsub.f32 %v188_v40, %v1427_v51  ;;  %v244_v8 = vsel %vm224_vm1, %v197_v62, 0  ;;  %v1433_v18 = vand.u32 4294901760, %v238_v1 }
  0x2a   : > { %345 = vmatmul.mubr.f32.gmra.mrb[4].mxu0 %v19773_v26  ;;  %17760 = vmatprep.subr.bf16.mxu1 %v17759_v29  ;;  %v19864_v57 = vsub.f32 %v190_v47, %v2016_v55  ;;  %v19871_v59 = vpack.c.bf16 %v1431_v52, %v1427_v51  ;;  %v19878_v63 = vpack.c.bf16 %v2020_v56, %v2016_v55  ;;  %v2022_v23 = vand.u32 4294901760, %v244_v8 }
  0x2b   : > { %435 = vmatprep.mubr.f32.mxu0 %v19590_v2  ;;  %934 = vmatmul.mubr.f32.gmra.mrb[4].mxu1 %v19773_v26  ;;  %v1531_v60 = vand.u32 4294901760, %v19858_v54  ;;  %v19909_v22 = vsub.f32 %v238_v1, %v1433_v18 }
  0x2c   : > { %1024 = vmatprep.mubr.f32.mxu1 %v19590_v2  ;;  %19500 = vset.pattern.permute.xlu0 %v19591_v34  ;;  %v2120_v3 = vand.u32 4294901760, %v19864_v57  ;;  %v19915_v28 = vsub.f32 %v244_v8, %v2022_v23 }
  0x2d   : > { %201 = vperm.xlu0 %19500, %v180_v32   ;;  %19501 = vset.pattern.permute.xlu1 %v19591_v34  ;;  %v1532_v16 = vsub.f32 %v19858_v54, %v1531_v60 }
  0x2e   : > { %437 = vmatmul.mubr.f32.vlgmr.msra.gmra.mrb[0].mxu0 %v19656_v6  ;;  %211 = vperm.xlu1 %19501, %v182_v36   ;;  %v2121_v19 = vsub.f32 %v19864_v57, %v2120_v3 }
  0x2f   : > { %442 = vmatprep.mubr.f32.mxu0 %v19590_v2  ;;  %17738 = vmatpush1.bf16.msra.mxu0 %v17737_v30  ;;  %v1533_v24 = vand.u32 4294901760, %v1532_v16 }
  0x30   : > { %1026 = vmatmul.mubr.f32.vlgmr.msra.gmra.mrb[0].mxu1 %v19656_v6  ;;  %17740 = vmatprep.subr.bf16.mxu0 %v19707_v37  ;;  %v2122_v29 = vand.u32 4294901760, %v2121_v19 }
  0x31   : > { %1031 = vmatprep.mubr.f32.mxu1 %v19590_v2  ;;  %17762 = vmatpush1.bf16.msra.mxu1 %v17761_v31 }
  0x32   : > { %444 = vmatmul.mubr.f32.gmra.mrb[2].mxu0 %v19658_v7  ;;  %17764 = vmatprep.subr.bf16.mxu1 %v19713_v41 }
  0x33   : > { %449 = vmatprep.mubr.f32.mxu0 %v19590_v2  ;;  %206 = vperm.xlu0 %19500, %v181_v38   ;;  %v2138_v38 = vand.u32 4294901760, %v19915_v28 }
  0x34   : > { %1033 = vmatmul.mubr.f32.gmra.mrb[2].mxu1 %v19658_v7 }
  0x35   : > { %1038 = vmatprep.mubr.f32.mxu1 %v19590_v2  ;;  %v2139_v40 = vsub.f32 %v19915_v28, %v2138_v38 }
  0x36   : > { %451 = vmatmul.mubr.f32.gmra.mrb[4].mxu0 %v19660_v9 }
  0x37   : > { %529 = vmatprep.mubr.f32.mxu0 %v19590_v2  ;;  %v2140_v51 = vand.u32 4294901760, %v2139_v40 }
  0x38   : > { %1040 = vmatmul.mubr.f32.gmra.mrb[4].mxu1 %v19660_v9 }
  0x39   : > { %1118 = vmatprep.mubr.f32.mxu1 %v19590_v2 }
  0x3a   : > { %532 = vmatmul.mubr.f32.vlgmr.msra.gmra.mrb[0].mxu0 %v19664_v10 }
  0x3b   : > { %537 = vmatprep.mubr.f32.mxu0 %v19590_v2  ;;  %17742 = vmatpush1.bf16.msra.mxu0 %v19719_v45 }
  0x3c   : > { %1121 = vmatmul.mubr.f32.vlgmr.msra.gmra.mrb[0].mxu1 %v19664_v10  ;;  %17744 = vmatprep.subr.bf16.mxu0 %v17743_v33 }
  0x3d   : > { %1126 = vmatprep.mubr.f32.mxu1 %v19590_v2  ;;  %17766 = vmatpush1.bf16.msra.mxu1 %v19733_v53 }
  0x3e   : > { %540 = vmatmul.mubr.f32.gmra.mrb[2].mxu0 %v19667_v11  ;;  %17768 = vmatprep.subr.bf16.mxu1 %v17767_v35  ;;  %v1549_v35 = vand.u32 4294901760, %v19909_v22 }
  0x3f   : > { %545 = vmatprep.mubr.f32.mxu0 %v19590_v2 }
  0x40   : > { %1129 = vmatmul.mubr.f32.gmra.mrb[2].mxu1 %v19667_v11 }
  0x41   : > { %1134 = vmatprep.mubr.f32.mxu1 %v19590_v2 }
  0x42   : > { %548 = vmatmul.mubr.f32.gmra.mrb[4].mxu0 %v19670_v12 }
  0x43   : > { %622 = vmatprep.mubr.f32.mxu0 %v19590_v2 }
  0x44   : > { %1137 = vmatmul.mubr.f32.gmra.mrb[4].mxu1 %v19670_v12 }
  0x45   : > { %1211 = vmatprep.mubr.f32.mxu1 %v19590_v2 }
  0x46   : > { %626 = vmatmul.mubr.f32.vlgmr.msra.gmra.mrb[0].mxu0 %v19673_v13 }
  0x47   : > { %631 = vmatprep.mubr.f32.mxu0 %v19590_v2  ;;  %17746 = vmatpush1.bf16.msra.mxu0 %v17745_v39 }
  0x48   : > { %1215 = vmatmul.mubr.f32.vlgmr.msra.gmra.mrb[0].mxu1 %v19673_v13  ;;  %17748 = vmatprep.subr.bf16.mxu0 %v19707_v37  ;;  %v19860_v37 = vsub.f32 %v241_v46, %v1431_v52 }
  0x49   : > { %1220 = vmatprep.mubr.f32.mxu1 %v19590_v2  ;;  %17770 = vmatpush1.bf16.msra.mxu1 %v17769_v43  ;;  %v1550_v43 = vsub.f32 %v19909_v22, %v1549_v35 }
  0x4a   : > { %635 = vmatmul.mubr.f32.gmra.mrb[2].mxu0 %v19676_v14  ;;  %17772 = vmatprep.subr.bf16.mxu1 %v19713_v41  ;;  %v19866_v41 = vsub.f32 %v247_v49, %v2020_v56  ;;  %v1543_v61 = vand.u32 4294901760, %v19860_v37  ;;  %v17783_v55 = vpack.c.bf16 %v19860_v37, %v19858_v54 }
  0x4b   : > { %640 = vmatprep.mubr.f32.mxu0 %v19590_v2  ;;  %v1551_v47 = vand.u32 4294901760, %v1550_v43 }
  0x4c   : > { %1224 = vmatmul.mubr.f32.gmra.mrb[2].mxu1 %v19676_v14  ;;  %v2132_v4 = vand.u32 4294901760, %v19866_v41  ;;  %v1544_v17 = vsub.f32 %v19860_v37, %v1543_v61  ;;  %v17807_v58 = vpack.c.bf16 %v19866_v41, %v19864_v57  ;;  %v17791_v1 = vpack.c.bf16 %v1543_v61, %v1531_v60  ;;  %v17476_v37 = vld [vmem:[%s19681_s5 + $0xc8] sm:$0x1] }
  0x4d   : > { %1229 = vmatprep.mubr.f32.mxu1 %v19590_v2  ;;  %v17468_v60 = vld [vmem:[%s19681_s5 + $0x88] sm:$0xff]  ;;  %v2652_v61 = vsel %vm224_vm1, %v17476_v37, 0 }
  0x4e   : > { %644 = vmatmul.mubr.f32.gmra.mrb[4].mxu0 %v19684_v15  ;;  %v2133_v20 = vsub.f32 %v19866_v41, %v2132_v4  ;;  %v1545_v25 = vand.u32 4294901760, %v1544_v17  ;;  %v17478_v41 = vld [vmem:[%s19681_s5 + $0xd8] sm:$0x1]  ;;  %v2672_v8 = vand.u32 4294901760, %v17468_v60  ;;  %v2676_v16 = vand.u32 4294901760, %v2652_v61 }
  0x4f   : > { %726 = vmatprep.mubr.f32.mxu0 %v19590_v2 }
  0x50   : > { %1233 = vmatmul.mubr.f32.gmra.mrb[4].mxu1 %v19684_v15  ;;  %v2134_v30 = vand.u32 4294901760, %v2133_v20  ;;  %v17779_v32 = vpack.c.bf16 %v1545_v25, %v1533_v24  ;;  %v20034_v17 = vsub.f32 %v17468_v60, %v2672_v8  ;;  %v17475_v20 = vld [vmem:[%s19681_s5 + $0xc0] sm:$0x1] }
  0x51   : > { %1315 = vmatprep.mubr.f32.mxu1 %v19590_v2  ;;  %v17467_v25 = vld [vmem:[%s19681_s5 + $0x80] sm:$0xff] }
  0x52   : > { %728 = vmatmul.mubr.f32.vlgmr.msra.gmra.mrb[0].mxu0 %v19656_v6  ;;  %v17803_v39 = vpack.c.bf16 %v2134_v30, %v2122_v29  ;;  %v17469_v30 = vld [vmem:[%s19681_s5 + $0x90] sm:$0xff] }
  0x53   : > { %733 = vmatprep.mubr.f32.mxu0 %v19590_v2  ;;  %17750 = vmatpush1.bf16.msra.mxu0 %v19719_v45  ;;  %v1429_v45 = vand.u32 4294901760, %v187_v0 }
  0x54   : > { %1317 = vmatmul.mubr.f32.vlgmr.msra.gmra.mrb[0].mxu1 %v19656_v6  ;;  %17776 = vmatprep.subr.bf16.mxu0 %v19871_v59 }
  0x55   : > { %1322 = vmatprep.mubr.f32.mxu1 %v19590_v2  ;;  %17774 = vmatpush1.bf16.msra.mxu1 %v19733_v53  ;;  %v19907_v21 = vsub.f32 %v187_v0, %v1429_v45  ;;  %v2018_v53 = vand.u32 4294901760, %v189_v5  ;;  %v19919_v31 = vpack.c.bf16 %v1433_v18, %v1429_v45 }
  0x56   : > { %735 = vmatmul.mubr.f32.gmra.mrb[2].mxu0 %v19658_v7  ;;  %17800 = vmatprep.subr.bf16.mxu1 %v19878_v63 }
  0x57   : > { %740 = vmatprep.mubr.f32.mxu0 %v19590_v2  ;;  %v19913_v27 = vsub.f32 %v189_v5, %v2018_v53  ;;  %v1537_v33 = vand.u32 4294901760, %v19907_v21  ;;  %v19925_v34 = vpack.c.bf16 %v2022_v23, %v2018_v53  ;;  %v17785_v62 = vpack.c.bf16 %v19909_v22, %v19907_v21  ;;  %v17477_v23 = vld [vmem:[%s19681_s5 + $0xd0] sm:$0x1] }
  0x58   : > { %1324 = vmatmul.mubr.f32.gmra.mrb[2].mxu1 %v19658_v7  ;;  %v17815_v5 = vpack.c.bf16 %v2132_v4, %v2120_v3  ;;  %v17470_v3 = vld [vmem:[%s19681_s5 + $0x98] sm:$0xff]  ;;  %v2658_v4 = vsel %vm224_vm1, %v17478_v41, 0  ;;  %v2776_v22 = vand.u32 4294901760, %v20034_v17 }
  0x59   : > { %1329 = vmatprep.mubr.f32.mxu1 %v19590_v2  ;;  %v2126_v36 = vand.u32 4294901760, %v19913_v27  ;;  %v1538_v42 = vsub.f32 %v19907_v21, %v1537_v33  ;;  %v17809_v0 = vpack.c.bf16 %v19915_v28, %v19913_v27  ;;  %v17793_v54 = vpack.c.bf16 %v1549_v35, %v1537_v33 }
  0x5a   : > { %742 = vmatmul.mubr.f32.gmra.mrb[4].mxu0 %v19660_v9  ;;  %v3261_v45 = vand.u32 4294901760, %v17470_v3  ;;  %v3265_v18 = vand.u32 4294901760, %v2658_v4  ;;  %v20047_v21 = vpack.c.bf16 %v2676_v16, %v2672_v8  ;;  %v2655_v33 = vsel %vm224_vm1, %v17477_v23, 0 }
  0x5b   : > { %816 = vmatprep.mubr.f32.mxu0 %v19590_v2  ;;  %v2127_v44 = vsub.f32 %v19913_v27, %v2126_v36  ;;  %v1539_v46 = vand.u32 4294901760, %v1538_v42  ;;  %v17817_v57 = vpack.c.bf16 %v2138_v38, %v2126_v36  ;;  %v2649_v27 = vsel %vm224_vm1, %v17475_v20, 0 }
  0x5c   : > { %1331 = vmatmul.mubr.f32.gmra.mrb[4].mxu1 %v19660_v9  ;;  %v20040_v19 = vsub.f32 %v17470_v3, %v3261_v45  ;;  %v20054_v24 = vpack.c.bf16 %v3265_v18, %v3261_v45  ;;  %v2777_v35 = vsub.f32 %v20034_v17, %v2776_v22  ;;  %v2678_v36 = vand.u32 4294901760, %v2649_v27 }
  0x5d   : > { %1405 = vmatprep.mubr.f32.mxu1 %v19590_v2  ;;  %v2128_v49 = vand.u32 4294901760, %v2127_v44  ;;  %v17781_v52 = vpack.c.bf16 %v1551_v47, %v1539_v46  ;;  %v3267_v44 = vand.u32 4294901760, %v2655_v33 }
  0x5e   : > { %818 = vmatmul.mubr.f32.vlgmr.msra.gmra.mrb[0].mxu0 %v19656_v6  ;;  %v3365_v28 = vand.u32 4294901760, %v20040_v19  ;;  %v20085_v43 = vsub.f32 %v2649_v27, %v2678_v36  ;;  %v2778_v40 = vand.u32 4294901760, %v2777_v35 }
  0x5f   : > { %823 = vmatprep.mubr.f32.mxu0 %v19590_v2  ;;  %17778 = vmatpush1.bf16.msra.mxu0 %v19919_v31  ;;  %v17805_v56 = vpack.c.bf16 %v2140_v51, %v2128_v49  ;;  %v20091_v49 = vsub.f32 %v2655_v33, %v3267_v44 }
  0x60   : > { %1407 = vmatmul.mubr.f32.vlgmr.msra.gmra.mrb[0].mxu1 %v19656_v6  ;;  %17780 = vmatprep.subr.bf16.mxu0 %v17779_v32  ;;  %v3366_v38 = vsub.f32 %v20040_v19, %v3365_v28 }
  0x61   : > { %1412 = vmatprep.mubr.f32.mxu1 %v19590_v2  ;;  %17802 = vmatpush1.bf16.msra.mxu1 %v19925_v34 }
  0x62   : > { %825 = vmatmul.mubr.f32.gmra.mrb[2].mxu0 %v19658_v7  ;;  %17804 = vmatprep.subr.bf16.mxu1 %v17803_v39  ;;  %v3367_v51 = vand.u32 4294901760, %v3366_v38 }
  0x63   : > { %830 = vmatprep.mubr.f32.mxu0 %v19590_v2 }
  0x64   : > { %1414 = vmatmul.mubr.f32.gmra.mrb[2].mxu1 %v19658_v7 }
  0x65   : > { %1419 = vmatprep.mubr.f32.mxu1 %v19590_v2 }
  0x66   : > { %832 = vmatmul.mubr.f32.gmra.mrb[4].mxu0 %v19660_v9 }
  0x67   : > { %1495 = vmatprep.mubr.f32.mxu0 %v19590_v2 }
  0x68   : > { %1421 = vmatmul.mubr.f32.gmra.mrb[4].mxu1 %v19660_v9 }
  0x69   : > { %2084 = vmatprep.mubr.f32.mxu1 %v19590_v2 }
  0x6a   : > { %1501 = vmatmul.mubr.f32.vlgmr.msra.gmra.mrb[6].mxu0 %v19723_v48 }
  0x6b   : > { %1506 = vmatprep.mubr.f32.mxu0 %v19590_v2  ;;  %17782 = vmatpush1.bf16.msra.mxu0 %v17781_v52 }
  0x6c   : > { %2090 = vmatmul.mubr.f32.vlgmr.msra.gmra.mrb[6].mxu1 %v19723_v48  ;;  %17784 = vmatprep.subr.bf16.mxu0 %v17783_v55 }
  0x6d   : > { %2095 = vmatprep.mubr.f32.mxu1 %v19590_v2  ;;  %17806 = vmatpush1.bf16.msra.mxu1 %v17805_v56 }
  0x6e   : > { %1512 = vmatmul.mubr.f32.gmra.mrb[8].mxu0 %v19728_v50  ;;  %17808 = vmatprep.subr.bf16.mxu1 %v17807_v58  ;;  %v2794_v58 = vand.u32 4294901760, %v20085_v43 }
  0x6f   : > { %1517 = vmatprep.mubr.f32.mxu0 %v19590_v2 }
  0x70   : > { %2101 = vmatmul.mubr.f32.gmra.mrb[8].mxu1 %v19728_v50 }
  0x71   : > { %2106 = vmatprep.mubr.f32.mxu1 %v19590_v2 }
  0x72   : > { %1523 = vmatmul.mubr.f32.gmra.mrb[10].mxu0 %v19773_v26 }
  0x73   : > { %1613 = vmatprep.mubr.f32.mxu0 %v19590_v2 }
  0x74   : > { %2112 = vmatmul.mubr.f32.gmra.mrb[10].mxu1 %v19773_v26 }
  0x75   : > { %2202 = vmatprep.mubr.f32.mxu1 %v19590_v2 }
  0x76   : > { %1615 = vmatmul.mubr.f32.vlgmr.msra.gmra.mrb[6].mxu0 %v19656_v6 }
  0x77   : > { %1620 = vmatprep.mubr.f32.mxu0 %v19590_v2  ;;  %17786 = vmatpush1.bf16.msra.mxu0 %v17785_v62 }
  0x78   : > { %2204 = vmatmul.mubr.f32.vlgmr.msra.gmra.mrb[6].mxu1 %v19656_v6  ;;  %17788 = vmatprep.subr.bf16.mxu0 %v19871_v59 }
  0x79   : > { %2209 = vmatprep.mubr.f32.mxu1 %v19590_v2  ;;  %17810 = vmatpush1.bf16.msra.mxu1 %v17809_v0 }
  0x7a   : > { %1622 = vmatmul.mubr.f32.gmra.mrb[8].mxu0 %v19658_v7  ;;  %17812 = vmatprep.subr.bf16.mxu1 %v19878_v63 }
  0x7b   : > { %1627 = vmatprep.mubr.f32.mxu0 %v19590_v2 }
  0x7c   : > { %2211 = vmatmul.mubr.f32.gmra.mrb[8].mxu1 %v19658_v7 }
  0x7d   : > { %2216 = vmatprep.mubr.f32.mxu1 %v19590_v2 }
  0x7e   : > { %1629 = vmatmul.mubr.f32.gmra.mrb[10].mxu0 %v19660_v9 }
  0x7f   : > { %1707 = vmatprep.mubr.f32.mxu0 %v19590_v2 }
  0x80   : > { %2218 = vmatmul.mubr.f32.gmra.mrb[10].mxu1 %v19660_v9 }
  0x81   : > { %2296 = vmatprep.mubr.f32.mxu1 %v19590_v2 }
  0x82   : > { %1710 = vmatmul.mubr.f32.vlgmr.msra.gmra.mrb[6].mxu0 %v19664_v10 }
  0x83   : > { %1715 = vmatprep.mubr.f32.mxu0 %v19590_v2  ;;  %17790 = vmatpush1.bf16.msra.mxu0 %v19919_v31 }
  0x84   : > { %2299 = vmatmul.mubr.f32.vlgmr.msra.gmra.mrb[6].mxu1 %v19664_v10  ;;  %17792 = vmatprep.subr.bf16.mxu0 %v17791_v1 }
  0x85   : > { %2304 = vmatprep.mubr.f32.mxu1 %v19590_v2  ;;  %17814 = vmatpush1.bf16.msra.mxu1 %v19925_v34 }
  0x86   : > { %1718 = vmatmul.mubr.f32.gmra.mrb[8].mxu0 %v19667_v11  ;;  %17816 = vmatprep.subr.bf16.mxu1 %v17815_v5  ;;  %v3383_v5 = vand.u32 4294901760, %v20091_v49 }
  0x87   : > { %1723 = vmatprep.mubr.f32.mxu0 %v19590_v2 }
  0x88   : > { %2307 = vmatmul.mubr.f32.gmra.mrb[8].mxu1 %v19667_v11  ;;  %v3384_v60 = vsub.f32 %v20091_v49, %v3383_v5 }
  0x89   : > { %2312 = vmatprep.mubr.f32.mxu1 %v19590_v2 }
  0x8a   : > { %1726 = vmatmul.mubr.f32.gmra.mrb[10].mxu0 %v19670_v12  ;;  %v3385_v8 = vand.u32 4294901760, %v3384_v60 }
  0x8b   : > { %1800 = vmatprep.mubr.f32.mxu0 %v19590_v2 }
  0x8c   : > { %2315 = vmatmul.mubr.f32.gmra.mrb[10].mxu1 %v19670_v12 }
  0x8d   : > { %2389 = vmatprep.mubr.f32.mxu1 %v19590_v2 }
  0x8e   : > { %1804 = vmatmul.mubr.f32.vlgmr.msra.gmra.mrb[6].mxu0 %v19673_v13 }
  0x8f   : > { %1809 = vmatprep.mubr.f32.mxu0 %v19590_v2  ;;  %17794 = vmatpush1.bf16.msra.mxu0 %v17793_v54 }
  0x90   : > { %2393 = vmatmul.mubr.f32.vlgmr.msra.gmra.mrb[6].mxu1 %v19673_v13  ;;  %17796 = vmatprep.subr.bf16.mxu0 %v19871_v59  ;;  %v20036_v59 = vsub.f32 %v2652_v61, %v2676_v16 }
  0x91   : > { %2398 = vmatprep.mubr.f32.mxu1 %v19590_v2  ;;  %17818 = vmatpush1.bf16.msra.mxu1 %v17817_v57  ;;  %v2795_v57 = vsub.f32 %v20085_v43, %v2794_v58 }
  0x92   : > { %1813 = vmatmul.mubr.f32.gmra.mrb[8].mxu0 %v19676_v14  ;;  %17820 = vmatprep.subr.bf16.mxu1 %v19878_v63  ;;  %v20042_v63 = vsub.f32 %v2658_v4, %v3265_v18  ;;  %v2788_v53 = vand.u32 4294901760, %v20036_v59  ;;  %v17831_v45 = vpack.c.bf16 %v20036_v59, %v20034_v17 }
  0x93   : > { %1818 = vmatprep.mubr.f32.mxu0 %v19590_v2  ;;  %v2796_v3 = vand.u32 4294901760, %v2795_v57 }
  0x94   : > { %2402 = vmatmul.mubr.f32.gmra.mrb[8].mxu1 %v19676_v14  ;;  %v3377_v29 = vand.u32 4294901760, %v20042_v63  ;;  %v2789_v32 = vsub.f32 %v20036_v59, %v2788_v53  ;;  %v17855_v20 = vpack.c.bf16 %v20042_v63, %v20040_v19  ;;  %v17839_v27 = vpack.c.bf16 %v2788_v53, %v2776_v22  ;;  %v17480_v59 = vld [vmem:[%s19681_s5 + $0xe8] sm:$0x1] }
  0x95   : > { %2407 = vmatprep.mubr.f32.mxu1 %v19590_v2  ;;  %v17472_v22 = vld [vmem:[%s19681_s5 + $0xa8] sm:$0xff]  ;;  %v2664_v53 = vsel %vm224_vm1, %v17480_v59, 0 }
  0x96   : > { %1822 = vmatmul.mubr.f32.gmra.mrb[10].mxu0 %v19684_v15  ;;  %v3378_v39 = vsub.f32 %v20042_v63, %v3377_v29  ;;  %v2790_v46 = vand.u32 4294901760, %v2789_v32  ;;  %v17482_v63 = vld [vmem:[%s19681_s5 + $0xf8] sm:$0x1]  ;;  %v3850_v33 = vand.u32 4294901760, %v17472_v22  ;;  %v3854_v35 = vand.u32 4294901760, %v2664_v53 }
  0x97   : > { %1904 = vmatprep.mubr.f32.mxu0 %v19590_v2 }
  0x98   : > { %2411 = vmatmul.mubr.f32.gmra.mrb[10].mxu1 %v19684_v15  ;;  %v3379_v52 = vand.u32 4294901760, %v3378_v39  ;;  %v17827_v62 = vpack.c.bf16 %v2790_v46, %v2778_v40  ;;  %v20210_v32 = vsub.f32 %v17472_v22, %v3850_v33  ;;  %v17479_v39 = vld [vmem:[%s19681_s5 + $0xe0] sm:$0x1] }
  0x99   : > { %2493 = vmatprep.mubr.f32.mxu1 %v19590_v2  ;;  %v17471_v46 = vld [vmem:[%s19681_s5 + $0xa0] sm:$0xff] }
  0x9a   : > { %1906 = vmatmul.mubr.f32.vlgmr.msra.gmra.mrb[6].mxu0 %v19656_v6  ;;  %v17851_v54 = vpack.c.bf16 %v3379_v52, %v3367_v51  ;;  %v17473_v52 = vld [vmem:[%s19681_s5 + $0xb0] sm:$0xff] }
  0x9b   : > { %1911 = vmatprep.mubr.f32.mxu0 %v19590_v2  ;;  %17798 = vmatpush1.bf16.msra.mxu0 %v19919_v31  ;;  %v2674_v31 = vand.u32 4294901760, %v17467_v25 }
  0x9c   : > { %2495 = vmatmul.mubr.f32.vlgmr.msra.gmra.mrb[6].mxu1 %v19656_v6  ;;  %17824 = vmatprep.subr.bf16.mxu0 %v20047_v21 }
  0x9d   : > { %2500 = vmatprep.mubr.f32.mxu1 %v19590_v2  ;;  %17822 = vmatpush1.bf16.msra.mxu1 %v19925_v34  ;;  %v20083_v42 = vsub.f32 %v17467_v25, %v2674_v31  ;;  %v3263_v34 = vand.u32 4294901760, %v17469_v30  ;;  %v20095_v55 = vpack.c.bf16 %v2678_v36, %v2674_v31 }
  0x9e   : > { %1913 = vmatmul.mubr.f32.gmra.mrb[8].mxu0 %v19658_v7  ;;  %17848 = vmatprep.subr.bf16.mxu1 %v20054_v24 }
  0x9f   : > { %1918 = vmatprep.mubr.f32.mxu0 %v19590_v2  ;;  %v20089_v47 = vsub.f32 %v17469_v30, %v3263_v34  ;;  %v2782_v56 = vand.u32 4294901760, %v20083_v42  ;;  %v20101_v0 = vpack.c.bf16 %v3267_v44, %v3263_v34  ;;  %v17833_v23 = vpack.c.bf16 %v20085_v43, %v20083_v42  ;;  %v17481_v44 = vld [vmem:[%s19681_s5 + $0xf0] sm:$0x1] }
  0xa0   : > { %2502 = vmatmul.mubr.f32.gmra.mrb[8].mxu1 %v19658_v7  ;;  %v17863_v30 = vpack.c.bf16 %v3377_v29, %v3365_v28  ;;  %v17474_v28 = vld [vmem:[%s19681_s5 + $0xb8] sm:$0xff]  ;;  %v2670_v29 = vsel %vm224_vm1, %v17482_v63, 0  ;;  %v3954_v43 = vand.u32 4294901760, %v20210_v32 }
  0xa1   : > { %2507 = vmatprep.mubr.f32.mxu1 %v19590_v2  ;;  %v3371_v1 = vand.u32 4294901760, %v20089_v47  ;;  %v2783_v37 = vsub.f32 %v20083_v42, %v2782_v56  ;;  %v17857_v25 = vpack.c.bf16 %v20091_v49, %v20089_v47  ;;  %v17841_v17 = vpack.c.bf16 %v2794_v58, %v2782_v56 }
  0xa2   : > { %1920 = vmatmul.mubr.f32.gmra.mrb[10].mxu0 %v19660_v9  ;;  %v4439_v31 = vand.u32 4294901760, %v17474_v28  ;;  %v4443_v36 = vand.u32 4294901760, %v2670_v29  ;;  %v20223_v42 = vpack.c.bf16 %v3854_v35, %v3850_v33  ;;  %v2667_v56 = vsel %vm224_vm1, %v17481_v44, 0 }
  0xa3   : > { %1994 = vmatprep.mubr.f32.mxu0 %v19590_v2  ;;  %v3372_v41 = vsub.f32 %v20089_v47, %v3371_v1  ;;  %v2784_v61 = vand.u32 4294901760, %v2783_v37  ;;  %v17865_v19 = vpack.c.bf16 %v3383_v5, %v3371_v1  ;;  %v2661_v47 = vsel %vm224_vm1, %v17479_v39, 0 }
  0xa4   : > { %2509 = vmatmul.mubr.f32.gmra.mrb[10].mxu1 %v19660_v9  ;;  %v20216_v38 = vsub.f32 %v17474_v28, %v4439_v31  ;;  %v20230_v40 = vpack.c.bf16 %v4443_v36, %v4439_v31  ;;  %v3955_v58 = vsub.f32 %v20210_v32, %v3954_v43  ;;  %v3856_v1 = vand.u32 4294901760, %v2661_v47 }
  0xa5   : > { %2583 = vmatprep.mubr.f32.mxu1 %v19590_v2  ;;  %v3373_v4 = vand.u32 4294901760, %v3372_v41  ;;  %v17829_v16 = vpack.c.bf16 %v2796_v3, %v2784_v61  ;;  %v4445_v41 = vand.u32 4294901760, %v2667_v56 }
  0xa6   : > { %1996 = vmatmul.mubr.f32.vlgmr.msra.gmra.mrb[6].mxu0 %v19656_v6  ;;  %v4543_v49 = vand.u32 4294901760, %v20216_v38  ;;  %v20261_v57 = vsub.f32 %v2661_v47, %v3856_v1  ;;  %v3956_v60 = vand.u32 4294901760, %v3955_v58 }
  0xa7   : > { %2001 = vmatprep.mubr.f32.mxu0 %v19590_v2  ;;  %17826 = vmatpush1.bf16.msra.mxu0 %v20095_v55  ;;  %v17853_v18 = vpack.c.bf16 %v3385_v8, %v3373_v4  ;;  %v20267_v4 = vsub.f32 %v2667_v56, %v4445_v41 }
  0xa8   : > { %2585 = vmatmul.mubr.f32.vlgmr.msra.gmra.mrb[6].mxu1 %v19656_v6  ;;  %17828 = vmatprep.subr.bf16.mxu0 %v17827_v62  ;;  %v4544_v5 = vsub.f32 %v20216_v38, %v4543_v49 }
  0xa9   : > { %2590 = vmatprep.mubr.f32.mxu1 %v19590_v2  ;;  %17850 = vmatpush1.bf16.msra.mxu1 %v20101_v0 }
  0xaa   : > { %2003 = vmatmul.mubr.f32.gmra.mrb[8].mxu0 %v19658_v7  ;;  %17852 = vmatprep.subr.bf16.mxu1 %v17851_v54  ;;  %v4545_v8 = vand.u32 4294901760, %v4544_v5 }
  0xab   : > { %2008 = vmatprep.mubr.f32.mxu0 %v19590_v2 }
  0xac   : > { %2592 = vmatmul.mubr.f32.gmra.mrb[8].mxu1 %v19658_v7 }
  0xad   : > { %2597 = vmatprep.mubr.f32.mxu1 %v19590_v2 }
  0xae   : > { %2010 = vmatmul.mubr.f32.gmra.mrb[10].mxu0 %v19660_v9 }
  0xaf   : > { %2740 = vmatprep.mubr.f32.mxu0 %v19590_v2 }
  0xb0   : > { %2599 = vmatmul.mubr.f32.gmra.mrb[10].mxu1 %v19660_v9 }
  0xb1   : > { %3329 = vmatprep.mubr.f32.mxu1 %v19590_v2 }
  0xb2   : > { %2746 = vmatmul.mubr.f32.vlgmr.msra.gmra.mrb[12].mxu0 %v19723_v48 }
  0xb3   : > { %2751 = vmatprep.mubr.f32.mxu0 %v19590_v2  ;;  %17830 = vmatpush1.bf16.msra.mxu0 %v17829_v16 }
  0xb4   : > { %3335 = vmatmul.mubr.f32.vlgmr.msra.gmra.mrb[12].mxu1 %v19723_v48  ;;  %17832 = vmatprep.subr.bf16.mxu0 %v17831_v45 }
  0xb5   : > { %3340 = vmatprep.mubr.f32.mxu1 %v19590_v2  ;;  %17854 = vmatpush1.bf16.msra.mxu1 %v17853_v18 }
  0xb6   : > { %2757 = vmatmul.mubr.f32.gmra.mrb[14].mxu0 %v19728_v50  ;;  %17856 = vmatprep.subr.bf16.mxu1 %v17855_v20  ;;  %v3972_v20 = vand.u32 4294901760, %v20261_v57 }
  0xb7   : > { %2762 = vmatprep.mubr.f32.mxu0 %v19590_v2 }
  0xb8   : > { %3346 = vmatmul.mubr.f32.gmra.mrb[14].mxu1 %v19728_v50 }
  0xb9   : > { %3351 = vmatprep.mubr.f32.mxu1 %v19590_v2 }
  0xba   : > { %2768 = vmatmul.mubr.f32.gmra.mrb[16].mxu0 %v19773_v26 }
  0xbb   : > { %2858 = vmatprep.mubr.f32.mxu0 %v19590_v2 }
  0xbc   : > { %3357 = vmatmul.mubr.f32.gmra.mrb[16].mxu1 %v19773_v26 }
  0xbd   : > { %3447 = vmatprep.mubr.f32.mxu1 %v19590_v2 }
  0xbe   : > { %2860 = vmatmul.mubr.f32.vlgmr.msra.gmra.mrb[12].mxu0 %v19656_v6 }
  0xbf   : > { %2865 = vmatprep.mubr.f32.mxu0 %v19590_v2  ;;  %17834 = vmatpush1.bf16.msra.mxu0 %v17833_v23 }
  0xc0   : > { %3449 = vmatmul.mubr.f32.vlgmr.msra.gmra.mrb[12].mxu1 %v19656_v6  ;;  %17836 = vmatprep.subr.bf16.mxu0 %v20047_v21 }
  0xc1   : > { %3454 = vmatprep.mubr.f32.mxu1 %v19590_v2  ;;  %17858 = vmatpush1.bf16.msra.mxu1 %v17857_v25 }
  0xc2   : > { %2867 = vmatmul.mubr.f32.gmra.mrb[14].mxu0 %v19658_v7  ;;  %17860 = vmatprep.subr.bf16.mxu1 %v20054_v24 }
  0xc3   : > { %2872 = vmatprep.mubr.f32.mxu0 %v19590_v2 }
  0xc4   : > { %3456 = vmatmul.mubr.f32.gmra.mrb[14].mxu1 %v19658_v7 }
  0xc5   : > { %3461 = vmatprep.mubr.f32.mxu1 %v19590_v2 }
  0xc6   : > { %2874 = vmatmul.mubr.f32.gmra.mrb[16].mxu0 %v19660_v9 }
  0xc7   : > { %2952 = vmatprep.mubr.f32.mxu0 %v19590_v2 }
  0xc8   : > { %3463 = vmatmul.mubr.f32.gmra.mrb[16].mxu1 %v19660_v9 }
  0xc9   : > { %3541 = vmatprep.mubr.f32.mxu1 %v19590_v2 }
  0xca   : > { %2955 = vmatmul.mubr.f32.vlgmr.msra.gmra.mrb[12].mxu0 %v19664_v10 }
  0xcb   : > { %2960 = vmatprep.mubr.f32.mxu0 %v19590_v2  ;;  %17838 = vmatpush1.bf16.msra.mxu0 %v20095_v55 }
  0xcc   : > { %3544 = vmatmul.mubr.f32.vlgmr.msra.gmra.mrb[12].mxu1 %v19664_v10  ;;  %17840 = vmatprep.subr.bf16.mxu0 %v17839_v27 }
  0xcd   : > { %3549 = vmatprep.mubr.f32.mxu1 %v19590_v2  ;;  %17862 = vmatpush1.bf16.msra.mxu1 %v20101_v0 }
  0xce   : > { %2963 = vmatmul.mubr.f32.gmra.mrb[14].mxu0 %v19667_v11  ;;  %17864 = vmatprep.subr.bf16.mxu1 %v17863_v30  ;;  %v4561_v30 = vand.u32 4294901760, %v20267_v4 }
  0xcf   : > { %2968 = vmatprep.mubr.f32.mxu0 %v19590_v2 }
  0xd0   : > { %3552 = vmatmul.mubr.f32.gmra.mrb[14].mxu1 %v19667_v11  ;;  %v4562_v22 = vsub.f32 %v20267_v4, %v4561_v30 }
  0xd1   : > { %3557 = vmatprep.mubr.f32.mxu1 %v19590_v2 }
  0xd2   : > { %2971 = vmatmul.mubr.f32.gmra.mrb[16].mxu0 %v19670_v12  ;;  %v4563_v33 = vand.u32 4294901760, %v4562_v22 }
  0xd3   : > { %3045 = vmatprep.mubr.f32.mxu0 %v19590_v2 }
  0xd4   : > { %3560 = vmatmul.mubr.f32.gmra.mrb[16].mxu1 %v19670_v12 }
  0xd5   : > { %3634 = vmatprep.mubr.f32.mxu1 %v19590_v2 }
  0xd6   : > { %3049 = vmatmul.mubr.f32.vlgmr.msra.gmra.mrb[12].mxu0 %v19673_v13 }
  0xd7   : > { %3054 = vmatprep.mubr.f32.mxu0 %v19590_v2  ;;  %17842 = vmatpush1.bf16.msra.mxu0 %v17841_v17 }
  0xd8   : > { %3638 = vmatmul.mubr.f32.vlgmr.msra.gmra.mrb[12].mxu1 %v19673_v13  ;;  %17844 = vmatprep.subr.bf16.mxu0 %v20047_v21  ;;  %v20212_v21 = vsub.f32 %v2664_v53, %v3854_v35 }
  0xd9   : > { %3643 = vmatprep.mubr.f32.mxu1 %v19590_v2  ;;  %17866 = vmatpush1.bf16.msra.mxu1 %v17865_v19  ;;  %v3973_v19 = vsub.f32 %v20261_v57, %v3972_v20 }
  0xda   : > { %3058 = vmatmul.mubr.f32.gmra.mrb[14].mxu0 %v19676_v14  ;;  %17868 = vmatprep.subr.bf16.mxu1 %v20054_v24  ;;  %v20218_v24 = vsub.f32 %v2670_v29, %v4443_v36  ;;  %v3966_v34 = vand.u32 4294901760, %v20212_v21  ;;  %v17879_v31 = vpack.c.bf16 %v20212_v21, %v20210_v32 }
  0xdb   : > { %3063 = vmatprep.mubr.f32.mxu0 %v19590_v2  ;;  %v3974_v28 = vand.u32 4294901760, %v3973_v19 }
  0xdc   : > { %3647 = vmatmul.mubr.f32.gmra.mrb[14].mxu1 %v19676_v14  ;;  %v4555_v51 = vand.u32 4294901760, %v20218_v24  ;;  %v3967_v62 = vsub.f32 %v20212_v21, %v3966_v34  ;;  %v17903_v39 = vpack.c.bf16 %v20218_v24, %v20216_v38  ;;  %v17887_v47 = vpack.c.bf16 %v3966_v34, %v3954_v43  ;;  %v17516_v21 = vld [vmem:[%s19681_s5 + $0x148] sm:$0x1] }
  0xdd   : > { %3652 = vmatprep.mubr.f32.mxu1 %v19590_v2  ;;  %v17508_v43 = vld [vmem:[%s19681_s5 + $0x108] sm:$0xff]  ;;  %v5074_v34 = vsel %vm224_vm1, %v17516_v21, 0 }
  0xde   : > { %3067 = vmatmul.mubr.f32.gmra.mrb[16].mxu0 %v19684_v15  ;;  %v4556_v54 = vsub.f32 %v20218_v24, %v4555_v51  ;;  %v3968_v61 = vand.u32 4294901760, %v3967_v62  ;;  %v17518_v24 = vld [vmem:[%s19681_s5 + $0x158] sm:$0x1]  ;;  %v5094_v56 = vand.u32 4294901760, %v17508_v43  ;;  %v5098_v58 = vand.u32 4294901760, %v5074_v34 }
  0xdf   : > { %3149 = vmatprep.mubr.f32.mxu0 %v19590_v2 }
  0xe0   : > { %3656 = vmatmul.mubr.f32.gmra.mrb[16].mxu1 %v19684_v15  ;;  %v4557_v16 = vand.u32 4294901760, %v4556_v54  ;;  %v17875_v23 = vpack.c.bf16 %v3968_v61, %v3956_v60  ;;  %v20386_v62 = vsub.f32 %v17508_v43, %v5094_v56  ;;  %v17515_v54 = vld [vmem:[%s19681_s5 + $0x140] sm:$0x1] }
  0xe1   : > { %3738 = vmatprep.mubr.f32.mxu1 %v19590_v2  ;;  %v17507_v61 = vld [vmem:[%s19681_s5 + $0x100] sm:$0xff] }
  0xe2   : > { %3151 = vmatmul.mubr.f32.vlgmr.msra.gmra.mrb[12].mxu0 %v19656_v6  ;;  %v17899_v17 = vpack.c.bf16 %v4557_v16, %v4545_v8  ;;  %v17509_v16 = vld [vmem:[%s19681_s5 + $0x110] sm:$0xff] }
  0xe3   : > { %3156 = vmatprep.mubr.f32.mxu0 %v19590_v2  ;;  %17846 = vmatpush1.bf16.msra.mxu0 %v20095_v55  ;;  %v3852_v55 = vand.u32 4294901760, %v17471_v46 }
  0xe4   : > { %3740 = vmatmul.mubr.f32.vlgmr.msra.gmra.mrb[12].mxu1 %v19656_v6  ;;  %17872 = vmatprep.subr.bf16.mxu0 %v20223_v42 }
  0xe5   : > { %3745 = vmatprep.mubr.f32.mxu1 %v19590_v2  ;;  %17870 = vmatpush1.bf16.msra.mxu1 %v20101_v0  ;;  %v20259_v37 = vsub.f32 %v17471_v46, %v3852_v55  ;;  %v4441_v0 = vand.u32 4294901760, %v17473_v52  ;;  %v20271_v45 = vpack.c.bf16 %v3856_v1, %v3852_v55 }
  0xe6   : > { %3158 = vmatmul.mubr.f32.gmra.mrb[14].mxu0 %v19658_v7  ;;  %17896 = vmatprep.subr.bf16.mxu1 %v20230_v40 }
  0xe7   : > { %3163 = vmatprep.mubr.f32.mxu0 %v19590_v2  ;;  %v20265_v3 = vsub.f32 %v17473_v52, %v4441_v0  ;;  %v3960_v18 = vand.u32 4294901760, %v20259_v37  ;;  %v20277_v25 = vpack.c.bf16 %v4445_v41, %v4441_v0  ;;  %v17881_v44 = vpack.c.bf16 %v20261_v57, %v20259_v37  ;;  %v17517_v41 = vld [vmem:[%s19681_s5 + $0x150] sm:$0x1] }
  0xe8   : > { %3747 = vmatmul.mubr.f32.gmra.mrb[14].mxu1 %v19658_v7  ;;  %v17911_v52 = vpack.c.bf16 %v4555_v51, %v4543_v49  ;;  %v17510_v49 = vld [vmem:[%s19681_s5 + $0x118] sm:$0xff]  ;;  %v5080_v51 = vsel %vm224_vm1, %v17518_v24, 0  ;;  %v5198_v57 = vand.u32 4294901760, %v20386_v62 }
  0xe9   : > { %3752 = vmatprep.mubr.f32.mxu1 %v19590_v2  ;;  %v4549_v27 = vand.u32 4294901760, %v20265_v3  ;;  %v3961_v59 = vsub.f32 %v20259_v37, %v3960_v18  ;;  %v17905_v46 = vpack.c.bf16 %v20267_v4, %v20265_v3  ;;  %v17889_v32 = vpack.c.bf16 %v3972_v20, %v3960_v18 }
  0xea   : > { %3165 = vmatmul.mubr.f32.gmra.mrb[16].mxu0 %v19660_v9  ;;  %v5683_v55 = vand.u32 4294901760, %v17510_v49  ;;  %v5687_v1 = vand.u32 4294901760, %v5080_v51  ;;  %v20399_v37 = vpack.c.bf16 %v5098_v58, %v5094_v56  ;;  %v5077_v18 = vsel %vm224_vm1, %v17517_v41, 0 }
  0xeb   : > { %3239 = vmatprep.mubr.f32.mxu0 %v19590_v2  ;;  %v4550_v63 = vsub.f32 %v20265_v3, %v4549_v27  ;;  %v3962_v53 = vand.u32 4294901760, %v3961_v59  ;;  %v17913_v38 = vpack.c.bf16 %v4561_v30, %v4549_v27  ;;  %v5071_v3 = vsel %vm224_vm1, %v17515_v54, 0 }
  0xec   : > { %3754 = vmatmul.mubr.f32.gmra.mrb[16].mxu1 %v19660_v9  ;;  %v20394_v5 = vsub.f32 %v5080_v51, %v5687_v1  ;;  %v20407_v60 = vpack.c.bf16 %v5687_v1, %v5683_v55  ;;  %v5199_v20 = vsub.f32 %v20386_v62, %v5198_v57  ;;  %v5096_v27 = vand.u32 4294901760, %v17507_v61 }
  0xed   : > { %3828 = vmatprep.mubr.f32.mxu1 %v19590_v2  ;;  %v4551_v29 = vand.u32 4294901760, %v4550_v63  ;;  %v17877_v35 = vpack.c.bf16 %v3974_v28, %v3962_v53  ;;  %v5100_v30 = vand.u32 4294901760, %v5071_v3  ;;  %v5685_v63 = vand.u32 4294901760, %v17509_v16 }
  0xee   : > { %3241 = vmatmul.mubr.f32.vlgmr.msra.gmra.mrb[12].mxu0 %v19656_v6  ;;  %v5799_v8 = vand.u32 4294901760, %v20394_v5  ;;  %v5689_v22 = vand.u32 4294901760, %v5077_v18  ;;  %v5200_v53 = vand.u32 4294901760, %v5199_v20 }
  0xef   : > { %3246 = vmatprep.mubr.f32.mxu0 %v19590_v2  ;;  %17874 = vmatpush1.bf16.msra.mxu0 %v20271_v45  ;;  %v17901_v36 = vpack.c.bf16 %v4563_v33, %v4551_v29  ;;  %v20442_v19 = vsub.f32 %v5071_v3, %v5100_v30  ;;  %v20446_v33 = vsub.f32 %v17509_v16, %v5685_v63  ;;  %v20478_v16 = vpop.permute.xlu1 %211 }
  0xf0   : > { %3830 = vmatmul.mubr.f32.vlgmr.msra.gmra.mrb[12].mxu1 %v19656_v6  ;;  %17876 = vmatprep.subr.bf16.mxu0 %v17875_v23  ;;  %v5800_v59 = vsub.f32 %v20394_v5, %v5799_v8  ;;  %v20469_v56 = vpack.c.bf16 %v5689_v22, %v5685_v63 }
  0xf1   : > { %3835 = vmatprep.mubr.f32.mxu1 %v19590_v2  ;;  %17898 = vmatpush1.bf16.msra.mxu1 %v20277_v25 }
  0xf2   : > { %3248 = vmatmul.mubr.f32.gmra.mrb[14].mxu0 %v19658_v7  ;;  %17900 = vmatprep.subr.bf16.mxu1 %v17899_v17 }
  0xf3   : > { %3253 = vmatprep.mubr.f32.mxu0 %v19590_v2 }
  0xf4   : > { %3837 = vmatmul.mubr.f32.gmra.mrb[14].mxu1 %v19658_v7 }
  0xf5   : > { %3842 = vmatprep.mubr.f32.mxu1 %v19590_v2 }
  0xf6   : > { %3255 = vmatmul.mubr.f32.gmra.mrb[16].mxu0 %v19660_v9 }
  0xf7   : > { %3918 = vmatprep.mubr.f32.mxu0 %v19590_v2 }
  0xf8   : > { %3844 = vmatmul.mubr.f32.gmra.mrb[16].mxu1 %v19660_v9 }
  0xf9   : > { %4507 = vmatprep.mubr.f32.mxu1 %v19590_v2 }
  0xfa   : > { %3924 = vmatmul.mubr.f32.vlgmr.msra.gmra.mrb[18].mxu0 %v19723_v48 }
  0xfb   : > { %3929 = vmatprep.mubr.f32.mxu0 %v19590_v2  ;;  %17878 = vmatpush1.bf16.msra.mxu0 %v17877_v35  ;;  %v20448_v35 = vsub.f32 %v5077_v18, %v5689_v22 }
  0xfc   : > { %4513 = vmatmul.mubr.f32.vlgmr.msra.gmra.mrb[18].mxu1 %v19723_v48  ;;  %17880 = vmatprep.subr.bf16.mxu0 %v17879_v31 }
  0xfd   : > { %4518 = vmatprep.mubr.f32.mxu1 %v19590_v2  ;;  %17902 = vmatpush1.bf16.msra.mxu1 %v17901_v36 }
  0xfe   : > { %3935 = vmatmul.mubr.f32.gmra.mrb[20].mxu0 %v19728_v50  ;;  %17904 = vmatprep.subr.bf16.mxu1 %v17903_v39 }
  0xff   : > { %3940 = vmatprep.mubr.f32.mxu0 %v19590_v2 }
 0x100   : > { %4524 = vmatmul.mubr.f32.gmra.mrb[20].mxu1 %v19728_v50 }
 0x101   : > { %4529 = vmatprep.mubr.f32.mxu1 %v19590_v2 }
 0x102   : > { %3946 = vmatmul.mubr.f32.gmra.mrb[22].mxu0 %v19773_v26 }
 0x103   : > { %4036 = vmatprep.mubr.f32.mxu0 %v19590_v2 }
 0x104   : > { %4535 = vmatmul.mubr.f32.gmra.mrb[22].mxu1 %v19773_v26 }
 0x105   : > { %4625 = vmatprep.mubr.f32.mxu1 %v19590_v2 }
 0x106   : > { %4038 = vmatmul.mubr.f32.vlgmr.msra.gmra.mrb[18].mxu0 %v19656_v6 }
 0x107   : > { %4043 = vmatprep.mubr.f32.mxu0 %v19590_v2  ;;  %17882 = vmatpush1.bf16.msra.mxu0 %v17881_v44  ;;  %v5801_v44 = vand.u32 4294901760, %v5800_v59 }
 0x108   : > { %4627 = vmatmul.mubr.f32.vlgmr.msra.gmra.mrb[18].mxu1 %v19656_v6  ;;  %17884 = vmatprep.subr.bf16.mxu0 %v20223_v42 }
 0x109   : > { %4632 = vmatprep.mubr.f32.mxu1 %v19590_v2  ;;  %17906 = vmatpush1.bf16.msra.mxu1 %v17905_v46 }
 0x10a   : > { %4045 = vmatmul.mubr.f32.gmra.mrb[20].mxu0 %v19658_v7  ;;  %17908 = vmatprep.subr.bf16.mxu1 %v20230_v40 }
 0x10b   : > { %4050 = vmatprep.mubr.f32.mxu0 %v19590_v2 }
 0x10c   : > { %4634 = vmatmul.mubr.f32.gmra.mrb[20].mxu1 %v19658_v7 }
 0x10d   : > { %4639 = vmatprep.mubr.f32.mxu1 %v19590_v2 }
 0x10e   : > { %4052 = vmatmul.mubr.f32.gmra.mrb[22].mxu0 %v19660_v9 }
 0x10f   : > { %4130 = vmatprep.mubr.f32.mxu0 %v19590_v2 }
 0x110   : > { %4641 = vmatmul.mubr.f32.gmra.mrb[22].mxu1 %v19660_v9 }
 0x111   : > { %4719 = vmatprep.mubr.f32.mxu1 %v19590_v2 }
 0x112   : > { %4133 = vmatmul.mubr.f32.vlgmr.msra.gmra.mrb[18].mxu0 %v19664_v10 }
 0x113   : > { %4138 = vmatprep.mubr.f32.mxu0 %v19590_v2  ;;  %17886 = vmatpush1.bf16.msra.mxu0 %v20271_v45 }
 0x114   : > { %4722 = vmatmul.mubr.f32.vlgmr.msra.gmra.mrb[18].mxu1 %v19664_v10  ;;  %17888 = vmatprep.subr.bf16.mxu0 %v17887_v47 }
 0x115   : > { %4727 = vmatprep.mubr.f32.mxu1 %v19590_v2  ;;  %17910 = vmatpush1.bf16.msra.mxu1 %v20277_v25 }
 0x116   : > { %4141 = vmatmul.mubr.f32.gmra.mrb[20].mxu0 %v19667_v11  ;;  %17912 = vmatprep.subr.bf16.mxu1 %v17911_v52 }
 0x117   : > { %4146 = vmatprep.mubr.f32.mxu0 %v19590_v2 }
 0x118   : > { %4730 = vmatmul.mubr.f32.gmra.mrb[20].mxu1 %v19667_v11 }
 0x119   : > { %4735 = vmatprep.mubr.f32.mxu1 %v19590_v2 }
 0x11a   : > { %4149 = vmatmul.mubr.f32.gmra.mrb[22].mxu0 %v19670_v12 }
 0x11b   : > { %4223 = vmatprep.mubr.f32.mxu0 %v19590_v2 }
 0x11c   : > { %4738 = vmatmul.mubr.f32.gmra.mrb[22].mxu1 %v19670_v12 }
 0x11d   : > { %4812 = vmatprep.mubr.f32.mxu1 %v19590_v2 }
 0x11e   : > { %4227 = vmatmul.mubr.f32.vlgmr.msra.gmra.mrb[18].mxu0 %v19673_v13 }
 0x11f   : > { %4232 = vmatprep.mubr.f32.mxu0 %v19590_v2  ;;  %17890 = vmatpush1.bf16.msra.mxu0 %v17889_v32  ;;  %v20456_v32 = vpack.c.bf16 %v5100_v30, %v5096_v27 }
 0x120   : > { %4816 = vmatmul.mubr.f32.vlgmr.msra.gmra.mrb[18].mxu1 %v19673_v13  ;;  %17892 = vmatprep.subr.bf16.mxu0 %v20223_v42  ;;  %v20388_v42 = vsub.f32 %v5074_v34, %v5098_v58  ;;  %v5793_v58 = vand.u32 4294901760, %v20446_v33 }
 0x121   : > { %4821 = vmatprep.mubr.f32.mxu1 %v19590_v2  ;;  %17914 = vmatpush1.bf16.msra.mxu1 %v17913_v38  ;;  %v5216_v38 = vand.u32 4294901760, %v20442_v19 }
 0x122   : > { %4236 = vmatmul.mubr.f32.gmra.mrb[20].mxu0 %v19676_v14  ;;  %17916 = vmatprep.subr.bf16.mxu1 %v20230_v40  ;;  %v20392_v40 = vsub.f32 %v17510_v49, %v5683_v55  ;;  %v5210_v0 = vand.u32 4294901760, %v20388_v42  ;;  %v5805_v55 = vand.u32 4294901760, %v20448_v35  ;;  %v5794_v59 = vsub.f32 %v20446_v33, %v5793_v58 }
 0x123   : > { %4241 = vmatprep.mubr.f32.mxu0 %v19590_v2  ;;  %v5217_v20 = vsub.f32 %v20442_v19, %v5216_v38 }
 0x124   : > { %4825 = vmatmul.mubr.f32.gmra.mrb[20].mxu1 %v19676_v14  ;;  %v5787_v4 = vand.u32 4294901760, %v20392_v40  ;;  %v5211_v23 = vsub.f32 %v20388_v42, %v5210_v0  ;;  %v5806_v63 = vsub.f32 %v20448_v35, %v5805_v55 }
 0x125   : > { %4830 = vmatprep.mubr.f32.mxu1 %v19590_v2 }
 0x126   : > { %4245 = vmatmul.mubr.f32.gmra.mrb[22].mxu0 %v19684_v15  ;;  %v5788_v17 = vsub.f32 %v20392_v40, %v5787_v4  ;;  %v5212_v28 = vand.u32 4294901760, %v5211_v23 }
 0x127   : > { %4327 = vmatprep.mubr.f32.mxu0 %v19590_v2 }
 0x128   : > { %4834 = vmatmul.mubr.f32.gmra.mrb[22].mxu1 %v19684_v15  ;;  %v5789_v39 = vand.u32 4294901760, %v5788_v17  ;;  %v17923_v34 = vpack.c.bf16 %v5212_v28, %v5200_v53 }
 0x129   : > { %4916 = vmatprep.mubr.f32.mxu1 %v19590_v2 }
 0x12a   : > { %4329 = vmatmul.mubr.f32.vlgmr.msra.gmra.mrb[18].mxu0 %v19656_v6  ;;  %v17947_v41 = vpack.c.bf16 %v5801_v44, %v5789_v39 }
 0x12b   : > { %4334 = vmatprep.mubr.f32.mxu0 %v19590_v2  ;;  %17894 = vmatpush1.bf16.msra.mxu0 %v20271_v45  ;;  %v20427_v45 = vpop.permute.xlu0 %201 }
 0x12c   : > { %4918 = vmatmul.mubr.f32.vlgmr.msra.gmra.mrb[18].mxu1 %v19656_v6  ;;  %17920 = vmatprep.subr.bf16.mxu0 %v20399_v37 }
 0x12d   : > { %4923 = vmatprep.mubr.f32.mxu1 %v19590_v2  ;;  %17918 = vmatpush1.bf16.msra.mxu1 %v20277_v25  ;;  %v20440_v25 = vsub.f32 %v17507_v61, %v5096_v27 }
 0x12e   : > { %4336 = vmatmul.mubr.f32.gmra.mrb[20].mxu0 %v19658_v7  ;;  %17944 = vmatprep.subr.bf16.mxu1 %v20407_v60 }
 0x12f   : > { %4341 = vmatprep.mubr.f32.mxu0 %v19590_v2  ;;  %v20453_v52 = vpop.permute.xlu0 %206  ;;  %v5204_v21 = vand.u32 4294901760, %v20440_v25 }
 0x130   : > { %4925 = vmatmul.mubr.f32.gmra.mrb[20].mxu1 %v19658_v7 }
 0x131   : > { %v819_v29 = vpop.f32.mrb[0].mxu0  ;;  %4930 = vmatprep.mubr.f32.mxu1 %v19590_v2  ;;  %v5205_v18 = vsub.f32 %v20440_v25, %v5204_v21 }
 0x132   : > { %v18399_v31 = vadd.f32 %v819_v29, %v20427_v45  ;;  %v821_v36 = vpop.f32.mrb[1].mxu0  ;;  %4343 = vmatmul.mubr.f32.gmra.mrb[22].mxu0 %v19660_v9 }
 0x133   : > { %v1408_v46 = vpop.f32.mrb[0].mxu1  ;;  %v18400_v47 = vadd.f32 %v821_v36, %v20427_v45  ;;  %4417 = vmatprep.mubr.f32.mxu0 %v19590_v2  ;;  %v5218_v36 = vand.u32 4294901760, %v5217_v20  ;;  %v17521_v20 = vld [vmem:[%s19681_s5 + $0x170] sm:$0x1] }
 0x134   : > { %2605 = vst [vmem:[%s20461_s17] sm:$0xff] %v18399_v31  ;;  %v18405_v24 = vadd.f32 %v1408_v46, %v20427_v45  ;;  %v1410_v43 = vpop.f32.mrb[1].mxu1  ;;  %4932 = vmatmul.mubr.f32.gmra.mrb[22].mxu1 %v19660_v9  ;;  %v5206_v31 = vand.u32 4294901760, %v5205_v18 }
 0x135   : > { %2606 = vst [vmem:[%s20461_s17 + $0x8] sm:$0xff] %v18400_v47  ;;  %v18406_v49 = vadd.f32 %v1410_v43, %v20427_v45  ;;  %v826_v51 = vpop.f32.mrb[2].mxu0  ;;  %5006 = vmatprep.mubr.f32.mxu1 %v19590_v2  ;;  %v5795_v47 = vand.u32 4294901760, %v5794_v59 }
 0x136   : > { %2607 = vst [vmem:[%s20461_s17 + $0x10] sm:$0xff] %v18405_v24  ;;  %v18401_v1 = vadd.f32 %v826_v51, %v20453_v52  ;;  %v828_v54 = vpop.f32.mrb[3].mxu0  ;;  %4419 = vmatmul.mubr.f32.vlgmr.msra.gmra.mrb[18].mxu0 %v19656_v6  ;;  %v5807_v24 = vand.u32 4294901760, %v5806_v63  ;;  %v17925_v43 = vpack.c.bf16 %v5218_v36, %v5206_v31  ;;  %v17951_v51 = vpack.c.bf16 %v20394_v5, %v20392_v40  ;;  %v17522_v5 = vld [vmem:[%s19681_s5 + $0x178] sm:$0x1]  ;;  %v17513_v63 = vld [vmem:[%s19681_s5 + $0x130] sm:$0xff] }
 0x137   : > { %2608 = vst [vmem:[%s20461_s17 + $0x18] sm:$0xff] %v18406_v49  ;;  %v1415_v61 = vpop.f32.mrb[2].mxu1  ;;  %v18402_v3 = vadd.f32 %v828_v54, %v20453_v52  ;;  %4424 = vmatprep.mubr.f32.mxu0 %v19590_v2  ;;  %17922 = vmatpush1.bf16.msra.mxu0 %v20456_v32  ;;  %v17953_v54 = vpack.c.bf16 %v20448_v35, %v20446_v33 }
 0x138   : > { %2614 = vst [vmem:[%s20461_s17 + $0x40] sm:$0xff] %v18401_v1  ;;  %v18407_v23 = vadd.f32 %v1415_v61, %v20453_v52  ;;  %v1417_v27 = vpop.f32.mrb[3].mxu1  ;;  %5008 = vmatmul.mubr.f32.vlgmr.msra.gmra.mrb[18].mxu1 %v19656_v6  ;;  %17924 = vmatprep.subr.bf16.mxu0 %v17923_v34  ;;  %v17927_v34 = vpack.c.bf16 %v20388_v42, %v20386_v62  ;;  %v17520_v42 = vld [vmem:[%s19681_s5 + $0x168] sm:$0x1] }
 0x139   : > { %2615 = vst [vmem:[%s20461_s17 + $0x48] sm:$0xff] %v18402_v3  ;;  %v18408_v30 = vadd.f32 %v1417_v27, %v20453_v52  ;;  %v833_v17 = vpop.f32.mrb[4].mxu0  ;;  %5013 = vmatprep.mubr.f32.mxu1 %v19590_v2  ;;  %17946 = vmatpush1.bf16.msra.mxu1 %v20469_v56  ;;  %v17949_v49 = vpack.c.bf16 %v5807_v24, %v5795_v47  ;;  %v17511_v27 = vld [vmem:[%s19681_s5 + $0x120] sm:$0xff] }
 0x13a   : > { %2616 = vst [vmem:[%s20461_s17 + $0x50] sm:$0xff] %v18407_v23  ;;  %v18403_v22 = vadd.f32 %v833_v17, %v20478_v16  ;;  %v835_v53 = vpop.f32.mrb[5].mxu0  ;;  %4426 = vmatmul.mubr.f32.gmra.mrb[20].mxu0 %v19658_v7  ;;  %17948 = vmatprep.subr.bf16.mxu1 %v17947_v41  ;;  %v17929_v1 = vpack.c.bf16 %v20442_v19, %v20440_v25 }
 0x13b   : > { %2617 = vst [vmem:[%s20461_s17 + $0x58] sm:$0xff] %v18408_v30  ;;  %v1422_v28 = vpop.f32.mrb[4].mxu1  ;;  %v18404_v29 = vadd.f32 %v835_v53, %v20478_v16  ;;  %4431 = vmatprep.mubr.f32.mxu0 %v19590_v2  ;;  %v17935_v41 = vpack.c.bf16 %v5210_v0, %v5198_v57  ;;  %v17959_v61 = vpack.c.bf16 %v5799_v8, %v5787_v4  ;;  %v17512_v57 = vld [vmem:[%s19681_s5 + $0x128] sm:$0xff]  ;;  %v5086_v0 = vsel %vm224_vm1, %v17520_v42, 0  ;;  %v17514_v4 = vld [vmem:[%s19681_s5 + $0x138] sm:$0xff] }
 0x13c   : > { %2622 = vst [vmem:[%s20461_s17 + $0x80] sm:$0xf] %v18403_v22  ;;  %v18409_v39 = vadd.f32 %v1422_v28, %v20478_v16  ;;  %v1424_v44 = vpop.f32.mrb[5].mxu1  ;;  %5015 = vmatmul.mubr.f32.gmra.mrb[20].mxu1 %v19658_v7  ;;  %v17937_v62 = vpack.c.bf16 %v5216_v38, %v5204_v21  ;;  %v17961_v40 = vpack.c.bf16 %v5805_v55, %v5793_v58  ;;  %v5092_v8 = vsel %vm224_vm1, %v17522_v5, 0  ;;  %v17519_v58 = vld [vmem:[%s19681_s5 + $0x160] sm:$0x1] }
 0x13d   : > { %2623 = vst [vmem:[%s20461_s17 + $0x88] sm:$0xf] %v18404_v29  ;;  %v18410_v46 = vadd.f32 %v1424_v44, %v20478_v16  ;;  %5020 = vmatprep.mubr.f32.mxu1 %v19590_v2  ;;  %v6272_v25 = vand.u32 4294901760, %v17512_v57  ;;  %v6276_v19 = vand.u32 4294901760, %v5086_v0  ;;  %v6861_v35 = vand.u32 4294901760, %v17514_v4 }
 0x13e   : > { %2624 = vst [vmem:[%s20461_s17 + $0x90] sm:$0xf] %v18409_v39  ;;  %4433 = vmatmul.mubr.f32.gmra.mrb[22].mxu0 %v19660_v9  ;;  %v6865_v21 = vand.u32 4294901760, %v5092_v8  ;;  %v5083_v30 = vsel %vm224_vm1, %v17519_v58, 0  ;;  %v5089_v22 = vsel %vm224_vm1, %v17521_v20, 0 }
 0x13f   : > { %2625 = vst [vmem:[%s20461_s17 + $0x98] sm:$0xf] %v18410_v46  ;;  %5162 = vmatprep.mubr.f32.mxu0 %v19590_v2  ;;  %v20598_v33 = vsub.f32 %v17512_v57, %v6272_v25  ;;  %v20604_v38 = vsub.f32 %v17514_v4, %v6861_v35  ;;  %v20611_v55 = vpack.c.bf16 %v6276_v19, %v6272_v25  ;;  %v6278_v29 = vand.u32 4294901760, %v5083_v30 }
 0x140   : > { %5022 = vmatmul.mubr.f32.gmra.mrb[22].mxu1 %v19660_v9  ;;  %v20618_v23 = vpack.c.bf16 %v6865_v21, %v6861_v35  ;;  %v6867_v46 = vand.u32 4294901760, %v5089_v22 }
 0x141   : > { %5751 = vmatprep.mubr.f32.mxu1 %v19590_v2  ;;  %v6376_v3 = vand.u32 4294901760, %v20598_v33  ;;  %v6965_v17 = vand.u32 4294901760, %v20604_v38  ;;  %v20649_v44 = vsub.f32 %v5083_v30, %v6278_v29 }
 0x142   : > { %5168 = vmatmul.mubr.f32.vlgmr.msra.gmra.mrb[24].mxu0 %v19723_v48 }
 0x143   : > { %5173 = vmatprep.mubr.f32.mxu0 %v19590_v2  ;;  %17926 = vmatpush1.bf16.msra.mxu0 %v17925_v43  ;;  %v6377_v53 = vsub.f32 %v20598_v33, %v6376_v3  ;;  %v6966_v31 = vsub.f32 %v20604_v38, %v6965_v17  ;;  %v6394_v5 = vand.u32 4294901760, %v20649_v44 }
 0x144   : > { %5757 = vmatmul.mubr.f32.vlgmr.msra.gmra.mrb[24].mxu1 %v19723_v48  ;;  %17928 = vmatprep.subr.bf16.mxu0 %v17927_v34 }
 0x145   : > { %5762 = vmatprep.mubr.f32.mxu1 %v19590_v2  ;;  %17950 = vmatpush1.bf16.msra.mxu1 %v17949_v49  ;;  %v6378_v47 = vand.u32 4294901760, %v6377_v53  ;;  %v20655_v49 = vsub.f32 %v5089_v22, %v6867_v46  ;;  %v6395_v53 = vsub.f32 %v20649_v44, %v6394_v5 }
 0x146   : > { %5179 = vmatmul.mubr.f32.gmra.mrb[26].mxu0 %v19728_v50  ;;  %17952 = vmatprep.subr.bf16.mxu1 %v17951_v51 }
 0x147   : > { %5184 = vmatprep.mubr.f32.mxu0 %v19590_v2 }
 0x148   : > { %5768 = vmatmul.mubr.f32.gmra.mrb[26].mxu1 %v19728_v50 }
 0x149   : > { %5773 = vmatprep.mubr.f32.mxu1 %v19590_v2 }
 0x14a   : > { %5190 = vmatmul.mubr.f32.gmra.mrb[28].mxu0 %v19773_v26 }
 0x14b   : > { %5280 = vmatprep.mubr.f32.mxu0 %v19590_v2 }
 0x14c   : > { %5779 = vmatmul.mubr.f32.gmra.mrb[28].mxu1 %v19773_v26 }
 0x14d   : > { %5869 = vmatprep.mubr.f32.mxu1 %v19590_v2 }
 0x14e   : > { %5282 = vmatmul.mubr.f32.vlgmr.msra.gmra.mrb[24].mxu0 %v19656_v6 }
 0x14f   : > { %5287 = vmatprep.mubr.f32.mxu0 %v19590_v2  ;;  %17930 = vmatpush1.bf16.msra.mxu0 %v17929_v1 }
 0x150   : > { %5871 = vmatmul.mubr.f32.vlgmr.msra.gmra.mrb[24].mxu1 %v19656_v6  ;;  %17932 = vmatprep.subr.bf16.mxu0 %v20399_v37 }
 0x151   : > { %5876 = vmatprep.mubr.f32.mxu1 %v19590_v2  ;;  %17954 = vmatpush1.bf16.msra.mxu1 %v17953_v54  ;;  %v6967_v54 = vand.u32 4294901760, %v6966_v31 }
 0x152   : > { %5289 = vmatmul.mubr.f32.gmra.mrb[26].mxu0 %v19658_v7  ;;  %17956 = vmatprep.subr.bf16.mxu1 %v20407_v60 }
 0x153   : > { %5294 = vmatprep.mubr.f32.mxu0 %v19590_v2 }
 0x154   : > { %5878 = vmatmul.mubr.f32.gmra.mrb[26].mxu1 %v19658_v7 }
 0x155   : > { %5883 = vmatprep.mubr.f32.mxu1 %v19590_v2 }
 0x156   : > { %5296 = vmatmul.mubr.f32.gmra.mrb[28].mxu0 %v19660_v9 }
 0x157   : > { %5374 = vmatprep.mubr.f32.mxu0 %v19590_v2 }
 0x158   : > { %5885 = vmatmul.mubr.f32.gmra.mrb[28].mxu1 %v19660_v9 }
 0x159   : > { %5963 = vmatprep.mubr.f32.mxu1 %v19590_v2 }
 0x15a   : > { %5377 = vmatmul.mubr.f32.vlgmr.msra.gmra.mrb[24].mxu0 %v19664_v10 }
 0x15b   : > { %5382 = vmatprep.mubr.f32.mxu0 %v19590_v2  ;;  %17934 = vmatpush1.bf16.msra.mxu0 %v20456_v32 }
 0x15c   : > { %5966 = vmatmul.mubr.f32.vlgmr.msra.gmra.mrb[24].mxu1 %v19664_v10  ;;  %17936 = vmatprep.subr.bf16.mxu0 %v17935_v41 }
 0x15d   : > { %5971 = vmatprep.mubr.f32.mxu1 %v19590_v2  ;;  %17958 = vmatpush1.bf16.msra.mxu1 %v20469_v56 }
 0x15e   : > { %5385 = vmatmul.mubr.f32.gmra.mrb[26].mxu0 %v19667_v11  ;;  %17960 = vmatprep.subr.bf16.mxu1 %v17959_v61 }
 0x15f   : > { %5390 = vmatprep.mubr.f32.mxu0 %v19590_v2 }
 0x160   : > { %5974 = vmatmul.mubr.f32.gmra.mrb[26].mxu1 %v19667_v11 }
 0x161   : > { %5979 = vmatprep.mubr.f32.mxu1 %v19590_v2 }
 0x162   : > { %5393 = vmatmul.mubr.f32.gmra.mrb[28].mxu0 %v19670_v12 }
 0x163   : > { %5467 = vmatprep.mubr.f32.mxu0 %v19590_v2 }
 0x164   : > { %5982 = vmatmul.mubr.f32.gmra.mrb[28].mxu1 %v19670_v12 }
 0x165   : > { %6056 = vmatprep.mubr.f32.mxu1 %v19590_v2 }
 0x166   : > { %5471 = vmatmul.mubr.f32.vlgmr.msra.gmra.mrb[24].mxu0 %v19673_v13 }
 0x167   : > { %5476 = vmatprep.mubr.f32.mxu0 %v19590_v2  ;;  %17938 = vmatpush1.bf16.msra.mxu0 %v17937_v62 }
 0x168   : > { %6060 = vmatmul.mubr.f32.vlgmr.msra.gmra.mrb[24].mxu1 %v19673_v13  ;;  %17940 = vmatprep.subr.bf16.mxu0 %v20399_v37  ;;  %v20600_v37 = vsub.f32 %v5086_v0, %v6276_v19 }
 0x169   : > { %6065 = vmatprep.mubr.f32.mxu1 %v19590_v2  ;;  %17962 = vmatpush1.bf16.msra.mxu1 %v17961_v40 }
 0x16a   : > { %5480 = vmatmul.mubr.f32.gmra.mrb[26].mxu0 %v19676_v14  ;;  %17964 = vmatprep.subr.bf16.mxu1 %v20407_v60  ;;  %v20606_v60 = vsub.f32 %v5092_v8, %v6865_v21  ;;  %v6388_v18 = vand.u32 4294901760, %v20600_v37  ;;  %v6983_v21 = vand.u32 4294901760, %v20655_v49 }
 0x16b   : > { %5485 = vmatprep.mubr.f32.mxu0 %v19590_v2 }
 0x16c   : > { %6069 = vmatmul.mubr.f32.gmra.mrb[26].mxu1 %v19676_v14  ;;  %v6977_v59 = vand.u32 4294901760, %v20606_v60  ;;  %v6389_v28 = vsub.f32 %v20600_v37, %v6388_v18 }
 0x16d   : > { %6074 = vmatprep.mubr.f32.mxu1 %v19590_v2 }
 0x16e   : > { %5489 = vmatmul.mubr.f32.gmra.mrb[28].mxu0 %v19684_v15  ;;  %v6978_v36 = vsub.f32 %v20606_v60, %v6977_v59  ;;  %v6390_v24 = vand.u32 4294901760, %v6389_v28 }
 0x16f   : > { %5571 = vmatprep.mubr.f32.mxu0 %v19590_v2 }
 0x170   : > { %6078 = vmatmul.mubr.f32.gmra.mrb[28].mxu1 %v19684_v15  ;;  %v6979_v41 = vand.u32 4294901760, %v6978_v36  ;;  %v17971_v4 = vpack.c.bf16 %v6390_v24, %v6378_v47 }
 0x171   : > { %6160 = vmatprep.mubr.f32.mxu1 %v19590_v2 }
 0x172   : > { %5573 = vmatmul.mubr.f32.vlgmr.msra.gmra.mrb[24].mxu0 %v19656_v6 }
 0x173   : > { %5578 = vmatprep.mubr.f32.mxu0 %v19590_v2  ;;  %17942 = vmatpush1.bf16.msra.mxu0 %v20456_v32  ;;  %v6274_v32 = vand.u32 4294901760, %v17511_v27 }
 0x174   : > { %6162 = vmatmul.mubr.f32.vlgmr.msra.gmra.mrb[24].mxu1 %v19656_v6  ;;  %17968 = vmatprep.subr.bf16.mxu0 %v20611_v55 }
 0x175   : > { %6167 = vmatprep.mubr.f32.mxu1 %v19590_v2  ;;  %17966 = vmatpush1.bf16.msra.mxu1 %v20469_v56  ;;  %v20647_v39 = vsub.f32 %v17511_v27, %v6274_v32  ;;  %v6863_v56 = vand.u32 4294901760, %v17513_v63  ;;  %v20661_v42 = vpack.c.bf16 %v6278_v29, %v6274_v32  ;;  %v17995_v27 = vpack.c.bf16 %v6979_v41, %v6967_v54 }
 0x176   : > { %5580 = vmatmul.mubr.f32.gmra.mrb[26].mxu0 %v19658_v7  ;;  %17992 = vmatprep.subr.bf16.mxu1 %v20618_v23 }
 0x177   : > { %5585 = vmatprep.mubr.f32.mxu0 %v19590_v2  ;;  %v20653_v34 = vsub.f32 %v17513_v63, %v6863_v56  ;;  %v6382_v40 = vand.u32 4294901760, %v20647_v39  ;;  %v20671_v19 = vpack.c.bf16 %v6867_v46, %v6863_v56  ;;  %v6984_v56 = vsub.f32 %v20655_v49, %v6983_v21 }
 0x178   : > { %6169 = vmatmul.mubr.f32.gmra.mrb[26].mxu1 %v19658_v7 }
 0x179   : > { %v1997_v43 = vpop.f32.mrb[6].mxu0  ;;  %6174 = vmatprep.mubr.f32.mxu1 %v19590_v2  ;;  %v6971_v35 = vand.u32 4294901760, %v20653_v34  ;;  %v6383_v22 = vsub.f32 %v20647_v39, %v6382_v40 }
 0x17a   : > { %v18411_v51 = vadd.f32 %v1997_v43, %v20427_v45  ;;  %v1999_v1 = vpop.f32.mrb[7].mxu0  ;;  %5587 = vmatmul.mubr.f32.gmra.mrb[28].mxu0 %v19660_v9 }
 0x17b   : > { %v2586_v61 = vpop.f32.mrb[6].mxu1  ;;  %v18412_v62 = vadd.f32 %v1999_v1, %v20427_v45  ;;  %5661 = vmatprep.mubr.f32.mxu0 %v19590_v2  ;;  %v6972_v36 = vsub.f32 %v20653_v34, %v6971_v35  ;;  %v6396_v1 = vand.u32 4294901760, %v6395_v53  ;;  %v17557_v53 = vld [vmem:[%s19681_s5 + $0x1d0] sm:$0x1] }
 0x17c   : > { %2609 = vst [vmem:[%s20461_s17 + $0x20] sm:$0xff] %v18411_v51  ;;  %v18417_v57 = vadd.f32 %v2586_v61, %v20427_v45  ;;  %v2588_v0 = vpop.f32.mrb[7].mxu1  ;;  %6176 = vmatmul.mubr.f32.gmra.mrb[28].mxu1 %v19660_v9  ;;  %v6384_v51 = vand.u32 4294901760, %v6383_v22 }
 0x17d   : > { %2610 = vst [vmem:[%s20461_s17 + $0x28] sm:$0xff] %v18412_v62  ;;  %v18418_v8 = vadd.f32 %v2588_v0, %v20427_v45  ;;  %v2004_v25 = vpop.f32.mrb[8].mxu0  ;;  %6250 = vmatprep.mubr.f32.mxu1 %v19590_v2  ;;  %v6973_v62 = vand.u32 4294901760, %v6972_v36 }
 0x17e   : > { %2611 = vst [vmem:[%s20461_s17 + $0x30] sm:$0xff] %v18417_v57  ;;  %v18413_v58 = vadd.f32 %v2004_v25, %v20453_v52  ;;  %v2006_v20 = vpop.f32.mrb[9].mxu0  ;;  %5663 = vmatmul.mubr.f32.vlgmr.msra.gmra.mrb[24].mxu0 %v19656_v6  ;;  %v6985_v57 = vand.u32 4294901760, %v6984_v56  ;;  %v17973_v0 = vpack.c.bf16 %v6396_v1, %v6384_v51  ;;  %v17999_v25 = vpack.c.bf16 %v20606_v60, %v20604_v38  ;;  %v17558_v60 = vld [vmem:[%s19681_s5 + $0x1d8] sm:$0x1]  ;;  %v17549_v56 = vld [vmem:[%s19681_s5 + $0x190] sm:$0xff] }
 0x17f   : > { %2613 = vst.msk [vmem:[%s20461_s17 + $0x38] sm:$0xff] %vm2612_vm2, %v18418_v8  ;;  %v2593_v30 = vpop.f32.mrb[8].mxu1  ;;  %v18414_v63 = vadd.f32 %v2006_v20, %v20453_v52  ;;  %5668 = vmatprep.mubr.f32.mxu0 %v19590_v2  ;;  %17970 = vmatpush1.bf16.msra.mxu0 %v20661_v42  ;;  %v18001_v20 = vpack.c.bf16 %v20655_v49, %v20653_v34 }
 0x180   : > { %2618 = vst [vmem:[%s20461_s17 + $0x60] sm:$0xff] %v18413_v58  ;;  %v18419_v28 = vadd.f32 %v2593_v30, %v20453_v52  ;;  %v2595_v32 = vpop.f32.mrb[9].mxu1  ;;  %6252 = vmatmul.mubr.f32.vlgmr.msra.gmra.mrb[24].mxu1 %v19656_v6  ;;  %17972 = vmatprep.subr.bf16.mxu0 %v17971_v4  ;;  %v17975_v4 = vpack.c.bf16 %v20600_v37, %v20598_v33  ;;  %v17556_v37 = vld [vmem:[%s19681_s5 + $0x1c8] sm:$0x1] }
 0x181   : > { %2619 = vst [vmem:[%s20461_s17 + $0x68] sm:$0xff] %v18414_v63  ;;  %v18420_v29 = vadd.f32 %v2595_v32, %v20453_v52  ;;  %v2011_v31 = vpop.f32.mrb[10].mxu0  ;;  %6257 = vmatprep.mubr.f32.mxu1 %v19590_v2  ;;  %17994 = vmatpush1.bf16.msra.mxu1 %v20671_v19  ;;  %v17997_v8 = vpack.c.bf16 %v6985_v57, %v6973_v62  ;;  %v17547_v32 = vld [vmem:[%s19681_s5 + $0x180] sm:$0xff] }
 0x182   : > { %2620 = vst [vmem:[%s20461_s17 + $0x70] sm:$0xff] %v18419_v28  ;;  %v18415_v46 = vadd.f32 %v2011_v31, %v20478_v16  ;;  %v2013_v47 = vpop.f32.mrb[11].mxu0  ;;  %5670 = vmatmul.mubr.f32.gmra.mrb[26].mxu0 %v19658_v7  ;;  %17996 = vmatprep.subr.bf16.mxu1 %v17995_v27  ;;  %v17977_v58 = vpack.c.bf16 %v20649_v44, %v20647_v39 }
 0x183   : > { %2621 = vst.msk [vmem:[%s20461_s17 + $0x78] sm:$0xff] %vm2612_vm2, %v18420_v29  ;;  %v2600_v24 = vpop.f32.mrb[10].mxu1  ;;  %v18416_v43 = vadd.f32 %v2013_v47, %v20478_v16  ;;  %5675 = vmatprep.mubr.f32.mxu0 %v19590_v2  ;;  %v17983_v27 = vpack.c.bf16 %v6388_v18, %v6376_v3  ;;  %v18007_v30 = vpack.c.bf16 %v6977_v59, %v6965_v17  ;;  %v17548_v3 = vld [vmem:[%s19681_s5 + $0x188] sm:$0xff]  ;;  %v7496_v18 = vsel %vm224_vm1, %v17556_v37, 0  ;;  %v17550_v17 = vld [vmem:[%s19681_s5 + $0x198] sm:$0xff] }
 0x184   : > { %2626 = vst [vmem:[%s20461_s17 + $0xa0] sm:$0xf] %v18415_v46  ;;  %v18421_v54 = vadd.f32 %v2600_v24, %v20478_v16  ;;  %v2602_v41 = vpop.f32.mrb[11].mxu1  ;;  %6259 = vmatmul.mubr.f32.gmra.mrb[26].mxu1 %v19658_v7  ;;  %v17985_v33 = vpack.c.bf16 %v6394_v5, %v6382_v40  ;;  %v18009_v38 = vpack.c.bf16 %v6983_v21, %v6971_v35  ;;  %v7502_v59 = vsel %vm224_vm1, %v17558_v60, 0  ;;  %v17555_v35 = vld [vmem:[%s19681_s5 + $0x1c0] sm:$0x1] }
 0x185   : > { %2627 = vst [vmem:[%s20461_s17 + $0xa8] sm:$0xf] %v18416_v43  ;;  %v18422_v61 = vadd.f32 %v2602_v41, %v20478_v16  ;;  %6264 = vmatprep.mubr.f32.mxu1 %v19590_v2  ;;  %v7516_v39 = vand.u32 4294901760, %v17548_v3  ;;  %v7520_v44 = vand.u32 4294901760, %v7496_v18  ;;  %v8105_v49 = vand.u32 4294901760, %v17550_v17 }
 0x186   : > { %2628 = vst [vmem:[%s20461_s17 + $0xb0] sm:$0xf] %v18421_v54  ;;  %5677 = vmatmul.mubr.f32.gmra.mrb[28].mxu0 %v19660_v9  ;;  %v8109_v40 = vand.u32 4294901760, %v7502_v59  ;;  %v7493_v29 = vsel %vm224_vm1, %v17555_v35, 0  ;;  %v7499_v46 = vsel %vm224_vm1, %v17557_v53, 0 }
 0x187   : > { %2630 = vst.msk [vmem:[%s20461_s17 + $0xb8] sm:$0xf] %vm2629_vm3, %v18422_v61  ;;  %6340 = vmatprep.mubr.f32.mxu0 %v19590_v2  ;;  %v20801_v34 = vsub.f32 %v17548_v3, %v7516_v39  ;;  %v20807_v5 = vsub.f32 %v17550_v17, %v8105_v49  ;;  %v20814_v21 = vpack.c.bf16 %v7520_v44, %v7516_v39  ;;  %v7522_v43 = vand.u32 4294901760, %v7493_v29 }
 0x188   : > { %6266 = vmatmul.mubr.f32.gmra.mrb[28].mxu1 %v19660_v9  ;;  %v20821_v28 = vpack.c.bf16 %v8109_v40, %v8105_v49  ;;  %v8111_v61 = vand.u32 4294901760, %v7499_v46 }
 0x189   : > { %6929 = vmatprep.mubr.f32.mxu1 %v19590_v2  ;;  %v7620_v63 = vand.u32 4294901760, %v20801_v34  ;;  %v8209_v31 = vand.u32 4294901760, %v20807_v5  ;;  %v20852_v41 = vsub.f32 %v7493_v29, %v7522_v43 }
 0x18a   : > { %6346 = vmatmul.mubr.f32.vlgmr.msra.gmra.mrb[30].mxu0 %v19723_v48 }
 0x18b   : > { %6351 = vmatprep.mubr.f32.mxu0 %v19590_v2  ;;  %17974 = vmatpush1.bf16.msra.mxu0 %v17973_v0  ;;  %v7621_v47 = vsub.f32 %v20801_v34, %v7620_v63  ;;  %v8210_v51 = vsub.f32 %v20807_v5, %v8209_v31  ;;  %v7638_v60 = vand.u32 4294901760, %v20852_v41 }
 0x18c   : > { %6935 = vmatmul.mubr.f32.vlgmr.msra.gmra.mrb[30].mxu1 %v19723_v48  ;;  %17976 = vmatprep.subr.bf16.mxu0 %v17975_v4 }
 0x18d   : > { %6940 = vmatprep.mubr.f32.mxu1 %v19590_v2  ;;  %17998 = vmatpush1.bf16.msra.mxu1 %v17997_v8  ;;  %v7622_v62 = vand.u32 4294901760, %v7621_v47  ;;  %v20858_v8 = vsub.f32 %v7499_v46, %v8111_v61  ;;  %v7639_v47 = vsub.f32 %v20852_v41, %v7638_v60 }
 0x18e   : > { %6357 = vmatmul.mubr.f32.gmra.mrb[32].mxu0 %v19728_v50  ;;  %18000 = vmatprep.subr.bf16.mxu1 %v17999_v25 }
 0x18f   : > { %6362 = vmatprep.mubr.f32.mxu0 %v19590_v2 }
 0x190   : > { %6946 = vmatmul.mubr.f32.gmra.mrb[32].mxu1 %v19728_v50 }
 0x191   : > { %6951 = vmatprep.mubr.f32.mxu1 %v19590_v2 }
 0x192   : > { %6368 = vmatmul.mubr.f32.gmra.mrb[34].mxu0 %v19773_v26 }
 0x193   : > { %6458 = vmatprep.mubr.f32.mxu0 %v19590_v2 }
 0x194   : > { %6957 = vmatmul.mubr.f32.gmra.mrb[34].mxu1 %v19773_v26 }
 0x195   : > { %7047 = vmatprep.mubr.f32.mxu1 %v19590_v2 }
 0x196   : > { %6460 = vmatmul.mubr.f32.vlgmr.msra.gmra.mrb[30].mxu0 %v19656_v6 }
 0x197   : > { %6465 = vmatprep.mubr.f32.mxu0 %v19590_v2  ;;  %17978 = vmatpush1.bf16.msra.mxu0 %v17977_v58 }
 0x198   : > { %7049 = vmatmul.mubr.f32.vlgmr.msra.gmra.mrb[30].mxu1 %v19656_v6  ;;  %17980 = vmatprep.subr.bf16.mxu0 %v20611_v55 }
 0x199   : > { %7054 = vmatprep.mubr.f32.mxu1 %v19590_v2  ;;  %18002 = vmatpush1.bf16.msra.mxu1 %v18001_v20  ;;  %v8211_v20 = vand.u32 4294901760, %v8210_v51 }
 0x19a   : > { %6467 = vmatmul.mubr.f32.gmra.mrb[32].mxu0 %v19658_v7  ;;  %18004 = vmatprep.subr.bf16.mxu1 %v20618_v23 }
 0x19b   : > { %6472 = vmatprep.mubr.f32.mxu0 %v19590_v2 }
 0x19c   : > { %7056 = vmatmul.mubr.f32.gmra.mrb[32].mxu1 %v19658_v7 }
 0x19d   : > { %7061 = vmatprep.mubr.f32.mxu1 %v19590_v2 }
 0x19e   : > { %6474 = vmatmul.mubr.f32.gmra.mrb[34].mxu0 %v19660_v9 }
 0x19f   : > { %6552 = vmatprep.mubr.f32.mxu0 %v19590_v2 }
 0x1a0   : > { %7063 = vmatmul.mubr.f32.gmra.mrb[34].mxu1 %v19660_v9 }
 0x1a1   : > { %7141 = vmatprep.mubr.f32.mxu1 %v19590_v2 }
 0x1a2   : > { %6555 = vmatmul.mubr.f32.vlgmr.msra.gmra.mrb[30].mxu0 %v19664_v10 }
 0x1a3   : > { %6560 = vmatprep.mubr.f32.mxu0 %v19590_v2  ;;  %17982 = vmatpush1.bf16.msra.mxu0 %v20661_v42 }
 0x1a4   : > { %7144 = vmatmul.mubr.f32.vlgmr.msra.gmra.mrb[30].mxu1 %v19664_v10  ;;  %17984 = vmatprep.subr.bf16.mxu0 %v17983_v27 }
 0x1a5   : > { %7149 = vmatprep.mubr.f32.mxu1 %v19590_v2  ;;  %18006 = vmatpush1.bf16.msra.mxu1 %v20671_v19 }
 0x1a6   : > { %6563 = vmatmul.mubr.f32.gmra.mrb[32].mxu0 %v19667_v11  ;;  %18008 = vmatprep.subr.bf16.mxu1 %v18007_v30 }
 0x1a7   : > { %6568 = vmatprep.mubr.f32.mxu0 %v19590_v2 }
 0x1a8   : > { %7152 = vmatmul.mubr.f32.gmra.mrb[32].mxu1 %v19667_v11 }
 0x1a9   : > { %7157 = vmatprep.mubr.f32.mxu1 %v19590_v2 }
 0x1aa   : > { %6571 = vmatmul.mubr.f32.gmra.mrb[34].mxu0 %v19670_v12 }
 0x1ab   : > { %6645 = vmatprep.mubr.f32.mxu0 %v19590_v2 }
 0x1ac   : > { %7160 = vmatmul.mubr.f32.gmra.mrb[34].mxu1 %v19670_v12 }
 0x1ad   : > { %7234 = vmatprep.mubr.f32.mxu1 %v19590_v2 }
 0x1ae   : > { %6649 = vmatmul.mubr.f32.vlgmr.msra.gmra.mrb[30].mxu0 %v19673_v13 }
 0x1af   : > { %6654 = vmatprep.mubr.f32.mxu0 %v19590_v2  ;;  %17986 = vmatpush1.bf16.msra.mxu0 %v17985_v33 }
 0x1b0   : > { %7238 = vmatmul.mubr.f32.vlgmr.msra.gmra.mrb[30].mxu1 %v19673_v13  ;;  %17988 = vmatprep.subr.bf16.mxu0 %v20611_v55  ;;  %v20803_v55 = vsub.f32 %v7496_v18, %v7520_v44 }
 0x1b1   : > { %7243 = vmatprep.mubr.f32.mxu1 %v19590_v2  ;;  %18010 = vmatpush1.bf16.msra.mxu1 %v18009_v38 }
 0x1b2   : > { %6658 = vmatmul.mubr.f32.gmra.mrb[32].mxu0 %v19676_v14  ;;  %18012 = vmatprep.subr.bf16.mxu1 %v20618_v23  ;;  %v20809_v23 = vsub.f32 %v7502_v59, %v8109_v40  ;;  %v7632_v22 = vand.u32 4294901760, %v20803_v55  ;;  %v8227_v40 = vand.u32 4294901760, %v20858_v8 }
 0x1b3   : > { %6663 = vmatprep.mubr.f32.mxu0 %v19590_v2 }
 0x1b4   : > { %7247 = vmatmul.mubr.f32.gmra.mrb[32].mxu1 %v19676_v14  ;;  %v8221_v36 = vand.u32 4294901760, %v20809_v23  ;;  %v7633_v24 = vsub.f32 %v20803_v55, %v7632_v22 }
 0x1b5   : > { %7252 = vmatprep.mubr.f32.mxu1 %v19590_v2 }
 0x1b6   : > { %6667 = vmatmul.mubr.f32.gmra.mrb[34].mxu0 %v19684_v15  ;;  %v8222_v1 = vsub.f32 %v20809_v23, %v8221_v36  ;;  %v7634_v57 = vand.u32 4294901760, %v7633_v24 }
 0x1b7   : > { %6749 = vmatprep.mubr.f32.mxu0 %v19590_v2 }
 0x1b8   : > { %7256 = vmatmul.mubr.f32.gmra.mrb[34].mxu1 %v19684_v15  ;;  %v8223_v27 = vand.u32 4294901760, %v8222_v1  ;;  %v18019_v17 = vpack.c.bf16 %v7634_v57, %v7622_v62 }
 0x1b9   : > { %7338 = vmatprep.mubr.f32.mxu1 %v19590_v2 }
 0x1ba   : > { %6751 = vmatmul.mubr.f32.vlgmr.msra.gmra.mrb[30].mxu0 %v19656_v6 }
 0x1bb   : > { %6756 = vmatprep.mubr.f32.mxu0 %v19590_v2  ;;  %17990 = vmatpush1.bf16.msra.mxu0 %v20661_v42  ;;  %v7518_v42 = vand.u32 4294901760, %v17547_v32 }
 0x1bc   : > { %7340 = vmatmul.mubr.f32.vlgmr.msra.gmra.mrb[30].mxu1 %v19656_v6  ;;  %18016 = vmatprep.subr.bf16.mxu0 %v20814_v21 }
 0x1bd   : > { %7345 = vmatprep.mubr.f32.mxu1 %v19590_v2  ;;  %18014 = vmatpush1.bf16.msra.mxu1 %v20671_v19  ;;  %v20850_v54 = vsub.f32 %v17547_v32, %v7518_v42  ;;  %v8107_v19 = vand.u32 4294901760, %v17549_v56  ;;  %v20864_v37 = vpack.c.bf16 %v7522_v43, %v7518_v42  ;;  %v18043_v32 = vpack.c.bf16 %v8223_v27, %v8211_v20 }
 0x1be   : > { %6758 = vmatmul.mubr.f32.gmra.mrb[32].mxu0 %v19658_v7  ;;  %18040 = vmatprep.subr.bf16.mxu1 %v20821_v28 }
 0x1bf   : > { %6763 = vmatprep.mubr.f32.mxu0 %v19590_v2  ;;  %v20856_v4 = vsub.f32 %v17549_v56, %v8107_v19  ;;  %v7626_v38 = vand.u32 4294901760, %v20850_v54  ;;  %v20874_v44 = vpack.c.bf16 %v8111_v61, %v8107_v19  ;;  %v8228_v19 = vsub.f32 %v20858_v8, %v8227_v40 }
 0x1c0   : > { %7347 = vmatmul.mubr.f32.gmra.mrb[32].mxu1 %v19658_v7 }
 0x1c1   : > { %v3242_v0 = vpop.f32.mrb[12].mxu0  ;;  %7352 = vmatprep.mubr.f32.mxu1 %v19590_v2  ;;  %v8215_v49 = vand.u32 4294901760, %v20856_v4  ;;  %v7627_v46 = vsub.f32 %v20850_v54, %v7626_v38 }
 0x1c2   : > { %v18423_v25 = vadd.f32 %v3242_v0, %v20427_v45  ;;  %v3244_v58 = vpop.f32.mrb[13].mxu0  ;;  %6765 = vmatmul.mubr.f32.gmra.mrb[34].mxu0 %v19660_v9 }
 0x1c3   : > { %v3831_v30 = vpop.f32.mrb[12].mxu1  ;;  %v18424_v33 = vadd.f32 %v3244_v58, %v20427_v45  ;;  %6839 = vmatprep.mubr.f32.mxu0 %v19590_v2  ;;  %v8216_v1 = vsub.f32 %v20856_v4, %v8215_v49  ;;  %v7640_v58 = vand.u32 4294901760, %v7639_v47  ;;  %v17561_v47 = vld [vmem:[%s19681_s5 + $0x1f0] sm:$0x1] }
 0x1c4   : > { %17483 = vst [vmem:[%s20461_s17 + $0xc0] sm:$0xff] %v18423_v25  ;;  %v18429_v3 = vadd.f32 %v3831_v30, %v20427_v45  ;;  %v3833_v18 = vpop.f32.mrb[13].mxu1  ;;  %7354 = vmatmul.mubr.f32.gmra.mrb[34].mxu1 %v19660_v9  ;;  %v7628_v25 = vand.u32 4294901760, %v7627_v46 }
 0x1c5   : > { %17484 = vst [vmem:[%s20461_s17 + $0xc8] sm:$0xff] %v18424_v33  ;;  %v18430_v59 = vadd.f32 %v3833_v18, %v20427_v45  ;;  %v3249_v39 = vpop.f32.mrb[14].mxu0  ;;  %7428 = vmatprep.mubr.f32.mxu1 %v19590_v2  ;;  %v8217_v33 = vand.u32 4294901760, %v8216_v1 }
 0x1c6   : > { %17485 = vst [vmem:[%s20461_s17 + $0xd0] sm:$0xff] %v18429_v3  ;;  %v18425_v35 = vadd.f32 %v3249_v39, %v20453_v52  ;;  %v3251_v53 = vpop.f32.mrb[15].mxu0  ;;  %6841 = vmatmul.mubr.f32.vlgmr.msra.gmra.mrb[30].mxu0 %v19656_v6  ;;  %v8229_v3 = vand.u32 4294901760, %v8228_v19  ;;  %v18021_v18 = vpack.c.bf16 %v7640_v58, %v7628_v25  ;;  %v18047_v39 = vpack.c.bf16 %v20809_v23, %v20807_v5  ;;  %v17562_v23 = vld [vmem:[%s19681_s5 + $0x1f8] sm:$0x1]  ;;  %v17553_v19 = vld [vmem:[%s19681_s5 + $0x1b0] sm:$0xff] }
 0x1c7   : > { %17486 = vst [vmem:[%s20461_s17 + $0xd8] sm:$0xff] %v18430_v59  ;;  %v3838_v29 = vpop.f32.mrb[14].mxu1  ;;  %v18426_v56 = vadd.f32 %v3251_v53, %v20453_v52  ;;  %6846 = vmatprep.mubr.f32.mxu0 %v19590_v2  ;;  %18018 = vmatpush1.bf16.msra.mxu0 %v20864_v37  ;;  %v18049_v53 = vpack.c.bf16 %v20858_v8, %v20856_v4 }
 0x1c8   : > { %17491 = vst [vmem:[%s20461_s17 + $0x100] sm:$0xff] %v18425_v35  ;;  %v18431_v24 = vadd.f32 %v3838_v29, %v20453_v52  ;;  %v3840_v42 = vpop.f32.mrb[15].mxu1  ;;  %7430 = vmatmul.mubr.f32.vlgmr.msra.gmra.mrb[30].mxu1 %v19656_v6  ;;  %18020 = vmatprep.subr.bf16.mxu0 %v18019_v17  ;;  %v18023_v17 = vpack.c.bf16 %v20803_v55, %v20801_v34  ;;  %v17560_v55 = vld [vmem:[%s19681_s5 + $0x1e8] sm:$0x1] }
 0x1c9   : > { %17492 = vst [vmem:[%s20461_s17 + $0x108] sm:$0xff] %v18426_v56  ;;  %v18432_v43 = vadd.f32 %v3840_v42, %v20453_v52  ;;  %v3256_v51 = vpop.f32.mrb[16].mxu0  ;;  %7435 = vmatprep.mubr.f32.mxu1 %v19590_v2  ;;  %18042 = vmatpush1.bf16.msra.mxu1 %v20874_v44  ;;  %v18045_v59 = vpack.c.bf16 %v8229_v3, %v8217_v33  ;;  %v17551_v42 = vld [vmem:[%s19681_s5 + $0x1a0] sm:$0xff] }
 0x1ca   : > { %17493 = vst [vmem:[%s20461_s17 + $0x110] sm:$0xff] %v18431_v24  ;;  %v18427_v61 = vadd.f32 %v3256_v51, %v20478_v16  ;;  %v3258_v62 = vpop.f32.mrb[17].mxu0  ;;  %6848 = vmatmul.mubr.f32.gmra.mrb[32].mxu0 %v19658_v7  ;;  %18044 = vmatprep.subr.bf16.mxu1 %v18043_v32  ;;  %v18025_v35 = vpack.c.bf16 %v20852_v41, %v20850_v54 }
 0x1cb   : > { %17494 = vst [vmem:[%s20461_s17 + $0x118] sm:$0xff] %v18432_v43  ;;  %v3845_v57 = vpop.f32.mrb[16].mxu1  ;;  %v18428_v0 = vadd.f32 %v3258_v62, %v20478_v16  ;;  %6853 = vmatprep.mubr.f32.mxu0 %v19590_v2  ;;  %v18031_v32 = vpack.c.bf16 %v7632_v22, %v7620_v63  ;;  %v18055_v29 = vpack.c.bf16 %v8221_v36, %v8209_v31  ;;  %v17552_v63 = vld [vmem:[%s19681_s5 + $0x1a8] sm:$0xff]  ;;  %v7508_v22 = vsel %vm224_vm1, %v17560_v55, 0  ;;  %v17554_v31 = vld [vmem:[%s19681_s5 + $0x1b8] sm:$0xff] }
 0x1cc   : > { %17499 = vst [vmem:[%s20461_s17 + $0x140] sm:$0xf] %v18427_v61  ;;  %v18433_v20 = vadd.f32 %v3845_v57, %v20478_v16  ;;  %v3847_v27 = vpop.f32.mrb[17].mxu1  ;;  %7437 = vmatmul.mubr.f32.gmra.mrb[32].mxu1 %v19658_v7  ;;  %v18033_v34 = vpack.c.bf16 %v7638_v60, %v7626_v38  ;;  %v18057_v5 = vpack.c.bf16 %v8227_v40, %v8215_v49  ;;  %v7514_v36 = vsel %vm224_vm1, %v17562_v23, 0  ;;  %v17559_v49 = vld [vmem:[%s19681_s5 + $0x1e0] sm:$0x1] }
 0x1cd   : > { %17500 = vst [vmem:[%s20461_s17 + $0x148] sm:$0xf] %v18428_v0  ;;  %v18434_v30 = vadd.f32 %v3847_v27, %v20478_v16  ;;  %7442 = vmatprep.mubr.f32.mxu1 %v19590_v2  ;;  %v8694_v54 = vand.u32 4294901760, %v17552_v63  ;;  %v8698_v41 = vand.u32 4294901760, %v7508_v22  ;;  %v9283_v8 = vand.u32 4294901760, %v17554_v31 }
 0x1ce   : > { %17501 = vst [vmem:[%s20461_s17 + $0x150] sm:$0xf] %v18433_v20  ;;  %6855 = vmatmul.mubr.f32.gmra.mrb[34].mxu0 %v19660_v9  ;;  %v9287_v38 = vand.u32 4294901760, %v7514_v36  ;;  %v7505_v43 = vsel %vm224_vm1, %v17559_v49, 0  ;;  %v7511_v61 = vsel %vm224_vm1, %v17561_v47, 0 }
 0x1cf   : > { %17502 = vst [vmem:[%s20461_s17 + $0x158] sm:$0xf] %v18434_v30  ;;  %7584 = vmatprep.mubr.f32.mxu0 %v19590_v2  ;;  %v21001_v4 = vsub.f32 %v17552_v63, %v8694_v54  ;;  %v21007_v60 = vsub.f32 %v17554_v31, %v9283_v8  ;;  %v21014_v40 = vpack.c.bf16 %v8698_v41, %v8694_v54  ;;  %v8700_v0 = vand.u32 4294901760, %v7505_v43 }
 0x1d0   : > { %7444 = vmatmul.mubr.f32.gmra.mrb[34].mxu1 %v19660_v9  ;;  %v21021_v24 = vpack.c.bf16 %v9287_v38, %v9283_v8  ;;  %v9289_v30 = vand.u32 4294901760, %v7511_v61 }
 0x1d1   : > { %8173 = vmatprep.mubr.f32.mxu1 %v19590_v2  ;;  %v8798_v56 = vand.u32 4294901760, %v21001_v4  ;;  %v9387_v51 = vand.u32 4294901760, %v21007_v60  ;;  %v21052_v27 = vsub.f32 %v7505_v43, %v8700_v0 }
 0x1d2   : > { %7590 = vmatmul.mubr.f32.vlgmr.msra.gmra.mrb[36].mxu0 %v19723_v48 }
 0x1d3   : > { %7595 = vmatprep.mubr.f32.mxu0 %v19590_v2  ;;  %18022 = vmatpush1.bf16.msra.mxu0 %v18021_v18  ;;  %v8799_v62 = vsub.f32 %v21001_v4, %v8798_v56  ;;  %v9388_v25 = vsub.f32 %v21007_v60, %v9387_v51  ;;  %v8816_v23 = vand.u32 4294901760, %v21052_v27 }
 0x1d4   : > { %8179 = vmatmul.mubr.f32.vlgmr.msra.gmra.mrb[36].mxu1 %v19723_v48  ;;  %18024 = vmatprep.subr.bf16.mxu0 %v18023_v17 }
 0x1d5   : > { %8184 = vmatprep.mubr.f32.mxu1 %v19590_v2  ;;  %18046 = vmatpush1.bf16.msra.mxu1 %v18045_v59  ;;  %v8800_v33 = vand.u32 4294901760, %v8799_v62  ;;  %v21058_v59 = vsub.f32 %v7511_v61, %v9289_v30  ;;  %v8817_v62 = vsub.f32 %v21052_v27, %v8816_v23 }
 0x1d6   : > { %7601 = vmatmul.mubr.f32.gmra.mrb[38].mxu0 %v19728_v50  ;;  %18048 = vmatprep.subr.bf16.mxu1 %v18047_v39 }
 0x1d7   : > { %7606 = vmatprep.mubr.f32.mxu0 %v19590_v2 }
 0x1d8   : > { %8190 = vmatmul.mubr.f32.gmra.mrb[38].mxu1 %v19728_v50 }
 0x1d9   : > { %8195 = vmatprep.mubr.f32.mxu1 %v19590_v2 }
 0x1da   : > { %7612 = vmatmul.mubr.f32.gmra.mrb[40].mxu0 %v19773_v26 }
 0x1db   : > { %7702 = vmatprep.mubr.f32.mxu0 %v19590_v2 }
 0x1dc   : > { %8201 = vmatmul.mubr.f32.gmra.mrb[40].mxu1 %v19773_v26 }
 0x1dd   : > { %8291 = vmatprep.mubr.f32.mxu1 %v19590_v2 }
 0x1de   : > { %7704 = vmatmul.mubr.f32.vlgmr.msra.gmra.mrb[36].mxu0 %v19656_v6 }
 0x1df   : > { %7709 = vmatprep.mubr.f32.mxu0 %v19590_v2  ;;  %18026 = vmatpush1.bf16.msra.mxu0 %v18025_v35 }
 0x1e0   : > { %8293 = vmatmul.mubr.f32.vlgmr.msra.gmra.mrb[36].mxu1 %v19656_v6  ;;  %18028 = vmatprep.subr.bf16.mxu0 %v20814_v21 }
 0x1e1   : > { %8298 = vmatprep.mubr.f32.mxu1 %v19590_v2  ;;  %18050 = vmatpush1.bf16.msra.mxu1 %v18049_v53  ;;  %v9389_v53 = vand.u32 4294901760, %v9388_v25 }
 0x1e2   : > { %7711 = vmatmul.mubr.f32.gmra.mrb[38].mxu0 %v19658_v7  ;;  %18052 = vmatprep.subr.bf16.mxu1 %v20821_v28 }
 0x1e3   : > { %7716 = vmatprep.mubr.f32.mxu0 %v19590_v2 }
 0x1e4   : > { %8300 = vmatmul.mubr.f32.gmra.mrb[38].mxu1 %v19658_v7 }
 0x1e5   : > { %8305 = vmatprep.mubr.f32.mxu1 %v19590_v2 }
 0x1e6   : > { %7718 = vmatmul.mubr.f32.gmra.mrb[40].mxu0 %v19660_v9 }
 0x1e7   : > { %7796 = vmatprep.mubr.f32.mxu0 %v19590_v2 }
 0x1e8   : > { %8307 = vmatmul.mubr.f32.gmra.mrb[40].mxu1 %v19660_v9 }
 0x1e9   : > { %8385 = vmatprep.mubr.f32.mxu1 %v19590_v2 }
 0x1ea   : > { %7799 = vmatmul.mubr.f32.vlgmr.msra.gmra.mrb[36].mxu0 %v19664_v10 }
 0x1eb   : > { %7804 = vmatprep.mubr.f32.mxu0 %v19590_v2  ;;  %18030 = vmatpush1.bf16.msra.mxu0 %v20864_v37 }
 0x1ec   : > { %8388 = vmatmul.mubr.f32.vlgmr.msra.gmra.mrb[36].mxu1 %v19664_v10  ;;  %18032 = vmatprep.subr.bf16.mxu0 %v18031_v32 }
 0x1ed   : > { %8393 = vmatprep.mubr.f32.mxu1 %v19590_v2  ;;  %18054 = vmatpush1.bf16.msra.mxu1 %v20874_v44 }
 0x1ee   : > { %7807 = vmatmul.mubr.f32.gmra.mrb[38].mxu0 %v19667_v11  ;;  %18056 = vmatprep.subr.bf16.mxu1 %v18055_v29 }
 0x1ef   : > { %7812 = vmatprep.mubr.f32.mxu0 %v19590_v2 }
 0x1f0   : > { %8396 = vmatmul.mubr.f32.gmra.mrb[38].mxu1 %v19667_v11 }
 0x1f1   : > { %8401 = vmatprep.mubr.f32.mxu1 %v19590_v2 }
 0x1f2   : > { %7815 = vmatmul.mubr.f32.gmra.mrb[40].mxu0 %v19670_v12 }
 0x1f3   : > { %7889 = vmatprep.mubr.f32.mxu0 %v19590_v2 }
 0x1f4   : > { %8404 = vmatmul.mubr.f32.gmra.mrb[40].mxu1 %v19670_v12 }
 0x1f5   : > { %8478 = vmatprep.mubr.f32.mxu1 %v19590_v2 }
 0x1f6   : > { %7893 = vmatmul.mubr.f32.vlgmr.msra.gmra.mrb[36].mxu0 %v19673_v13 }
 0x1f7   : > { %7898 = vmatprep.mubr.f32.mxu0 %v19590_v2  ;;  %18034 = vmatpush1.bf16.msra.mxu0 %v18033_v34 }
 0x1f8   : > { %8482 = vmatmul.mubr.f32.vlgmr.msra.gmra.mrb[36].mxu1 %v19673_v13  ;;  %18036 = vmatprep.subr.bf16.mxu0 %v20814_v21  ;;  %v21003_v21 = vsub.f32 %v7508_v22, %v8698_v41 }
 0x1f9   : > { %8487 = vmatprep.mubr.f32.mxu1 %v19590_v2  ;;  %18058 = vmatpush1.bf16.msra.mxu1 %v18057_v5 }
 0x1fa   : > { %7902 = vmatmul.mubr.f32.gmra.mrb[38].mxu0 %v19676_v14  ;;  %18060 = vmatprep.subr.bf16.mxu1 %v20821_v28  ;;  %v21009_v28 = vsub.f32 %v7514_v36, %v9287_v38  ;;  %v8810_v46 = vand.u32 4294901760, %v21003_v21  ;;  %v9405_v38 = vand.u32 4294901760, %v21058_v59 }
 0x1fb   : > { %7907 = vmatprep.mubr.f32.mxu0 %v19590_v2 }
 0x1fc   : > { %8491 = vmatmul.mubr.f32.gmra.mrb[38].mxu1 %v19676_v14  ;;  %v9399_v1 = vand.u32 4294901760, %v21009_v28  ;;  %v8811_v57 = vsub.f32 %v21003_v21, %v8810_v46 }
 0x1fd   : > { %8496 = vmatprep.mubr.f32.mxu1 %v19590_v2 }
 0x1fe   : > { %7911 = vmatmul.mubr.f32.gmra.mrb[40].mxu0 %v19684_v15  ;;  %v9400_v58 = vsub.f32 %v21009_v28, %v9399_v1  ;;  %v8812_v3 = vand.u32 4294901760, %v8811_v57 }
 0x1ff   : > { %7993 = vmatprep.mubr.f32.mxu0 %v19590_v2 }
 0x200   : > { %8500 = vmatmul.mubr.f32.gmra.mrb[40].mxu1 %v19684_v15  ;;  %v9401_v32 = vand.u32 4294901760, %v9400_v58  ;;  %v18067_v31 = vpack.c.bf16 %v8812_v3, %v8800_v33 }
 0x201   : > { %8582 = vmatprep.mubr.f32.mxu1 %v19590_v2 }
 0x202   : > { %7995 = vmatmul.mubr.f32.vlgmr.msra.gmra.mrb[36].mxu0 %v19656_v6 }
 0x203   : > { %8000 = vmatprep.mubr.f32.mxu0 %v19590_v2  ;;  %18038 = vmatpush1.bf16.msra.mxu0 %v20864_v37  ;;  %v8696_v37 = vand.u32 4294901760, %v17551_v42 }
 0x204   : > { %8584 = vmatmul.mubr.f32.vlgmr.msra.gmra.mrb[36].mxu1 %v19656_v6  ;;  %18064 = vmatprep.subr.bf16.mxu0 %v21014_v40 }
 0x205   : > { %8589 = vmatprep.mubr.f32.mxu1 %v19590_v2  ;;  %18062 = vmatpush1.bf16.msra.mxu1 %v20874_v44  ;;  %v21050_v20 = vsub.f32 %v17551_v42, %v8696_v37  ;;  %v9285_v44 = vand.u32 4294901760, %v17553_v19  ;;  %v21064_v55 = vpack.c.bf16 %v8700_v0, %v8696_v37  ;;  %v18091_v42 = vpack.c.bf16 %v9401_v32, %v9389_v53 }
 0x206   : > { %8002 = vmatmul.mubr.f32.gmra.mrb[38].mxu0 %v19658_v7  ;;  %18088 = vmatprep.subr.bf16.mxu1 %v21021_v24 }
 0x207   : > { %8007 = vmatprep.mubr.f32.mxu0 %v19590_v2  ;;  %v21056_v17 = vsub.f32 %v17553_v19, %v9285_v44  ;;  %v8804_v5 = vand.u32 4294901760, %v21050_v20  ;;  %v21074_v41 = vpack.c.bf16 %v9289_v30, %v9285_v44  ;;  %v9406_v44 = vsub.f32 %v21058_v59, %v9405_v38 }
 0x208   : > { %8591 = vmatmul.mubr.f32.gmra.mrb[38].mxu1 %v19658_v7 }
 0x209   : > { %v4420_v18 = vpop.f32.mrb[18].mxu0  ;;  %8596 = vmatprep.mubr.f32.mxu1 %v19590_v2  ;;  %v9393_v8 = vand.u32 4294901760, %v21056_v17  ;;  %v8805_v61 = vsub.f32 %v21050_v20, %v8804_v5 }
 0x20a   : > { %v18435_v39 = vadd.f32 %v4420_v18, %v20427_v45  ;;  %v4422_v35 = vpop.f32.mrb[19].mxu0  ;;  %8009 = vmatmul.mubr.f32.gmra.mrb[40].mxu0 %v19660_v9 }
 0x20b   : > { %v5009_v29 = vpop.f32.mrb[18].mxu1  ;;  %v18436_v34 = vadd.f32 %v4422_v35, %v20427_v45  ;;  %8083 = vmatprep.mubr.f32.mxu0 %v19590_v2  ;;  %v9394_v58 = vsub.f32 %v21056_v17, %v9393_v8  ;;  %v8818_v35 = vand.u32 4294901760, %v8817_v62  ;;  %v17597_v62 = vld [vmem:[%s19681_s5 + $0x250] sm:$0x1] }
 0x20c   : > { %17487 = vst [vmem:[%s20461_s17 + $0xe0] sm:$0xff] %v18435_v39  ;;  %v18441_v63 = vadd.f32 %v5009_v29, %v20427_v45  ;;  %v5011_v22 = vpop.f32.mrb[19].mxu1  ;;  %8598 = vmatmul.mubr.f32.gmra.mrb[40].mxu1 %v19660_v9  ;;  %v8806_v39 = vand.u32 4294901760, %v8805_v61 }
 0x20d   : > { %17488 = vst [vmem:[%s20461_s17 + $0xe8] sm:$0xff] %v18436_v34  ;;  %v18442_v36 = vadd.f32 %v5011_v22, %v20427_v45  ;;  %v4427_v54 = vpop.f32.mrb[20].mxu0  ;;  %8672 = vmatprep.mubr.f32.mxu1 %v19590_v2  ;;  %v9395_v34 = vand.u32 4294901760, %v9394_v58 }
 0x20e   : > { %17489 = vst [vmem:[%s20461_s17 + $0xf0] sm:$0xff] %v18441_v63  ;;  %v18437_v49 = vadd.f32 %v4427_v54, %v20453_v52  ;;  %v4429_v47 = vpop.f32.mrb[21].mxu0  ;;  %8085 = vmatmul.mubr.f32.vlgmr.msra.gmra.mrb[36].mxu0 %v19656_v6  ;;  %v9407_v63 = vand.u32 4294901760, %v9406_v44  ;;  %v18069_v22 = vpack.c.bf16 %v8818_v35, %v8806_v39  ;;  %v18095_v54 = vpack.c.bf16 %v21009_v28, %v21007_v60  ;;  %v17598_v28 = vld [vmem:[%s19681_s5 + $0x258] sm:$0x1]  ;;  %v17589_v44 = vld [vmem:[%s19681_s5 + $0x210] sm:$0xff] }
 0x20f   : > { %17490 = vst.msk [vmem:[%s20461_s17 + $0xf8] sm:$0xff] %vm2612_vm2, %v18442_v36  ;;  %v5016_v43 = vpop.f32.mrb[20].mxu1  ;;  %v18438_v19 = vadd.f32 %v4429_v47, %v20453_v52  ;;  %8090 = vmatprep.mubr.f32.mxu0 %v19590_v2  ;;  %18066 = vmatpush1.bf16.msra.mxu0 %v21064_v55  ;;  %v18097_v47 = vpack.c.bf16 %v21058_v59, %v21056_v17 }
 0x210   : > { %17495 = vst [vmem:[%s20461_s17 + $0x120] sm:$0xff] %v18437_v49  ;;  %v18443_v57 = vadd.f32 %v5016_v43, %v20453_v52  ;;  %v5018_v37 = vpop.f32.mrb[21].mxu1  ;;  %8674 = vmatmul.mubr.f32.vlgmr.msra.gmra.mrb[36].mxu1 %v19656_v6  ;;  %18068 = vmatprep.subr.bf16.mxu0 %v18067_v31  ;;  %v18071_v31 = vpack.c.bf16 %v21003_v21, %v21001_v4  ;;  %v17596_v21 = vld [vmem:[%s19681_s5 + $0x248] sm:$0x1] }
 0x211   : > { %17496 = vst [vmem:[%s20461_s17 + $0x128] sm:$0xff] %v18438_v19  ;;  %v18444_v0 = vadd.f32 %v5018_v37, %v20453_v52  ;;  %v4434_v25 = vpop.f32.mrb[22].mxu0  ;;  %8679 = vmatprep.mubr.f32.mxu1 %v19590_v2  ;;  %18090 = vmatpush1.bf16.msra.mxu1 %v21074_v41  ;;  %v18093_v36 = vpack.c.bf16 %v9407_v63, %v9395_v34  ;;  %v17587_v37 = vld [vmem:[%s19681_s5 + $0x200] sm:$0xff] }
 0x212   : > { %17497 = vst [vmem:[%s20461_s17 + $0x130] sm:$0xff] %v18443_v57  ;;  %v18439_v30 = vadd.f32 %v4434_v25, %v20478_v16  ;;  %v4436_v33 = vpop.f32.mrb[23].mxu0  ;;  %8092 = vmatmul.mubr.f32.gmra.mrb[38].mxu0 %v19658_v7  ;;  %18092 = vmatprep.subr.bf16.mxu1 %v18091_v42  ;;  %v18073_v49 = vpack.c.bf16 %v21052_v27, %v21050_v20 }
 0x213   : > { %17498 = vst.msk [vmem:[%s20461_s17 + $0x138] sm:$0xff] %vm2612_vm2, %v18444_v0  ;;  %v5023_v3 = vpop.f32.mrb[22].mxu1  ;;  %v18440_v18 = vadd.f32 %v4436_v33, %v20478_v16  ;;  %8097 = vmatprep.mubr.f32.mxu0 %v19590_v2  ;;  %v18079_v42 = vpack.c.bf16 %v8810_v46, %v8798_v56  ;;  %v18103_v43 = vpack.c.bf16 %v9399_v1, %v9387_v51  ;;  %v17588_v56 = vld [vmem:[%s19681_s5 + $0x208] sm:$0xff]  ;;  %v9918_v46 = vsel %vm224_vm1, %v17596_v21, 0  ;;  %v17590_v51 = vld [vmem:[%s19681_s5 + $0x218] sm:$0xff] }
 0x214   : > { %17503 = vst [vmem:[%s20461_s17 + $0x160] sm:$0xf] %v18439_v30  ;;  %v18445_v53 = vadd.f32 %v5023_v3, %v20478_v16  ;;  %v5025_v32 = vpop.f32.mrb[23].mxu1  ;;  %8681 = vmatmul.mubr.f32.gmra.mrb[38].mxu1 %v19658_v7  ;;  %v18081_v4 = vpack.c.bf16 %v8816_v23, %v8804_v5  ;;  %v18105_v60 = vpack.c.bf16 %v9405_v38, %v9393_v8  ;;  %v9924_v1 = vsel %vm224_vm1, %v17598_v28, 0  ;;  %v17595_v8 = vld [vmem:[%s19681_s5 + $0x240] sm:$0x1] }
 0x215   : > { %17504 = vst [vmem:[%s20461_s17 + $0x168] sm:$0xf] %v18440_v18  ;;  %v18446_v29 = vadd.f32 %v5025_v32, %v20478_v16  ;;  %8686 = vmatprep.mubr.f32.mxu1 %v19590_v2  ;;  %v9938_v20 = vand.u32 4294901760, %v17588_v56  ;;  %v9942_v27 = vand.u32 4294901760, %v9918_v46  ;;  %v10527_v59 = vand.u32 4294901760, %v17590_v51 }
 0x216   : > { %17505 = vst [vmem:[%s20461_s17 + $0x170] sm:$0xf] %v18445_v53  ;;  %8099 = vmatmul.mubr.f32.gmra.mrb[40].mxu0 %v19660_v9  ;;  %v10531_v5 = vand.u32 4294901760, %v9924_v1  ;;  %v9915_v0 = vsel %vm224_vm1, %v17595_v8, 0  ;;  %v9921_v30 = vsel %vm224_vm1, %v17597_v62, 0 }
 0x217   : > { %17506 = vst.msk [vmem:[%s20461_s17 + $0x178] sm:$0xf] %vm2629_vm3, %v18446_v29  ;;  %8762 = vmatprep.mubr.f32.mxu0 %v19590_v2  ;;  %v21204_v17 = vsub.f32 %v17588_v56, %v9938_v20  ;;  %v21210_v23 = vsub.f32 %v17590_v51, %v10527_v59  ;;  %v21217_v38 = vpack.c.bf16 %v9942_v27, %v9938_v20  ;;  %v9944_v18 = vand.u32 4294901760, %v9915_v0 }
 0x218   : > { %8688 = vmatmul.mubr.f32.gmra.mrb[40].mxu1 %v19660_v9  ;;  %v21224_v57 = vpack.c.bf16 %v10531_v5, %v10527_v59  ;;  %v10533_v29 = vand.u32 4294901760, %v9921_v30 }
 0x219   : > { %9351 = vmatprep.mubr.f32.mxu1 %v19590_v2  ;;  %v10042_v19 = vand.u32 4294901760, %v21204_v17  ;;  %v10631_v25 = vand.u32 4294901760, %v21210_v23  ;;  %v21255_v32 = vsub.f32 %v9915_v0, %v9944_v18 }
 0x21a   : > { %8768 = vmatmul.mubr.f32.vlgmr.msra.gmra.mrb[42].mxu0 %v19723_v48 }
 0x21b   : > { %8773 = vmatprep.mubr.f32.mxu0 %v19590_v2  ;;  %18070 = vmatpush1.bf16.msra.mxu0 %v18069_v22  ;;  %v10043_v33 = vsub.f32 %v21204_v17, %v10042_v19  ;;  %v10632_v39 = vsub.f32 %v21210_v23, %v10631_v25  ;;  %v10060_v28 = vand.u32 4294901760, %v21255_v32 }
 0x21c   : > { %9357 = vmatmul.mubr.f32.vlgmr.msra.gmra.mrb[42].mxu1 %v19723_v48  ;;  %18072 = vmatprep.subr.bf16.mxu0 %v18071_v31 }
 0x21d   : > { %9362 = vmatprep.mubr.f32.mxu1 %v19590_v2  ;;  %18094 = vmatpush1.bf16.msra.mxu1 %v18093_v36  ;;  %v10044_v34 = vand.u32 4294901760, %v10043_v33  ;;  %v21261_v36 = vsub.f32 %v9921_v30, %v10533_v29  ;;  %v10061_v33 = vsub.f32 %v21255_v32, %v10060_v28 }
 0x21e   : > { %8779 = vmatmul.mubr.f32.gmra.mrb[44].mxu0 %v19728_v50  ;;  %18096 = vmatprep.subr.bf16.mxu1 %v18095_v54 }
 0x21f   : > { %8784 = vmatprep.mubr.f32.mxu0 %v19590_v2 }
 0x220   : > { %9368 = vmatmul.mubr.f32.gmra.mrb[44].mxu1 %v19728_v50 }
 0x221   : > { %9373 = vmatprep.mubr.f32.mxu1 %v19590_v2 }
 0x222   : > { %8790 = vmatmul.mubr.f32.gmra.mrb[46].mxu0 %v19773_v26 }
 0x223   : > { %8880 = vmatprep.mubr.f32.mxu0 %v19590_v2 }
 0x224   : > { %9379 = vmatmul.mubr.f32.gmra.mrb[46].mxu1 %v19773_v26 }
 0x225   : > { %9469 = vmatprep.mubr.f32.mxu1 %v19590_v2 }
 0x226   : > { %8882 = vmatmul.mubr.f32.vlgmr.msra.gmra.mrb[42].mxu0 %v19656_v6 }
 0x227   : > { %8887 = vmatprep.mubr.f32.mxu0 %v19590_v2  ;;  %18074 = vmatpush1.bf16.msra.mxu0 %v18073_v49 }
 0x228   : > { %9471 = vmatmul.mubr.f32.vlgmr.msra.gmra.mrb[42].mxu1 %v19656_v6  ;;  %18076 = vmatprep.subr.bf16.mxu0 %v21014_v40 }
 0x229   : > { %9476 = vmatprep.mubr.f32.mxu1 %v19590_v2  ;;  %18098 = vmatpush1.bf16.msra.mxu1 %v18097_v47  ;;  %v10633_v47 = vand.u32 4294901760, %v10632_v39 }
 0x22a   : > { %8889 = vmatmul.mubr.f32.gmra.mrb[44].mxu0 %v19658_v7  ;;  %18100 = vmatprep.subr.bf16.mxu1 %v21021_v24 }
 0x22b   : > { %8894 = vmatprep.mubr.f32.mxu0 %v19590_v2 }
 0x22c   : > { %9478 = vmatmul.mubr.f32.gmra.mrb[44].mxu1 %v19658_v7 }
 0x22d   : > { %9483 = vmatprep.mubr.f32.mxu1 %v19590_v2 }
 0x22e   : > { %8896 = vmatmul.mubr.f32.gmra.mrb[46].mxu0 %v19660_v9 }
 0x22f   : > { %8974 = vmatprep.mubr.f32.mxu0 %v19590_v2 }
 0x230   : > { %9485 = vmatmul.mubr.f32.gmra.mrb[46].mxu1 %v19660_v9 }
 0x231   : > { %9563 = vmatprep.mubr.f32.mxu1 %v19590_v2 }
 0x232   : > { %8977 = vmatmul.mubr.f32.vlgmr.msra.gmra.mrb[42].mxu0 %v19664_v10 }
 0x233   : > { %8982 = vmatprep.mubr.f32.mxu0 %v19590_v2  ;;  %18078 = vmatpush1.bf16.msra.mxu0 %v21064_v55 }
 0x234   : > { %9566 = vmatmul.mubr.f32.vlgmr.msra.gmra.mrb[42].mxu1 %v19664_v10  ;;  %18080 = vmatprep.subr.bf16.mxu0 %v18079_v42 }
 0x235   : > { %9571 = vmatprep.mubr.f32.mxu1 %v19590_v2  ;;  %18102 = vmatpush1.bf16.msra.mxu1 %v21074_v41 }
 0x236   : > { %8985 = vmatmul.mubr.f32.gmra.mrb[44].mxu0 %v19667_v11  ;;  %18104 = vmatprep.subr.bf16.mxu1 %v18103_v43 }
 0x237   : > { %8990 = vmatprep.mubr.f32.mxu0 %v19590_v2 }
 0x238   : > { %9574 = vmatmul.mubr.f32.gmra.mrb[44].mxu1 %v19667_v11 }
 0x239   : > { %9579 = vmatprep.mubr.f32.mxu1 %v19590_v2 }
 0x23a   : > { %8993 = vmatmul.mubr.f32.gmra.mrb[46].mxu0 %v19670_v12 }
 0x23b   : > { %9067 = vmatprep.mubr.f32.mxu0 %v19590_v2 }
 0x23c   : > { %9582 = vmatmul.mubr.f32.gmra.mrb[46].mxu1 %v19670_v12 }
 0x23d   : > { %9656 = vmatprep.mubr.f32.mxu1 %v19590_v2 }
 0x23e   : > { %9071 = vmatmul.mubr.f32.vlgmr.msra.gmra.mrb[42].mxu0 %v19673_v13 }
 0x23f   : > { %9076 = vmatprep.mubr.f32.mxu0 %v19590_v2  ;;  %18082 = vmatpush1.bf16.msra.mxu0 %v18081_v4 }
 0x240   : > { %9660 = vmatmul.mubr.f32.vlgmr.msra.gmra.mrb[42].mxu1 %v19673_v13  ;;  %18084 = vmatprep.subr.bf16.mxu0 %v21014_v40  ;;  %v21206_v40 = vsub.f32 %v9918_v46, %v9942_v27 }
 0x241   : > { %9665 = vmatprep.mubr.f32.mxu1 %v19590_v2  ;;  %18106 = vmatpush1.bf16.msra.mxu1 %v18105_v60 }
 0x242   : > { %9080 = vmatmul.mubr.f32.gmra.mrb[44].mxu0 %v19676_v14  ;;  %18108 = vmatprep.subr.bf16.mxu1 %v21021_v24  ;;  %v21212_v24 = vsub.f32 %v9924_v1, %v10531_v5  ;;  %v10054_v61 = vand.u32 4294901760, %v21206_v40  ;;  %v10649_v5 = vand.u32 4294901760, %v21261_v36 }
 0x243   : > { %9085 = vmatprep.mubr.f32.mxu0 %v19590_v2 }
 0x244   : > { %9669 = vmatmul.mubr.f32.gmra.mrb[44].mxu1 %v19676_v14  ;;  %v10643_v58 = vand.u32 4294901760, %v21212_v24  ;;  %v10055_v3 = vsub.f32 %v21206_v40, %v10054_v61 }
 0x245   : > { %9674 = vmatprep.mubr.f32.mxu1 %v19590_v2 }
 0x246   : > { %9089 = vmatmul.mubr.f32.gmra.mrb[46].mxu0 %v19684_v15  ;;  %v10644_v35 = vsub.f32 %v21212_v24, %v10643_v58  ;;  %v10056_v63 = vand.u32 4294901760, %v10055_v3 }
 0x247   : > { %9171 = vmatprep.mubr.f32.mxu0 %v19590_v2 }
 0x248   : > { %9678 = vmatmul.mubr.f32.gmra.mrb[46].mxu1 %v19684_v15  ;;  %v10645_v42 = vand.u32 4294901760, %v10644_v35  ;;  %v18115_v51 = vpack.c.bf16 %v10056_v63, %v10044_v34 }
 0x249   : > { %9760 = vmatprep.mubr.f32.mxu1 %v19590_v2 }
 0x24a   : > { %9173 = vmatmul.mubr.f32.vlgmr.msra.gmra.mrb[42].mxu0 %v19656_v6 }
 0x24b   : > { %9178 = vmatprep.mubr.f32.mxu0 %v19590_v2  ;;  %18086 = vmatpush1.bf16.msra.mxu0 %v21064_v55  ;;  %v9940_v55 = vand.u32 4294901760, %v17587_v37 }
 0x24c   : > { %9762 = vmatmul.mubr.f32.vlgmr.msra.gmra.mrb[42].mxu1 %v19656_v6  ;;  %18112 = vmatprep.subr.bf16.mxu0 %v21217_v38 }
 0x24d   : > { %9767 = vmatprep.mubr.f32.mxu1 %v19590_v2  ;;  %18110 = vmatpush1.bf16.msra.mxu1 %v21074_v41  ;;  %v21253_v53 = vsub.f32 %v17587_v37, %v9940_v55  ;;  %v10529_v41 = vand.u32 4294901760, %v17589_v44  ;;  %v21267_v21 = vpack.c.bf16 %v9944_v18, %v9940_v55  ;;  %v18139_v37 = vpack.c.bf16 %v10645_v42, %v10633_v47 }
 0x24e   : > { %9180 = vmatmul.mubr.f32.gmra.mrb[44].mxu0 %v19658_v7  ;;  %18136 = vmatprep.subr.bf16.mxu1 %v21224_v57 }
 0x24f   : > { %9185 = vmatprep.mubr.f32.mxu0 %v19590_v2  ;;  %v21259_v31 = vsub.f32 %v17589_v44, %v10529_v41  ;;  %v10048_v60 = vand.u32 4294901760, %v21253_v53  ;;  %v21277_v27 = vpack.c.bf16 %v10533_v29, %v10529_v41  ;;  %v10650_v41 = vsub.f32 %v21261_v36, %v10649_v5 }
 0x250   : > { %9769 = vmatmul.mubr.f32.gmra.mrb[44].mxu1 %v19658_v7 }
 0x251   : > { %v5664_v22 = vpop.f32.mrb[24].mxu0  ;;  %9774 = vmatprep.mubr.f32.mxu1 %v19590_v2  ;;  %v10637_v59 = vand.u32 4294901760, %v21259_v31  ;;  %v10049_v30 = vsub.f32 %v21253_v53, %v10048_v60 }
 0x252   : > { %v18447_v54 = vadd.f32 %v5664_v22, %v20427_v45  ;;  %v5666_v49 = vpop.f32.mrb[25].mxu0  ;;  %9187 = vmatmul.mubr.f32.gmra.mrb[46].mxu0 %v19660_v9 }
 0x253   : > { %v6253_v43 = vpop.f32.mrb[24].mxu1  ;;  %v18448_v4 = vadd.f32 %v5666_v49, %v20427_v45  ;;  %9261 = vmatprep.mubr.f32.mxu0 %v19590_v2  ;;  %v10638_v35 = vsub.f32 %v21259_v31, %v10637_v59  ;;  %v10062_v49 = vand.u32 4294901760, %v10061_v33  ;;  %v17601_v33 = vld [vmem:[%s19681_s5 + $0x270] sm:$0x1] }
 0x254   : > { %17523 = vst [vmem:[%s20461_s17 + $0x180] sm:$0xff] %v18447_v54  ;;  %v18453_v56 = vadd.f32 %v6253_v43, %v20427_v45  ;;  %v6255_v46 = vpop.f32.mrb[25].mxu1  ;;  %9776 = vmatmul.mubr.f32.gmra.mrb[46].mxu1 %v19660_v9  ;;  %v10050_v54 = vand.u32 4294901760, %v10049_v30 }
 0x255   : > { %17524 = vst [vmem:[%s20461_s17 + $0x188] sm:$0xff] %v18448_v4  ;;  %v18454_v1 = vadd.f32 %v6255_v46, %v20427_v45  ;;  %v5671_v20 = vpop.f32.mrb[26].mxu0  ;;  %9850 = vmatprep.mubr.f32.mxu1 %v19590_v2  ;;  %v10639_v4 = vand.u32 4294901760, %v10638_v35 }
 0x256   : > { %17525 = vst [vmem:[%s20461_s17 + $0x190] sm:$0xff] %v18453_v56  ;;  %v18449_v8 = vadd.f32 %v5671_v20, %v20453_v52  ;;  %v5673_v62 = vpop.f32.mrb[27].mxu0  ;;  %9263 = vmatmul.mubr.f32.vlgmr.msra.gmra.mrb[42].mxu0 %v19656_v6  ;;  %v10651_v56 = vand.u32 4294901760, %v10650_v41  ;;  %v18117_v46 = vpack.c.bf16 %v10062_v49, %v10050_v54  ;;  %v18143_v20 = vpack.c.bf16 %v21212_v24, %v21210_v23  ;;  %v17602_v24 = vld [vmem:[%s19681_s5 + $0x278] sm:$0x1]  ;;  %v17593_v41 = vld [vmem:[%s19681_s5 + $0x230] sm:$0xff] }
 0x257   : > { %17526 = vst [vmem:[%s20461_s17 + $0x198] sm:$0xff] %v18454_v1  ;;  %v6260_v0 = vpop.f32.mrb[26].mxu1  ;;  %v18450_v44 = vadd.f32 %v5673_v62, %v20453_v52  ;;  %9268 = vmatprep.mubr.f32.mxu0 %v19590_v2  ;;  %18114 = vmatpush1.bf16.msra.mxu0 %v21267_v21  ;;  %v18145_v62 = vpack.c.bf16 %v21261_v36, %v21259_v31 }
 0x258   : > { %17531 = vst [vmem:[%s20461_s17 + $0x1c0] sm:$0xff] %v18449_v8  ;;  %v18455_v3 = vadd.f32 %v6260_v0, %v20453_v52  ;;  %v6262_v55 = vpop.f32.mrb[27].mxu1  ;;  %9852 = vmatmul.mubr.f32.vlgmr.msra.gmra.mrb[42].mxu1 %v19656_v6  ;;  %18116 = vmatprep.subr.bf16.mxu0 %v18115_v51  ;;  %v18119_v51 = vpack.c.bf16 %v21206_v40, %v21204_v17  ;;  %v17600_v40 = vld [vmem:[%s19681_s5 + $0x268] sm:$0x1] }
 0x259   : > { %17532 = vst [vmem:[%s20461_s17 + $0x1c8] sm:$0xff] %v18450_v44  ;;  %v18456_v18 = vadd.f32 %v6262_v55, %v20453_v52  ;;  %v5678_v39 = vpop.f32.mrb[28].mxu0  ;;  %9857 = vmatprep.mubr.f32.mxu1 %v19590_v2  ;;  %18138 = vmatpush1.bf16.msra.mxu1 %v21277_v27  ;;  %v18141_v1 = vpack.c.bf16 %v10651_v56, %v10639_v4  ;;  %v17591_v55 = vld [vmem:[%s19681_s5 + $0x220] sm:$0xff] }
 0x25a   : > { %17533 = vst [vmem:[%s20461_s17 + $0x1d0] sm:$0xff] %v18455_v3  ;;  %v18451_v29 = vadd.f32 %v5678_v39, %v20478_v16  ;;  %v5680_v34 = vpop.f32.mrb[29].mxu0  ;;  %9270 = vmatmul.mubr.f32.gmra.mrb[44].mxu0 %v19658_v7  ;;  %18140 = vmatprep.subr.bf16.mxu1 %v18139_v37  ;;  %v18121_v8 = vpack.c.bf16 %v21255_v32, %v21253_v53 }
 0x25b   : > { %17534 = vst [vmem:[%s20461_s17 + $0x1d8] sm:$0xff] %v18456_v18  ;;  %v6267_v63 = vpop.f32.mrb[28].mxu1  ;;  %v18452_v22 = vadd.f32 %v5680_v34, %v20478_v16  ;;  %9275 = vmatprep.mubr.f32.mxu0 %v19590_v2  ;;  %v18127_v37 = vpack.c.bf16 %v10054_v61, %v10042_v19  ;;  %v18151_v0 = vpack.c.bf16 %v10643_v58, %v10631_v25  ;;  %v17592_v19 = vld [vmem:[%s19681_s5 + $0x228] sm:$0xff]  ;;  %v9930_v61 = vsel %vm224_vm1, %v17600_v40, 0  ;;  %v17594_v25 = vld [vmem:[%s19681_s5 + $0x238] sm:$0xff] }
 0x25c   : > { %17539 = vst [vmem:[%s20461_s17 + $0x200] sm:$0xf] %v18451_v29  ;;  %v18457_v47 = vadd.f32 %v6267_v63, %v20478_v16  ;;  %v6269_v42 = vpop.f32.mrb[29].mxu1  ;;  %9859 = vmatmul.mubr.f32.gmra.mrb[44].mxu1 %v19658_v7  ;;  %v18129_v17 = vpack.c.bf16 %v10060_v28, %v10048_v60  ;;  %v18153_v23 = vpack.c.bf16 %v10649_v5, %v10637_v59  ;;  %v9936_v58 = vsel %vm224_vm1, %v17602_v24, 0  ;;  %v17599_v59 = vld [vmem:[%s19681_s5 + $0x260] sm:$0x1] }
 0x25d   : > { %17540 = vst [vmem:[%s20461_s17 + $0x208] sm:$0xf] %v18452_v22  ;;  %v18458_v43 = vadd.f32 %v6269_v42, %v20478_v16  ;;  %9864 = vmatprep.mubr.f32.mxu1 %v19590_v2  ;;  %v11116_v53 = vand.u32 4294901760, %v17592_v19  ;;  %v11120_v32 = vand.u32 4294901760, %v9930_v61  ;;  %v11705_v36 = vand.u32 4294901760, %v17594_v25 }
 0x25e   : > { %17541 = vst [vmem:[%s20461_s17 + $0x210] sm:$0xf] %v18457_v47  ;;  %9277 = vmatmul.mubr.f32.gmra.mrb[46].mxu0 %v19660_v9  ;;  %v11709_v60 = vand.u32 4294901760, %v9936_v58  ;;  %v9927_v18 = vsel %vm224_vm1, %v17599_v59, 0  ;;  %v9933_v29 = vsel %vm224_vm1, %v17601_v33, 0 }
 0x25f   : > { %17542 = vst [vmem:[%s20461_s17 + $0x218] sm:$0xf] %v18458_v43  ;;  %10006 = vmatprep.mubr.f32.mxu0 %v19590_v2  ;;  %v21404_v31 = vsub.f32 %v17592_v19, %v11116_v53  ;;  %v21410_v28 = vsub.f32 %v17594_v25, %v11705_v36  ;;  %v21417_v5 = vpack.c.bf16 %v11120_v32, %v11116_v53  ;;  %v11122_v22 = vand.u32 4294901760, %v9927_v18 }
 0x260   : > { %9866 = vmatmul.mubr.f32.gmra.mrb[46].mxu1 %v19660_v9  ;;  %v21424_v3 = vpack.c.bf16 %v11709_v60, %v11705_v36  ;;  %v11711_v43 = vand.u32 4294901760, %v9933_v29 }
 0x261   : > { %10595 = vmatprep.mubr.f32.mxu1 %v19590_v2  ;;  %v11220_v44 = vand.u32 4294901760, %v21404_v31  ;;  %v11809_v39 = vand.u32 4294901760, %v21410_v28  ;;  %v21455_v42 = vsub.f32 %v9927_v18, %v11122_v22 }
 0x262   : > { %10012 = vmatmul.mubr.f32.vlgmr.msra.gmra.mrb[48].mxu0 %v19723_v48 }
 0x263   : > { %10017 = vmatprep.mubr.f32.mxu0 %v19590_v2  ;;  %18118 = vmatpush1.bf16.msra.mxu0 %v18117_v46  ;;  %v11221_v34 = vsub.f32 %v21404_v31, %v11220_v44  ;;  %v11810_v54 = vsub.f32 %v21410_v28, %v11809_v39  ;;  %v11238_v24 = vand.u32 4294901760, %v21455_v42 }
 0x264   : > { %10601 = vmatmul.mubr.f32.vlgmr.msra.gmra.mrb[48].mxu1 %v19723_v48  ;;  %18120 = vmatprep.subr.bf16.mxu0 %v18119_v51 }
 0x265   : > { %10606 = vmatprep.mubr.f32.mxu1 %v19590_v2  ;;  %18142 = vmatpush1.bf16.msra.mxu1 %v18141_v1  ;;  %v11222_v4 = vand.u32 4294901760, %v11221_v34  ;;  %v21461_v1 = vsub.f32 %v9933_v29, %v11711_v43  ;;  %v11239_v34 = vsub.f32 %v21455_v42, %v11238_v24 }
 0x266   : > { %10023 = vmatmul.mubr.f32.gmra.mrb[50].mxu0 %v19728_v50  ;;  %18144 = vmatprep.subr.bf16.mxu1 %v18143_v20 }
 0x267   : > { %10028 = vmatprep.mubr.f32.mxu0 %v19590_v2 }
 0x268   : > { %10612 = vmatmul.mubr.f32.gmra.mrb[50].mxu1 %v19728_v50 }
 0x269   : > { %10617 = vmatprep.mubr.f32.mxu1 %v19590_v2 }
 0x26a   : > { %10034 = vmatmul.mubr.f32.gmra.mrb[52].mxu0 %v19773_v26 }
 0x26b   : > { %10124 = vmatprep.mubr.f32.mxu0 %v19590_v2 }
 0x26c   : > { %10623 = vmatmul.mubr.f32.gmra.mrb[52].mxu1 %v19773_v26 }
 0x26d   : > { %10713 = vmatprep.mubr.f32.mxu1 %v19590_v2 }
 0x26e   : > { %10126 = vmatmul.mubr.f32.vlgmr.msra.gmra.mrb[48].mxu0 %v19656_v6 }
 0x26f   : > { %10131 = vmatprep.mubr.f32.mxu0 %v19590_v2  ;;  %18122 = vmatpush1.bf16.msra.mxu0 %v18121_v8 }
 0x270   : > { %10715 = vmatmul.mubr.f32.vlgmr.msra.gmra.mrb[48].mxu1 %v19656_v6  ;;  %18124 = vmatprep.subr.bf16.mxu0 %v21217_v38 }
 0x271   : > { %10720 = vmatprep.mubr.f32.mxu1 %v19590_v2  ;;  %18146 = vmatpush1.bf16.msra.mxu1 %v18145_v62  ;;  %v11811_v62 = vand.u32 4294901760, %v11810_v54 }
 0x272   : > { %10133 = vmatmul.mubr.f32.gmra.mrb[50].mxu0 %v19658_v7  ;;  %18148 = vmatprep.subr.bf16.mxu1 %v21224_v57 }
 0x273   : > { %10138 = vmatprep.mubr.f32.mxu0 %v19590_v2 }
 0x274   : > { %10722 = vmatmul.mubr.f32.gmra.mrb[50].mxu1 %v19658_v7 }
 0x275   : > { %10727 = vmatprep.mubr.f32.mxu1 %v19590_v2 }
 0x276   : > { %10140 = vmatmul.mubr.f32.gmra.mrb[52].mxu0 %v19660_v9 }
 0x277   : > { %10218 = vmatprep.mubr.f32.mxu0 %v19590_v2 }
 0x278   : > { %10729 = vmatmul.mubr.f32.gmra.mrb[52].mxu1 %v19660_v9 }
 0x279   : > { %10807 = vmatprep.mubr.f32.mxu1 %v19590_v2 }
 0x27a   : > { %10221 = vmatmul.mubr.f32.vlgmr.msra.gmra.mrb[48].mxu0 %v19664_v10 }
 0x27b   : > { %10226 = vmatprep.mubr.f32.mxu0 %v19590_v2  ;;  %18126 = vmatpush1.bf16.msra.mxu0 %v21267_v21 }
 0x27c   : > { %10810 = vmatmul.mubr.f32.vlgmr.msra.gmra.mrb[48].mxu1 %v19664_v10  ;;  %18128 = vmatprep.subr.bf16.mxu0 %v18127_v37 }
 0x27d   : > { %10815 = vmatprep.mubr.f32.mxu1 %v19590_v2  ;;  %18150 = vmatpush1.bf16.msra.mxu1 %v21277_v27 }
 0x27e   : > { %10229 = vmatmul.mubr.f32.gmra.mrb[50].mxu0 %v19667_v11  ;;  %18152 = vmatprep.subr.bf16.mxu1 %v18151_v0 }
 0x27f   : > { %10234 = vmatprep.mubr.f32.mxu0 %v19590_v2 }
 0x280   : > { %10818 = vmatmul.mubr.f32.gmra.mrb[50].mxu1 %v19667_v11 }
 0x281   : > { %10823 = vmatprep.mubr.f32.mxu1 %v19590_v2 }
 0x282   : > { %10237 = vmatmul.mubr.f32.gmra.mrb[52].mxu0 %v19670_v12 }
 0x283   : > { %10311 = vmatprep.mubr.f32.mxu0 %v19590_v2 }
 0x284   : > { %10826 = vmatmul.mubr.f32.gmra.mrb[52].mxu1 %v19670_v12 }
 0x285   : > { %10900 = vmatprep.mubr.f32.mxu1 %v19590_v2 }
 0x286   : > { %10315 = vmatmul.mubr.f32.vlgmr.msra.gmra.mrb[48].mxu0 %v19673_v13 }
 0x287   : > { %10320 = vmatprep.mubr.f32.mxu0 %v19590_v2  ;;  %18130 = vmatpush1.bf16.msra.mxu0 %v18129_v17 }
 0x288   : > { %10904 = vmatmul.mubr.f32.vlgmr.msra.gmra.mrb[48].mxu1 %v19673_v13  ;;  %18132 = vmatprep.subr.bf16.mxu0 %v21217_v38  ;;  %v21406_v38 = vsub.f32 %v9930_v61, %v11120_v32 }
 0x289   : > { %10909 = vmatprep.mubr.f32.mxu1 %v19590_v2  ;;  %18154 = vmatpush1.bf16.msra.mxu1 %v18153_v23 }
 0x28a   : > { %10324 = vmatmul.mubr.f32.gmra.mrb[50].mxu0 %v19676_v14  ;;  %18156 = vmatprep.subr.bf16.mxu1 %v21224_v57  ;;  %v21412_v57 = vsub.f32 %v9936_v58, %v11709_v60  ;;  %v11232_v30 = vand.u32 4294901760, %v21406_v38  ;;  %v11827_v60 = vand.u32 4294901760, %v21461_v1 }
 0x28b   : > { %10329 = vmatprep.mubr.f32.mxu0 %v19590_v2 }
 0x28c   : > { %10913 = vmatmul.mubr.f32.gmra.mrb[50].mxu1 %v19676_v14  ;;  %v11821_v35 = vand.u32 4294901760, %v21412_v57  ;;  %v11233_v63 = vsub.f32 %v21406_v38, %v11232_v30 }
 0x28d   : > { %10918 = vmatprep.mubr.f32.mxu1 %v19590_v2 }
 0x28e   : > { %10333 = vmatmul.mubr.f32.gmra.mrb[52].mxu0 %v19684_v15  ;;  %v11822_v49 = vsub.f32 %v21412_v57, %v11821_v35  ;;  %v11234_v56 = vand.u32 4294901760, %v11233_v63 }
 0x28f   : > { %10415 = vmatprep.mubr.f32.mxu0 %v19590_v2 }
 0x290   : > { %10922 = vmatmul.mubr.f32.gmra.mrb[52].mxu1 %v19684_v15  ;;  %v11823_v37 = vand.u32 4294901760, %v11822_v49  ;;  %v18163_v25 = vpack.c.bf16 %v11234_v56, %v11222_v4 }
 0x291   : > { %11004 = vmatprep.mubr.f32.mxu1 %v19590_v2 }
 0x292   : > { %10417 = vmatmul.mubr.f32.vlgmr.msra.gmra.mrb[48].mxu0 %v19656_v6 }
 0x293   : > { %10422 = vmatprep.mubr.f32.mxu0 %v19590_v2  ;;  %18134 = vmatpush1.bf16.msra.mxu0 %v21267_v21  ;;  %v11118_v21 = vand.u32 4294901760, %v17591_v55 }
 0x294   : > { %11006 = vmatmul.mubr.f32.vlgmr.msra.gmra.mrb[48].mxu1 %v19656_v6  ;;  %18160 = vmatprep.subr.bf16.mxu0 %v21417_v5 }
 0x295   : > { %11011 = vmatprep.mubr.f32.mxu1 %v19590_v2  ;;  %18158 = vmatpush1.bf16.msra.mxu1 %v21277_v27  ;;  %v21453_v47 = vsub.f32 %v17591_v55, %v11118_v21  ;;  %v11707_v27 = vand.u32 4294901760, %v17593_v41  ;;  %v21467_v40 = vpack.c.bf16 %v11122_v22, %v11118_v21  ;;  %v18187_v55 = vpack.c.bf16 %v11823_v37, %v11811_v62 }
 0x296   : > { %10424 = vmatmul.mubr.f32.gmra.mrb[50].mxu0 %v19658_v7  ;;  %18184 = vmatprep.subr.bf16.mxu1 %v21424_v3 }
 0x297   : > { %10429 = vmatprep.mubr.f32.mxu0 %v19590_v2  ;;  %v21459_v51 = vsub.f32 %v17593_v41, %v11707_v27  ;;  %v11226_v23 = vand.u32 4294901760, %v21453_v47  ;;  %v21477_v32 = vpack.c.bf16 %v11711_v43, %v11707_v27  ;;  %v11828_v27 = vsub.f32 %v21461_v1, %v11827_v60 }
 0x298   : > { %11013 = vmatmul.mubr.f32.gmra.mrb[50].mxu1 %v19658_v7 }
 0x299   : > { %v6842_v46 = vpop.f32.mrb[30].mxu0  ;;  %11018 = vmatprep.mubr.f32.mxu1 %v19590_v2  ;;  %v11815_v36 = vand.u32 4294901760, %v21459_v51  ;;  %v11227_v29 = vsub.f32 %v21453_v47, %v11226_v23 }
 0x29a   : > { %v18459_v20 = vadd.f32 %v6842_v46, %v20427_v45  ;;  %v6844_v8 = vpop.f32.mrb[31].mxu0  ;;  %10431 = vmatmul.mubr.f32.gmra.mrb[52].mxu0 %v19660_v9 }
 0x29b   : > { %v7431_v0 = vpop.f32.mrb[30].mxu1  ;;  %v18460_v17 = vadd.f32 %v6844_v8, %v20427_v45  ;;  %10505 = vmatprep.mubr.f32.mxu0 %v19590_v2  ;;  %v11816_v49 = vsub.f32 %v21459_v51, %v11815_v36  ;;  %v11240_v8 = vand.u32 4294901760, %v11239_v34  ;;  %v17637_v34 = vld [vmem:[%s19681_s5 + $0x2d0] sm:$0x1] }
 0x29c   : > { %17527 = vst [vmem:[%s20461_s17 + $0x1a0] sm:$0xff] %v18459_v20  ;;  %v18465_v19 = vadd.f32 %v7431_v0, %v20427_v45  ;;  %v7433_v61 = vpop.f32.mrb[31].mxu1  ;;  %11020 = vmatmul.mubr.f32.gmra.mrb[52].mxu1 %v19660_v9  ;;  %v11228_v20 = vand.u32 4294901760, %v11227_v29 }
 0x29d   : > { %17528 = vst [vmem:[%s20461_s17 + $0x1a8] sm:$0xff] %v18460_v17  ;;  %v18466_v58 = vadd.f32 %v7433_v61, %v20427_v45  ;;  %v6849_v53 = vpop.f32.mrb[32].mxu0  ;;  %11094 = vmatprep.mubr.f32.mxu1 %v19590_v2  ;;  %v11817_v17 = vand.u32 4294901760, %v11816_v49 }
 0x29e   : > { %17529 = vst [vmem:[%s20461_s17 + $0x1b0] sm:$0xff] %v18465_v19  ;;  %v18461_v59 = vadd.f32 %v6849_v53, %v20453_v52  ;;  %v6851_v33 = vpop.f32.mrb[33].mxu0  ;;  %10507 = vmatmul.mubr.f32.vlgmr.msra.gmra.mrb[48].mxu0 %v19656_v6  ;;  %v11829_v19 = vand.u32 4294901760, %v11828_v27  ;;  %v18165_v61 = vpack.c.bf16 %v11240_v8, %v11228_v20  ;;  %v18191_v53 = vpack.c.bf16 %v21412_v57, %v21410_v28  ;;  %v17638_v57 = vld [vmem:[%s19681_s5 + $0x2d8] sm:$0x1]  ;;  %v17629_v27 = vld [vmem:[%s19681_s5 + $0x290] sm:$0xff] }
 0x29f   : > { %17530 = vst.msk [vmem:[%s20461_s17 + $0x1b8] sm:$0xff] %vm2612_vm2, %v18466_v58  ;;  %v7438_v18 = vpop.f32.mrb[32].mxu1  ;;  %v18462_v41 = vadd.f32 %v6851_v33, %v20453_v52  ;;  %10512 = vmatprep.mubr.f32.mxu0 %v19590_v2  ;;  %18162 = vmatpush1.bf16.msra.mxu0 %v21467_v40  ;;  %v18193_v33 = vpack.c.bf16 %v21461_v1, %v21459_v51 }
 0x2a0   : > { %17535 = vst [vmem:[%s20461_s17 + $0x1e0] sm:$0xff] %v18461_v59  ;;  %v18467_v63 = vadd.f32 %v7438_v18, %v20453_v52  ;;  %v7440_v21 = vpop.f32.mrb[33].mxu1  ;;  %11096 = vmatmul.mubr.f32.vlgmr.msra.gmra.mrb[48].mxu1 %v19656_v6  ;;  %18164 = vmatprep.subr.bf16.mxu0 %v18163_v25  ;;  %v18167_v25 = vpack.c.bf16 %v21406_v38, %v21404_v31  ;;  %v17636_v38 = vld [vmem:[%s19681_s5 + $0x2c8] sm:$0x1] }
 0x2a1   : > { %17536 = vst [vmem:[%s20461_s17 + $0x1e8] sm:$0xff] %v18462_v41  ;;  %v18468_v22 = vadd.f32 %v7440_v21, %v20453_v52  ;;  %v6856_v54 = vpop.f32.mrb[34].mxu0  ;;  %11101 = vmatprep.mubr.f32.mxu1 %v19590_v2  ;;  %18186 = vmatpush1.bf16.msra.mxu1 %v21477_v32  ;;  %v18189_v58 = vpack.c.bf16 %v11829_v19, %v11817_v17  ;;  %v17627_v21 = vld [vmem:[%s19681_s5 + $0x280] sm:$0xff] }
 0x2a2   : > { %17537 = vst [vmem:[%s20461_s17 + $0x1f0] sm:$0xff] %v18467_v63  ;;  %v18463_v43 = vadd.f32 %v6856_v54, %v20478_v16  ;;  %v6858_v4 = vpop.f32.mrb[35].mxu0  ;;  %10514 = vmatmul.mubr.f32.gmra.mrb[50].mxu0 %v19658_v7  ;;  %18188 = vmatprep.subr.bf16.mxu1 %v18187_v55  ;;  %v18169_v59 = vpack.c.bf16 %v21455_v42, %v21453_v47 }
 0x2a3   : > { %17538 = vst.msk [vmem:[%s20461_s17 + $0x1f8] sm:$0xff] %vm2612_vm2, %v18468_v22  ;;  %v7445_v56 = vpop.f32.mrb[34].mxu1  ;;  %v18464_v46 = vadd.f32 %v6858_v4, %v20478_v16  ;;  %10519 = vmatprep.mubr.f32.mxu0 %v19590_v2  ;;  %v18175_v55 = vpack.c.bf16 %v11232_v30, %v11220_v44  ;;  %v18199_v18 = vpack.c.bf16 %v11821_v35, %v11809_v39  ;;  %v17628_v44 = vld [vmem:[%s19681_s5 + $0x288] sm:$0xff]  ;;  %v12340_v30 = vsel %vm224_vm1, %v17636_v38, 0  ;;  %v17630_v39 = vld [vmem:[%s19681_s5 + $0x298] sm:$0xff] }
 0x2a4   : > { %17543 = vst [vmem:[%s20461_s17 + $0x220] sm:$0xf] %v18463_v43  ;;  %v18469_v62 = vadd.f32 %v7445_v56, %v20478_v16  ;;  %v7447_v37 = vpop.f32.mrb[35].mxu1  ;;  %11103 = vmatmul.mubr.f32.gmra.mrb[50].mxu1 %v19658_v7  ;;  %v18177_v31 = vpack.c.bf16 %v11238_v24, %v11226_v23  ;;  %v18201_v28 = vpack.c.bf16 %v11827_v60, %v11815_v36  ;;  %v12346_v35 = vsel %vm224_vm1, %v17638_v57, 0  ;;  %v17635_v36 = vld [vmem:[%s19681_s5 + $0x2c0] sm:$0x1] }
 0x2a5   : > { %17544 = vst [vmem:[%s20461_s17 + $0x228] sm:$0xf] %v18464_v46  ;;  %v18470_v0 = vadd.f32 %v7447_v37, %v20478_v16  ;;  %11108 = vmatprep.mubr.f32.mxu1 %v19590_v2  ;;  %v12360_v47 = vand.u32 4294901760, %v17628_v44  ;;  %v12364_v42 = vand.u32 4294901760, %v12340_v30  ;;  %v12949_v1 = vand.u32 4294901760, %v17630_v39 }
 0x2a6   : > { %17545 = vst [vmem:[%s20461_s17 + $0x230] sm:$0xf] %v18469_v62  ;;  %10521 = vmatmul.mubr.f32.gmra.mrb[52].mxu0 %v19660_v9  ;;  %v12953_v23 = vand.u32 4294901760, %v12346_v35  ;;  %v12337_v22 = vsel %vm224_vm1, %v17635_v36, 0  ;;  %v12343_v43 = vsel %vm224_vm1, %v17637_v34, 0 }
 0x2a7   : > { %17546 = vst.msk [vmem:[%s20461_s17 + $0x238] sm:$0xf] %vm2629_vm3, %v18470_v0  ;;  %11184 = vmatprep.mubr.f32.mxu0 %v19590_v2  ;;  %v21607_v51 = vsub.f32 %v17628_v44, %v12360_v47  ;;  %v21613_v24 = vsub.f32 %v17630_v39, %v12949_v1  ;;  %v21620_v60 = vpack.c.bf16 %v12364_v42, %v12360_v47  ;;  %v12366_v46 = vand.u32 4294901760, %v12337_v22 }
 0x2a8   : > { %11110 = vmatmul.mubr.f32.gmra.mrb[52].mxu1 %v19660_v9  ;;  %v21627_v63 = vpack.c.bf16 %v12953_v23, %v12949_v1  ;;  %v12955_v0 = vand.u32 4294901760, %v12343_v43 }
 0x2a9   : > { %11773 = vmatprep.mubr.f32.mxu1 %v19590_v2  ;;  %v12464_v41 = vand.u32 4294901760, %v21607_v51  ;;  %v13053_v54 = vand.u32 4294901760, %v21613_v24  ;;  %v21658_v37 = vsub.f32 %v12337_v22, %v12366_v46 }
 0x2aa   : > { %11190 = vmatmul.mubr.f32.vlgmr.msra.gmra.mrb[54].mxu0 %v19723_v48 }
 0x2ab   : > { %11195 = vmatprep.mubr.f32.mxu0 %v19590_v2  ;;  %18166 = vmatpush1.bf16.msra.mxu0 %v18165_v61  ;;  %v12465_v4 = vsub.f32 %v21607_v51, %v12464_v41  ;;  %v13054_v20 = vsub.f32 %v21613_v24, %v13053_v54  ;;  %v12482_v57 = vand.u32 4294901760, %v21658_v37 }
 0x2ac   : > { %11779 = vmatmul.mubr.f32.vlgmr.msra.gmra.mrb[54].mxu1 %v19723_v48  ;;  %18168 = vmatprep.subr.bf16.mxu0 %v18167_v25 }
 0x2ad   : > { %11784 = vmatprep.mubr.f32.mxu1 %v19590_v2  ;;  %18190 = vmatpush1.bf16.msra.mxu1 %v18189_v58  ;;  %v12466_v17 = vand.u32 4294901760, %v12465_v4  ;;  %v21664_v58 = vsub.f32 %v12343_v43, %v12955_v0  ;;  %v12483_v4 = vsub.f32 %v21658_v37, %v12482_v57 }
 0x2ae   : > { %11201 = vmatmul.mubr.f32.gmra.mrb[56].mxu0 %v19728_v50  ;;  %18192 = vmatprep.subr.bf16.mxu1 %v18191_v53 }
 0x2af   : > { %11206 = vmatprep.mubr.f32.mxu0 %v19590_v2 }
 0x2b0   : > { %11790 = vmatmul.mubr.f32.gmra.mrb[56].mxu1 %v19728_v50 }
 0x2b1   : > { %11795 = vmatprep.mubr.f32.mxu1 %v19590_v2 }
 0x2b2   : > { %11212 = vmatmul.mubr.f32.gmra.mrb[58].mxu0 %v19773_v26 }
 0x2b3   : > { %11302 = vmatprep.mubr.f32.mxu0 %v19590_v2 }
 0x2b4   : > { %11801 = vmatmul.mubr.f32.gmra.mrb[58].mxu1 %v19773_v26 }
 0x2b5   : > { %11891 = vmatprep.mubr.f32.mxu1 %v19590_v2 }
 0x2b6   : > { %11304 = vmatmul.mubr.f32.vlgmr.msra.gmra.mrb[54].mxu0 %v19656_v6 }
 0x2b7   : > { %11309 = vmatprep.mubr.f32.mxu0 %v19590_v2  ;;  %18170 = vmatpush1.bf16.msra.mxu0 %v18169_v59 }
 0x2b8   : > { %11893 = vmatmul.mubr.f32.vlgmr.msra.gmra.mrb[54].mxu1 %v19656_v6  ;;  %18172 = vmatprep.subr.bf16.mxu0 %v21417_v5 }
 0x2b9   : > { %11898 = vmatprep.mubr.f32.mxu1 %v19590_v2  ;;  %18194 = vmatpush1.bf16.msra.mxu1 %v18193_v33  ;;  %v13055_v33 = vand.u32 4294901760, %v13054_v20 }
 0x2ba   : > { %11311 = vmatmul.mubr.f32.gmra.mrb[56].mxu0 %v19658_v7  ;;  %18196 = vmatprep.subr.bf16.mxu1 %v21424_v3 }
 0x2bb   : > { %11316 = vmatprep.mubr.f32.mxu0 %v19590_v2 }
 0x2bc   : > { %11900 = vmatmul.mubr.f32.gmra.mrb[56].mxu1 %v19658_v7 }
 0x2bd   : > { %11905 = vmatprep.mubr.f32.mxu1 %v19590_v2 }
 0x2be   : > { %11318 = vmatmul.mubr.f32.gmra.mrb[58].mxu0 %v19660_v9 }
 0x2bf   : > { %11396 = vmatprep.mubr.f32.mxu0 %v19590_v2 }
 0x2c0   : > { %11907 = vmatmul.mubr.f32.gmra.mrb[58].mxu1 %v19660_v9 }
 0x2c1   : > { %11985 = vmatprep.mubr.f32.mxu1 %v19590_v2 }
 0x2c2   : > { %11399 = vmatmul.mubr.f32.vlgmr.msra.gmra.mrb[54].mxu0 %v19664_v10 }
 0x2c3   : > { %11404 = vmatprep.mubr.f32.mxu0 %v19590_v2  ;;  %18174 = vmatpush1.bf16.msra.mxu0 %v21467_v40 }
 0x2c4   : > { %11988 = vmatmul.mubr.f32.vlgmr.msra.gmra.mrb[54].mxu1 %v19664_v10  ;;  %18176 = vmatprep.subr.bf16.mxu0 %v18175_v55 }
 0x2c5   : > { %11993 = vmatprep.mubr.f32.mxu1 %v19590_v2  ;;  %18198 = vmatpush1.bf16.msra.mxu1 %v21477_v32 }
 0x2c6   : > { %11407 = vmatmul.mubr.f32.gmra.mrb[56].mxu0 %v19667_v11  ;;  %18200 = vmatprep.subr.bf16.mxu1 %v18199_v18 }
 0x2c7   : > { %11412 = vmatprep.mubr.f32.mxu0 %v19590_v2 }
 0x2c8   : > { %11996 = vmatmul.mubr.f32.gmra.mrb[56].mxu1 %v19667_v11 }
 0x2c9   : > { %12001 = vmatprep.mubr.f32.mxu1 %v19590_v2 }
 0x2ca   : > { %11415 = vmatmul.mubr.f32.gmra.mrb[58].mxu0 %v19670_v12 }
 0x2cb   : > { %11489 = vmatprep.mubr.f32.mxu0 %v19590_v2 }
 0x2cc   : > { %12004 = vmatmul.mubr.f32.gmra.mrb[58].mxu1 %v19670_v12 }
 0x2cd   : > { %12078 = vmatprep.mubr.f32.mxu1 %v19590_v2 }
 0x2ce   : > { %11493 = vmatmul.mubr.f32.vlgmr.msra.gmra.mrb[54].mxu0 %v19673_v13 }
 0x2cf   : > { %11498 = vmatprep.mubr.f32.mxu0 %v19590_v2  ;;  %18178 = vmatpush1.bf16.msra.mxu0 %v18177_v31 }
 0x2d0   : > { %12082 = vmatmul.mubr.f32.vlgmr.msra.gmra.mrb[54].mxu1 %v19673_v13  ;;  %18180 = vmatprep.subr.bf16.mxu0 %v21417_v5  ;;  %v21609_v5 = vsub.f32 %v12340_v30, %v12364_v42 }
 0x2d1   : > { %12087 = vmatprep.mubr.f32.mxu1 %v19590_v2  ;;  %18202 = vmatpush1.bf16.msra.mxu1 %v18201_v28 }
 0x2d2   : > { %11502 = vmatmul.mubr.f32.gmra.mrb[56].mxu0 %v19676_v14  ;;  %18204 = vmatprep.subr.bf16.mxu1 %v21424_v3  ;;  %v21615_v3 = vsub.f32 %v12346_v35, %v12953_v23  ;;  %v12476_v29 = vand.u32 4294901760, %v21609_v5  ;;  %v13071_v23 = vand.u32 4294901760, %v21664_v58 }
 0x2d3   : > { %11507 = vmatprep.mubr.f32.mxu0 %v19590_v2 }
 0x2d4   : > { %12091 = vmatmul.mubr.f32.gmra.mrb[56].mxu1 %v19676_v14  ;;  %v13065_v49 = vand.u32 4294901760, %v21615_v3  ;;  %v12477_v56 = vsub.f32 %v21609_v5, %v12476_v29 }
 0x2d5   : > { %12096 = vmatprep.mubr.f32.mxu1 %v19590_v2 }
 0x2d6   : > { %11511 = vmatmul.mubr.f32.gmra.mrb[58].mxu0 %v19684_v15  ;;  %v13066_v8 = vsub.f32 %v21615_v3, %v13065_v49  ;;  %v12478_v19 = vand.u32 4294901760, %v12477_v56 }
 0x2d7   : > { %11593 = vmatprep.mubr.f32.mxu0 %v19590_v2 }
 0x2d8   : > { %12100 = vmatmul.mubr.f32.gmra.mrb[58].mxu1 %v19684_v15  ;;  %v13067_v55 = vand.u32 4294901760, %v13066_v8  ;;  %v18211_v39 = vpack.c.bf16 %v12478_v19, %v12466_v17 }
 0x2d9   : > { %12182 = vmatprep.mubr.f32.mxu1 %v19590_v2 }
 0x2da   : > { %11595 = vmatmul.mubr.f32.vlgmr.msra.gmra.mrb[54].mxu0 %v19656_v6 }
 0x2db   : > { %11600 = vmatprep.mubr.f32.mxu0 %v19590_v2  ;;  %18182 = vmatpush1.bf16.msra.mxu0 %v21467_v40  ;;  %v12362_v40 = vand.u32 4294901760, %v17627_v21 }
 0x2dc   : > { %12184 = vmatmul.mubr.f32.vlgmr.msra.gmra.mrb[54].mxu1 %v19656_v6  ;;  %18208 = vmatprep.subr.bf16.mxu0 %v21620_v60 }
 0x2dd   : > { %12189 = vmatprep.mubr.f32.mxu1 %v19590_v2  ;;  %18206 = vmatpush1.bf16.msra.mxu1 %v21477_v32  ;;  %v21656_v62 = vsub.f32 %v17627_v21, %v12362_v40  ;;  %v12951_v32 = vand.u32 4294901760, %v17629_v27  ;;  %v21670_v38 = vpack.c.bf16 %v12366_v46, %v12362_v40  ;;  %v18235_v21 = vpack.c.bf16 %v13067_v55, %v13055_v33 }
 0x2de   : > { %11602 = vmatmul.mubr.f32.gmra.mrb[56].mxu0 %v19658_v7  ;;  %18232 = vmatprep.subr.bf16.mxu1 %v21627_v63 }
 0x2df   : > { %11607 = vmatprep.mubr.f32.mxu0 %v19590_v2  ;;  %v21662_v25 = vsub.f32 %v17629_v27, %v12951_v32  ;;  %v12470_v28 = vand.u32 4294901760, %v21656_v62  ;;  %v21680_v42 = vpack.c.bf16 %v12955_v0, %v12951_v32  ;;  %v13072_v32 = vsub.f32 %v21664_v58, %v13071_v23 }
 0x2e0   : > { %12191 = vmatmul.mubr.f32.gmra.mrb[56].mxu1 %v19658_v7 }
 0x2e1   : > { %v8086_v61 = vpop.f32.mrb[36].mxu0  ;;  %12196 = vmatprep.mubr.f32.mxu1 %v19590_v2  ;;  %v13059_v1 = vand.u32 4294901760, %v21662_v25  ;;  %v12471_v43 = vsub.f32 %v21656_v62, %v12470_v28 }
 0x2e2   : > { %v18471_v53 = vadd.f32 %v8086_v61, %v20427_v45  ;;  %v8088_v59 = vpop.f32.mrb[37].mxu0  ;;  %11609 = vmatmul.mubr.f32.gmra.mrb[58].mxu0 %v19660_v9 }
 0x2e3   : > { %v8675_v18 = vpop.f32.mrb[36].mxu1  ;;  %v18472_v31 = vadd.f32 %v8088_v59, %v20427_v45  ;;  %11683 = vmatprep.mubr.f32.mxu0 %v19590_v2  ;;  %v13060_v8 = vsub.f32 %v21662_v25, %v13059_v1  ;;  %v12484_v59 = vand.u32 4294901760, %v12483_v4  ;;  %v17641_v4 = vld [vmem:[%s19681_s5 + $0x2f0] sm:$0x1] }
 0x2e4   : > { %17563 = vst [vmem:[%s20461_s17 + $0x240] sm:$0xff] %v18471_v53  ;;  %v18477_v44 = vadd.f32 %v8675_v18, %v20427_v45  ;;  %v8677_v30 = vpop.f32.mrb[37].mxu1  ;;  %12198 = vmatmul.mubr.f32.gmra.mrb[58].mxu1 %v19660_v9  ;;  %v12472_v53 = vand.u32 4294901760, %v12471_v43 }
 0x2e5   : > { %17564 = vst [vmem:[%s20461_s17 + $0x248] sm:$0xff] %v18472_v31  ;;  %v18478_v35 = vadd.f32 %v8677_v30, %v20427_v45  ;;  %v8093_v47 = vpop.f32.mrb[38].mxu0  ;;  %12272 = vmatprep.mubr.f32.mxu1 %v19590_v2  ;;  %v13061_v31 = vand.u32 4294901760, %v13060_v8 }
 0x2e6   : > { %17565 = vst [vmem:[%s20461_s17 + $0x250] sm:$0xff] %v18477_v44  ;;  %v18473_v36 = vadd.f32 %v8093_v47, %v20453_v52  ;;  %v8095_v34 = vpop.f32.mrb[39].mxu0  ;;  %11685 = vmatmul.mubr.f32.vlgmr.msra.gmra.mrb[54].mxu0 %v19656_v6  ;;  %v13073_v44 = vand.u32 4294901760, %v13072_v32  ;;  %v18213_v30 = vpack.c.bf16 %v12484_v59, %v12472_v53  ;;  %v18239_v47 = vpack.c.bf16 %v21615_v3, %v21613_v24  ;;  %v17642_v3 = vld [vmem:[%s19681_s5 + $0x2f8] sm:$0x1]  ;;  %v17633_v32 = vld [vmem:[%s19681_s5 + $0x2b0] sm:$0xff] }
 0x2e7   : > { %17566 = vst [vmem:[%s20461_s17 + $0x258] sm:$0xff] %v18478_v35  ;;  %v8682_v22 = vpop.f32.mrb[38].mxu1  ;;  %v18474_v27 = vadd.f32 %v8095_v34, %v20453_v52  ;;  %11690 = vmatprep.mubr.f32.mxu0 %v19590_v2  ;;  %18210 = vmatpush1.bf16.msra.mxu0 %v21670_v38  ;;  %v18241_v34 = vpack.c.bf16 %v21664_v58, %v21662_v25 }
 0x2e8   : > { %17571 = vst [vmem:[%s20461_s17 + $0x280] sm:$0xff] %v18473_v36  ;;  %v18479_v56 = vadd.f32 %v8682_v22, %v20453_v52  ;;  %v8684_v40 = vpop.f32.mrb[39].mxu1  ;;  %12274 = vmatmul.mubr.f32.vlgmr.msra.gmra.mrb[54].mxu1 %v19656_v6  ;;  %18212 = vmatprep.subr.bf16.mxu0 %v18211_v39  ;;  %v18215_v39 = vpack.c.bf16 %v21609_v5, %v21607_v51  ;;  %v17640_v5 = vld [vmem:[%s19681_s5 + $0x2e8] sm:$0x1] }
 0x2e9   : > { %17572 = vst [vmem:[%s20461_s17 + $0x288] sm:$0xff] %v18474_v27  ;;  %v18480_v46 = vadd.f32 %v8684_v40, %v20453_v52  ;;  %v8100_v20 = vpop.f32.mrb[40].mxu0  ;;  %12279 = vmatprep.mubr.f32.mxu1 %v19590_v2  ;;  %18234 = vmatpush1.bf16.msra.mxu1 %v21680_v42  ;;  %v18237_v35 = vpack.c.bf16 %v13073_v44, %v13061_v31  ;;  %v17631_v40 = vld [vmem:[%s19681_s5 + $0x2a0] sm:$0xff] }
 0x2ea   : > { %17573 = vst [vmem:[%s20461_s17 + $0x290] sm:$0xff] %v18479_v56  ;;  %v18475_v0 = vadd.f32 %v8100_v20, %v20478_v16  ;;  %v8102_v17 = vpop.f32.mrb[41].mxu0  ;;  %11692 = vmatmul.mubr.f32.gmra.mrb[56].mxu0 %v19658_v7  ;;  %18236 = vmatprep.subr.bf16.mxu1 %v18235_v21  ;;  %v18217_v36 = vpack.c.bf16 %v21658_v37, %v21656_v62 }
 0x2eb   : > { %17574 = vst [vmem:[%s20461_s17 + $0x298] sm:$0xff] %v18480_v46  ;;  %v8689_v19 = vpop.f32.mrb[40].mxu1  ;;  %v18476_v61 = vadd.f32 %v8102_v17, %v20478_v16  ;;  %11697 = vmatprep.mubr.f32.mxu0 %v19590_v2  ;;  %v18223_v21 = vpack.c.bf16 %v12476_v29, %v12464_v41  ;;  %v18247_v22 = vpack.c.bf16 %v13065_v49, %v13053_v54  ;;  %v17632_v41 = vld [vmem:[%s19681_s5 + $0x2a8] sm:$0xff]  ;;  %v12352_v29 = vsel %vm224_vm1, %v17640_v5, 0  ;;  %v17634_v54 = vld [vmem:[%s19681_s5 + $0x2b8] sm:$0xff] }
 0x2ec   : > { %17579 = vst [vmem:[%s20461_s17 + $0x2c0] sm:$0xf] %v18475_v0  ;;  %v18481_v33 = vadd.f32 %v8689_v19, %v20478_v16  ;;  %v8691_v55 = vpop.f32.mrb[41].mxu1  ;;  %12281 = vmatmul.mubr.f32.gmra.mrb[56].mxu1 %v19658_v7  ;;  %v18225_v51 = vpack.c.bf16 %v12482_v57, %v12470_v28  ;;  %v18249_v24 = vpack.c.bf16 %v13071_v23, %v13059_v1  ;;  %v12358_v49 = vsel %vm224_vm1, %v17642_v3, 0  ;;  %v17639_v1 = vld [vmem:[%s19681_s5 + $0x2e0] sm:$0x1] }
 0x2ed   : > { %17580 = vst [vmem:[%s20461_s17 + $0x2c8] sm:$0xf] %v18476_v61  ;;  %v18482_v18 = vadd.f32 %v8691_v55, %v20478_v16  ;;  %12286 = vmatprep.mubr.f32.mxu1 %v19590_v2  ;;  %v13538_v62 = vand.u32 4294901760, %v17632_v41  ;;  %v13542_v37 = vand.u32 4294901760, %v12352_v29  ;;  %v14127_v58 = vand.u32 4294901760, %v17634_v54 }
 0x2ee   : > { %17581 = vst [vmem:[%s20461_s17 + $0x2d0] sm:$0xf] %v18481_v33  ;;  %11699 = vmatmul.mubr.f32.gmra.mrb[58].mxu0 %v19660_v9  ;;  %v14131_v28 = vand.u32 4294901760, %v12358_v49  ;;  %v12349_v46 = vsel %vm224_vm1, %v17639_v1, 0  ;;  %v12355_v0 = vsel %vm224_vm1, %v17641_v4, 0 }
 0x2ef   : > { %17582 = vst [vmem:[%s20461_s17 + $0x2d8] sm:$0xf] %v18482_v18  ;;  %12428 = vmatprep.mubr.f32.mxu0 %v19590_v2  ;;  %v21807_v25 = vsub.f32 %v17632_v41, %v13538_v62  ;;  %v21813_v57 = vsub.f32 %v17634_v54, %v14127_v58  ;;  %v21820_v23 = vpack.c.bf16 %v13542_v37, %v13538_v62  ;;  %v13544_v61 = vand.u32 4294901760, %v12349_v46 }
 0x2f0   : > { %12288 = vmatmul.mubr.f32.gmra.mrb[58].mxu1 %v19660_v9  ;;  %v21827_v56 = vpack.c.bf16 %v14131_v28, %v14127_v58  ;;  %v14133_v18 = vand.u32 4294901760, %v12355_v0 }
 0x2f1   : > { %13017 = vmatprep.mubr.f32.mxu1 %v19590_v2  ;;  %v13642_v27 = vand.u32 4294901760, %v21807_v25  ;;  %v14231_v20 = vand.u32 4294901760, %v21813_v57  ;;  %v21858_v55 = vsub.f32 %v12349_v46, %v13544_v61 }
 0x2f2   : > { %12434 = vmatmul.mubr.f32.vlgmr.msra.gmra.mrb[60].mxu0 %v19723_v48 }
 0x2f3   : > { %12439 = vmatprep.mubr.f32.mxu0 %v19590_v2  ;;  %18214 = vmatpush1.bf16.msra.mxu0 %v18213_v30  ;;  %v13643_v17 = vsub.f32 %v21807_v25, %v13642_v27  ;;  %v14232_v53 = vsub.f32 %v21813_v57, %v14231_v20  ;;  %v13660_v3 = vand.u32 4294901760, %v21858_v55 }
 0x2f4   : > { %13023 = vmatmul.mubr.f32.vlgmr.msra.gmra.mrb[60].mxu1 %v19723_v48  ;;  %18216 = vmatprep.subr.bf16.mxu0 %v18215_v39 }
 0x2f5   : > { %13028 = vmatprep.mubr.f32.mxu1 %v19590_v2  ;;  %18238 = vmatpush1.bf16.msra.mxu1 %v18237_v35  ;;  %v13644_v31 = vand.u32 4294901760, %v13643_v17  ;;  %v21864_v35 = vsub.f32 %v12355_v0, %v14133_v18  ;;  %v13661_v17 = vsub.f32 %v21858_v55, %v13660_v3 }
 0x2f6   : > { %12445 = vmatmul.mubr.f32.gmra.mrb[62].mxu0 %v19728_v50  ;;  %18240 = vmatprep.subr.bf16.mxu1 %v18239_v47 }
 0x2f7   : > { %12450 = vmatprep.mubr.f32.mxu0 %v19590_v2 }
 0x2f8   : > { %13034 = vmatmul.mubr.f32.gmra.mrb[62].mxu1 %v19728_v50 }
 0x2f9   : > { %13039 = vmatprep.mubr.f32.mxu1 %v19590_v2 }
 0x2fa   : > { %12456 = vmatmul.mubr.f32.gmra.mrb[64].mxu0 %v19773_v26 }
 0x2fb   : > { %12546 = vmatprep.mubr.f32.mxu0 %v19590_v2 }
 0x2fc   : > { %13045 = vmatmul.mubr.f32.gmra.mrb[64].mxu1 %v19773_v26 }
 0x2fd   : > { %13135 = vmatprep.mubr.f32.mxu1 %v19590_v2 }
 0x2fe   : > { %12548 = vmatmul.mubr.f32.vlgmr.msra.gmra.mrb[60].mxu0 %v19656_v6 }
 0x2ff   : > { %12553 = vmatprep.mubr.f32.mxu0 %v19590_v2  ;;  %18218 = vmatpush1.bf16.msra.mxu0 %v18217_v36 }
 0x300   : > { %13137 = vmatmul.mubr.f32.vlgmr.msra.gmra.mrb[60].mxu1 %v19656_v6  ;;  %18220 = vmatprep.subr.bf16.mxu0 %v21620_v60 }
 0x301   : > { %13142 = vmatprep.mubr.f32.mxu1 %v19590_v2  ;;  %18242 = vmatpush1.bf16.msra.mxu1 %v18241_v34  ;;  %v14233_v34 = vand.u32 4294901760, %v14232_v53 }
 0x302   : > { %12555 = vmatmul.mubr.f32.gmra.mrb[62].mxu0 %v19658_v7  ;;  %18244 = vmatprep.subr.bf16.mxu1 %v21627_v63 }
 0x303   : > { %12560 = vmatprep.mubr.f32.mxu0 %v19590_v2 }
 0x304   : > { %13144 = vmatmul.mubr.f32.gmra.mrb[62].mxu1 %v19658_v7 }
 0x305   : > { %13149 = vmatprep.mubr.f32.mxu1 %v19590_v2 }
 0x306   : > { %12562 = vmatmul.mubr.f32.gmra.mrb[64].mxu0 %v19660_v9 }
 0x307   : > { %12640 = vmatprep.mubr.f32.mxu0 %v19590_v2 }
 0x308   : > { %13151 = vmatmul.mubr.f32.gmra.mrb[64].mxu1 %v19660_v9 }
 0x309   : > { %13229 = vmatprep.mubr.f32.mxu1 %v19590_v2 }
 0x30a   : > { %12643 = vmatmul.mubr.f32.vlgmr.msra.gmra.mrb[60].mxu0 %v19664_v10 }
 0x30b   : > { %12648 = vmatprep.mubr.f32.mxu0 %v19590_v2  ;;  %18222 = vmatpush1.bf16.msra.mxu0 %v21670_v38 }
 0x30c   : > { %13232 = vmatmul.mubr.f32.vlgmr.msra.gmra.mrb[60].mxu1 %v19664_v10  ;;  %18224 = vmatprep.subr.bf16.mxu0 %v18223_v21 }
 0x30d   : > { %13237 = vmatprep.mubr.f32.mxu1 %v19590_v2  ;;  %18246 = vmatpush1.bf16.msra.mxu1 %v21680_v42 }
 0x30e   : > { %12651 = vmatmul.mubr.f32.gmra.mrb[62].mxu0 %v19667_v11  ;;  %18248 = vmatprep.subr.bf16.mxu1 %v18247_v22 }
 0x30f   : > { %12656 = vmatprep.mubr.f32.mxu0 %v19590_v2 }
 0x310   : > { %13240 = vmatmul.mubr.f32.gmra.mrb[62].mxu1 %v19667_v11 }
 0x311   : > { %13245 = vmatprep.mubr.f32.mxu1 %v19590_v2 }
 0x312   : > { %12659 = vmatmul.mubr.f32.gmra.mrb[64].mxu0 %v19670_v12 }
 0x313   : > { %12733 = vmatprep.mubr.f32.mxu0 %v19590_v2 }
 0x314   : > { %13248 = vmatmul.mubr.f32.gmra.mrb[64].mxu1 %v19670_v12 }
 0x315   : > { %13322 = vmatprep.mubr.f32.mxu1 %v19590_v2 }
 0x316   : > { %12737 = vmatmul.mubr.f32.vlgmr.msra.gmra.mrb[60].mxu0 %v19673_v13 }
 0x317   : > { %12742 = vmatprep.mubr.f32.mxu0 %v19590_v2  ;;  %18226 = vmatpush1.bf16.msra.mxu0 %v18225_v51 }
 0x318   : > { %13326 = vmatmul.mubr.f32.vlgmr.msra.gmra.mrb[60].mxu1 %v19673_v13  ;;  %18228 = vmatprep.subr.bf16.mxu0 %v21620_v60  ;;  %v21809_v60 = vsub.f32 %v12352_v29, %v13542_v37 }
 0x319   : > { %13331 = vmatprep.mubr.f32.mxu1 %v19590_v2  ;;  %18250 = vmatpush1.bf16.msra.mxu1 %v18249_v24 }
 0x31a   : > { %12746 = vmatmul.mubr.f32.gmra.mrb[62].mxu0 %v19676_v14  ;;  %18252 = vmatprep.subr.bf16.mxu1 %v21627_v63  ;;  %v21815_v63 = vsub.f32 %v12358_v49, %v14131_v28  ;;  %v13654_v43 = vand.u32 4294901760, %v21809_v60  ;;  %v14249_v28 = vand.u32 4294901760, %v21864_v35 }
 0x31b   : > { %12751 = vmatprep.mubr.f32.mxu0 %v19590_v2 }
 0x31c   : > { %13335 = vmatmul.mubr.f32.gmra.mrb[62].mxu1 %v19676_v14  ;;  %v14243_v8 = vand.u32 4294901760, %v21815_v63  ;;  %v13655_v19 = vsub.f32 %v21809_v60, %v13654_v43 }
 0x31d   : > { %13340 = vmatprep.mubr.f32.mxu1 %v19590_v2 }
 0x31e   : > { %12755 = vmatmul.mubr.f32.gmra.mrb[64].mxu0 %v19684_v15  ;;  %v14244_v59 = vsub.f32 %v21815_v63, %v14243_v8  ;;  %v13656_v44 = vand.u32 4294901760, %v13655_v19 }
 0x31f   : > { %12837 = vmatprep.mubr.f32.mxu0 %v19590_v2 }
 0x320   : > { %13344 = vmatmul.mubr.f32.gmra.mrb[64].mxu1 %v19684_v15  ;;  %v14245_v21 = vand.u32 4294901760, %v14244_v59  ;;  %v18259_v54 = vpack.c.bf16 %v13656_v44, %v13644_v31 }
 0x321   : > { %13426 = vmatprep.mubr.f32.mxu1 %v19590_v2 }
 0x322   : > { %12839 = vmatmul.mubr.f32.vlgmr.msra.gmra.mrb[60].mxu0 %v19656_v6 }
 0x323   : > { %12844 = vmatprep.mubr.f32.mxu0 %v19590_v2  ;;  %18230 = vmatpush1.bf16.msra.mxu0 %v21670_v38  ;;  %v13540_v38 = vand.u32 4294901760, %v17631_v40 }
 0x324   : > { %13428 = vmatmul.mubr.f32.vlgmr.msra.gmra.mrb[60].mxu1 %v19656_v6  ;;  %18256 = vmatprep.subr.bf16.mxu0 %v21820_v23 }
 0x325   : > { %13433 = vmatprep.mubr.f32.mxu1 %v19590_v2  ;;  %18254 = vmatpush1.bf16.msra.mxu1 %v21680_v42  ;;  %v21856_v33 = vsub.f32 %v17631_v40, %v13540_v38  ;;  %v14129_v42 = vand.u32 4294901760, %v17633_v32  ;;  %v21870_v5 = vpack.c.bf16 %v13544_v61, %v13540_v38  ;;  %v18283_v40 = vpack.c.bf16 %v14245_v21, %v14233_v34 }
 0x326   : > { %12846 = vmatmul.mubr.f32.gmra.mrb[62].mxu0 %v19658_v7  ;;  %18280 = vmatprep.subr.bf16.mxu1 %v21827_v56 }
 0x327   : > { %12851 = vmatprep.mubr.f32.mxu0 %v19590_v2  ;;  %v21862_v39 = vsub.f32 %v17633_v32, %v14129_v42  ;;  %v13648_v24 = vand.u32 4294901760, %v21856_v33  ;;  %v21880_v37 = vpack.c.bf16 %v14133_v18, %v14129_v42  ;;  %v14250_v42 = vsub.f32 %v21864_v35, %v14249_v28 }
 0x328   : > { %13435 = vmatmul.mubr.f32.gmra.mrb[62].mxu1 %v19658_v7 }
 0x329   : > { %v9264_v30 = vpop.f32.mrb[42].mxu0  ;;  %13440 = vmatprep.mubr.f32.mxu1 %v19590_v2  ;;  %v14237_v58 = vand.u32 4294901760, %v21862_v39  ;;  %v13649_v0 = vsub.f32 %v21856_v33, %v13648_v24 }
 0x32a   : > { %v18483_v47 = vadd.f32 %v9264_v30, %v20427_v45  ;;  %v9266_v36 = vpop.f32.mrb[43].mxu0  ;;  %12853 = vmatmul.mubr.f32.gmra.mrb[64].mxu0 %v19660_v9 }
 0x32b   : > { %v9853_v22 = vpop.f32.mrb[42].mxu1  ;;  %v18484_v51 = vadd.f32 %v9266_v36, %v20427_v45  ;;  %12927 = vmatprep.mubr.f32.mxu0 %v19590_v2  ;;  %v14238_v59 = vsub.f32 %v21862_v39, %v14237_v58  ;;  %v13662_v36 = vand.u32 4294901760, %v13661_v17  ;;  %v17677_v17 = vld [vmem:[%s19681_s5 + $0x350] sm:$0x1] }
 0x32c   : > { %17567 = vst [vmem:[%s20461_s17 + $0x260] sm:$0xff] %v18483_v47  ;;  %v18489_v41 = vadd.f32 %v9853_v22, %v20427_v45  ;;  %v9855_v29 = vpop.f32.mrb[43].mxu1  ;;  %13442 = vmatmul.mubr.f32.gmra.mrb[64].mxu1 %v19660_v9  ;;  %v13650_v47 = vand.u32 4294901760, %v13649_v0 }
 0x32d   : > { %17568 = vst [vmem:[%s20461_s17 + $0x268] sm:$0xff] %v18484_v51  ;;  %v18490_v49 = vadd.f32 %v9855_v29, %v20427_v45  ;;  %v9271_v62 = vpop.f32.mrb[44].mxu0  ;;  %13516 = vmatprep.mubr.f32.mxu1 %v19590_v2  ;;  %v14239_v51 = vand.u32 4294901760, %v14238_v59 }
 0x32e   : > { %17569 = vst [vmem:[%s20461_s17 + $0x270] sm:$0xff] %v18489_v41  ;;  %v18485_v1 = vadd.f32 %v9271_v62, %v20453_v52  ;;  %v9273_v4 = vpop.f32.mrb[45].mxu0  ;;  %12929 = vmatmul.mubr.f32.vlgmr.msra.gmra.mrb[60].mxu0 %v19656_v6  ;;  %v14251_v41 = vand.u32 4294901760, %v14250_v42  ;;  %v18261_v29 = vpack.c.bf16 %v13662_v36, %v13650_v47  ;;  %v18287_v62 = vpack.c.bf16 %v21815_v63, %v21813_v57  ;;  %v17678_v63 = vld [vmem:[%s19681_s5 + $0x358] sm:$0x1]  ;;  %v17669_v42 = vld [vmem:[%s19681_s5 + $0x310] sm:$0xff] }
 0x32f   : > { %17570 = vst.msk [vmem:[%s20461_s17 + $0x278] sm:$0xff] %vm2612_vm2, %v18490_v49  ;;  %v9860_v46 = vpop.f32.mrb[44].mxu1  ;;  %v18486_v32 = vadd.f32 %v9273_v4, %v20453_v52  ;;  %12934 = vmatprep.mubr.f32.mxu0 %v19590_v2  ;;  %18258 = vmatpush1.bf16.msra.mxu0 %v21870_v5  ;;  %v18289_v4 = vpack.c.bf16 %v21864_v35, %v21862_v39 }
 0x330   : > { %17575 = vst [vmem:[%s20461_s17 + $0x2a0] sm:$0xff] %v18485_v1  ;;  %v18491_v19 = vadd.f32 %v9860_v46, %v20453_v52  ;;  %v9862_v38 = vpop.f32.mrb[45].mxu1  ;;  %13518 = vmatmul.mubr.f32.vlgmr.msra.gmra.mrb[60].mxu1 %v19656_v6  ;;  %18260 = vmatprep.subr.bf16.mxu0 %v18259_v54  ;;  %v18263_v54 = vpack.c.bf16 %v21809_v60, %v21807_v25  ;;  %v17676_v60 = vld [vmem:[%s19681_s5 + $0x348] sm:$0x1] }
 0x331   : > { %17576 = vst [vmem:[%s20461_s17 + $0x2a8] sm:$0xff] %v18486_v32  ;;  %v18492_v61 = vadd.f32 %v9862_v38, %v20453_v52  ;;  %v9278_v53 = vpop.f32.mrb[46].mxu0  ;;  %13523 = vmatprep.mubr.f32.mxu1 %v19590_v2  ;;  %18282 = vmatpush1.bf16.msra.mxu1 %v21880_v37  ;;  %v18285_v49 = vpack.c.bf16 %v14251_v41, %v14239_v51  ;;  %v17667_v38 = vld [vmem:[%s19681_s5 + $0x300] sm:$0xff] }
 0x332   : > { %17577 = vst [vmem:[%s20461_s17 + $0x2b0] sm:$0xff] %v18491_v19  ;;  %v18487_v18 = vadd.f32 %v9278_v53, %v20478_v16  ;;  %v9280_v31 = vpop.f32.mrb[47].mxu0  ;;  %12936 = vmatmul.mubr.f32.gmra.mrb[62].mxu0 %v19658_v7  ;;  %18284 = vmatprep.subr.bf16.mxu1 %v18283_v40  ;;  %v18265_v1 = vpack.c.bf16 %v21858_v55, %v21856_v33 }
 0x333   : > { %17578 = vst.msk [vmem:[%s20461_s17 + $0x2b8] sm:$0xff] %vm2612_vm2, %v18492_v61  ;;  %v9867_v44 = vpop.f32.mrb[46].mxu1  ;;  %v18488_v30 = vadd.f32 %v9280_v31, %v20478_v16  ;;  %12941 = vmatprep.mubr.f32.mxu0 %v19590_v2  ;;  %v18271_v40 = vpack.c.bf16 %v13654_v43, %v13642_v27  ;;  %v18295_v46 = vpack.c.bf16 %v14243_v8, %v14231_v20  ;;  %v17668_v27 = vld [vmem:[%s19681_s5 + $0x308] sm:$0xff]  ;;  %v14762_v43 = vsel %vm224_vm1, %v17676_v60, 0  ;;  %v17670_v20 = vld [vmem:[%s19681_s5 + $0x318] sm:$0xff] }
 0x334   : > { %17583 = vst [vmem:[%s20461_s17 + $0x2e0] sm:$0xf] %v18487_v18  ;;  %v18493_v34 = vadd.f32 %v9867_v44, %v20478_v16  ;;  %v9869_v21 = vpop.f32.mrb[47].mxu1  ;;  %13525 = vmatmul.mubr.f32.gmra.mrb[62].mxu1 %v19658_v7  ;;  %v18273_v25 = vpack.c.bf16 %v13660_v3, %v13648_v24  ;;  %v18297_v57 = vpack.c.bf16 %v14249_v28, %v14237_v58  ;;  %v14768_v8 = vsel %vm224_vm1, %v17678_v63, 0  ;;  %v17675_v58 = vld [vmem:[%s19681_s5 + $0x340] sm:$0x1] }
 0x335   : > { %17584 = vst [vmem:[%s20461_s17 + $0x2e8] sm:$0xf] %v18488_v30  ;;  %v18494_v22 = vadd.f32 %v9869_v21, %v20478_v16  ;;  %13530 = vmatprep.mubr.f32.mxu1 %v19590_v2  ;;  %v14782_v33 = vand.u32 4294901760, %v17668_v27  ;;  %v14786_v55 = vand.u32 4294901760, %v14762_v43  ;;  %v15371_v35 = vand.u32 4294901760, %v17670_v20 }
 0x336   : > { %17585 = vst [vmem:[%s20461_s17 + $0x2f0] sm:$0xf] %v18493_v34  ;;  %12943 = vmatmul.mubr.f32.gmra.mrb[64].mxu0 %v19660_v9  ;;  %v15375_v24 = vand.u32 4294901760, %v14768_v8  ;;  %v14759_v61 = vsel %vm224_vm1, %v17675_v58, 0  ;;  %v14765_v18 = vsel %vm224_vm1, %v17677_v17, 0 }
 0x337   : > { %17586 = vst.msk [vmem:[%s20461_s17 + $0x2f8] sm:$0xf] %vm2629_vm3, %v18494_v22  ;;  %13606 = vmatprep.mubr.f32.mxu0 %v19590_v2  ;;  %v22010_v39 = vsub.f32 %v17668_v27, %v14782_v33  ;;  %v22016_v3 = vsub.f32 %v17670_v20, %v15371_v35  ;;  %v22023_v28 = vpack.c.bf16 %v14786_v55, %v14782_v33  ;;  %v14788_v30 = vand.u32 4294901760, %v14759_v61 }
 0x338   : > { %13532 = vmatmul.mubr.f32.gmra.mrb[64].mxu1 %v19660_v9  ;;  %v22030_v19 = vpack.c.bf16 %v15375_v24, %v15371_v35  ;;  %v15377_v22 = vand.u32 4294901760, %v14765_v18 }
 0x339   : > { %14195 = vmatprep.mubr.f32.mxu1 %v19590_v2  ;;  %v14886_v32 = vand.u32 4294901760, %v22010_v39  ;;  %v15475_v53 = vand.u32 4294901760, %v22016_v3  ;;  %v22061_v21 = vsub.f32 %v14759_v61, %v14788_v30 }
 0x33a   : > { %13612 = vmatmul.mubr.f32.vlgmr.msra.gmra.mrb[66].mxu0 %v19723_v48 }
 0x33b   : > { %13617 = vmatprep.mubr.f32.mxu0 %v19590_v2  ;;  %18262 = vmatpush1.bf16.msra.mxu0 %v18261_v29  ;;  %v14887_v31 = vsub.f32 %v22010_v39, %v14886_v32  ;;  %v15476_v47 = vsub.f32 %v22016_v3, %v15475_v53  ;;  %v14904_v63 = vand.u32 4294901760, %v22061_v21 }
 0x33c   : > { %14201 = vmatmul.mubr.f32.vlgmr.msra.gmra.mrb[66].mxu1 %v19723_v48  ;;  %18264 = vmatprep.subr.bf16.mxu0 %v18263_v54 }
 0x33d   : > { %14206 = vmatprep.mubr.f32.mxu1 %v19590_v2  ;;  %18286 = vmatpush1.bf16.msra.mxu1 %v18285_v49  ;;  %v14888_v51 = vand.u32 4294901760, %v14887_v31  ;;  %v22067_v49 = vsub.f32 %v14765_v18, %v15377_v22  ;;  %v14905_v31 = vsub.f32 %v22061_v21, %v14904_v63 }
 0x33e   : > { %13623 = vmatmul.mubr.f32.gmra.mrb[68].mxu0 %v19728_v50  ;;  %18288 = vmatprep.subr.bf16.mxu1 %v18287_v62 }
 0x33f   : > { %13628 = vmatprep.mubr.f32.mxu0 %v19590_v2 }
 0x340   : > { %14212 = vmatmul.mubr.f32.gmra.mrb[68].mxu1 %v19728_v50 }
 0x341   : > { %14217 = vmatprep.mubr.f32.mxu1 %v19590_v2 }
 0x342   : > { %13634 = vmatmul.mubr.f32.gmra.mrb[70].mxu0 %v19773_v26 }
 0x343   : > { %13724 = vmatprep.mubr.f32.mxu0 %v19590_v2 }
 0x344   : > { %14223 = vmatmul.mubr.f32.gmra.mrb[70].mxu1 %v19773_v26 }
 0x345   : > { %14313 = vmatprep.mubr.f32.mxu1 %v19590_v2 }
 0x346   : > { %13726 = vmatmul.mubr.f32.vlgmr.msra.gmra.mrb[66].mxu0 %v19656_v6 }
 0x347   : > { %13731 = vmatprep.mubr.f32.mxu0 %v19590_v2  ;;  %18266 = vmatpush1.bf16.msra.mxu0 %v18265_v1 }
 0x348   : > { %14315 = vmatmul.mubr.f32.vlgmr.msra.gmra.mrb[66].mxu1 %v19656_v6  ;;  %18268 = vmatprep.subr.bf16.mxu0 %v21820_v23 }
 0x349   : > { %14320 = vmatprep.mubr.f32.mxu1 %v19590_v2  ;;  %18290 = vmatpush1.bf16.msra.mxu1 %v18289_v4  ;;  %v15477_v4 = vand.u32 4294901760, %v15476_v47 }
 0x34a   : > { %13733 = vmatmul.mubr.f32.gmra.mrb[68].mxu0 %v19658_v7  ;;  %18292 = vmatprep.subr.bf16.mxu1 %v21827_v56 }
 0x34b   : > { %13738 = vmatprep.mubr.f32.mxu0 %v19590_v2 }
 0x34c   : > { %14322 = vmatmul.mubr.f32.gmra.mrb[68].mxu1 %v19658_v7 }
 0x34d   : > { %14327 = vmatprep.mubr.f32.mxu1 %v19590_v2 }
 0x34e   : > { %13740 = vmatmul.mubr.f32.gmra.mrb[70].mxu0 %v19660_v9 }
 0x34f   : > { %13818 = vmatprep.mubr.f32.mxu0 %v19590_v2 }
 0x350   : > { %14329 = vmatmul.mubr.f32.gmra.mrb[70].mxu1 %v19660_v9 }
 0x351   : > { %14407 = vmatprep.mubr.f32.mxu1 %v19590_v2 }
 0x352   : > { %13821 = vmatmul.mubr.f32.vlgmr.msra.gmra.mrb[66].mxu0 %v19664_v10 }
 0x353   : > { %13826 = vmatprep.mubr.f32.mxu0 %v19590_v2  ;;  %18270 = vmatpush1.bf16.msra.mxu0 %v21870_v5 }
 0x354   : > { %14410 = vmatmul.mubr.f32.vlgmr.msra.gmra.mrb[66].mxu1 %v19664_v10  ;;  %18272 = vmatprep.subr.bf16.mxu0 %v18271_v40 }
 0x355   : > { %14415 = vmatprep.mubr.f32.mxu1 %v19590_v2  ;;  %18294 = vmatpush1.bf16.msra.mxu1 %v21880_v37 }
 0x356   : > { %13829 = vmatmul.mubr.f32.gmra.mrb[68].mxu0 %v19667_v11  ;;  %18296 = vmatprep.subr.bf16.mxu1 %v18295_v46 }
 0x357   : > { %13834 = vmatprep.mubr.f32.mxu0 %v19590_v2 }
 0x358   : > { %14418 = vmatmul.mubr.f32.gmra.mrb[68].mxu1 %v19667_v11 }
 0x359   : > { %14423 = vmatprep.mubr.f32.mxu1 %v19590_v2 }
 0x35a   : > { %13837 = vmatmul.mubr.f32.gmra.mrb[70].mxu0 %v19670_v12 }
 0x35b   : > { %13911 = vmatprep.mubr.f32.mxu0 %v19590_v2 }
 0x35c   : > { %14426 = vmatmul.mubr.f32.gmra.mrb[70].mxu1 %v19670_v12 }
 0x35d   : > { %14500 = vmatprep.mubr.f32.mxu1 %v19590_v2 }
 0x35e   : > { %13915 = vmatmul.mubr.f32.vlgmr.msra.gmra.mrb[66].mxu0 %v19673_v13 }
 0x35f   : > { %13920 = vmatprep.mubr.f32.mxu0 %v19590_v2  ;;  %18274 = vmatpush1.bf16.msra.mxu0 %v18273_v25 }
 0x360   : > { %14504 = vmatmul.mubr.f32.vlgmr.msra.gmra.mrb[66].mxu1 %v19673_v13  ;;  %18276 = vmatprep.subr.bf16.mxu0 %v21820_v23  ;;  %v22012_v23 = vsub.f32 %v14762_v43, %v14786_v55 }
 0x361   : > { %14509 = vmatprep.mubr.f32.mxu1 %v19590_v2  ;;  %18298 = vmatpush1.bf16.msra.mxu1 %v18297_v57 }
 0x362   : > { %13924 = vmatmul.mubr.f32.gmra.mrb[68].mxu0 %v19676_v14  ;;  %18300 = vmatprep.subr.bf16.mxu1 %v21827_v56  ;;  %v22018_v56 = vsub.f32 %v14768_v8, %v15375_v24  ;;  %v14898_v0 = vand.u32 4294901760, %v22012_v23  ;;  %v15493_v24 = vand.u32 4294901760, %v22067_v49 }
 0x363   : > { %13929 = vmatprep.mubr.f32.mxu0 %v19590_v2 }
 0x364   : > { %14513 = vmatmul.mubr.f32.gmra.mrb[68].mxu1 %v19676_v14  ;;  %v15487_v59 = vand.u32 4294901760, %v22018_v56  ;;  %v14899_v44 = vsub.f32 %v22012_v23, %v14898_v0 }
 0x365   : > { %14518 = vmatprep.mubr.f32.mxu1 %v19590_v2 }
 0x366   : > { %13933 = vmatmul.mubr.f32.gmra.mrb[70].mxu0 %v19684_v15  ;;  %v15488_v36 = vsub.f32 %v22018_v56, %v15487_v59  ;;  %v14900_v41 = vand.u32 4294901760, %v14899_v44 }
 0x367   : > { %14015 = vmatprep.mubr.f32.mxu0 %v19590_v2 }
 0x368   : > { %14522 = vmatmul.mubr.f32.gmra.mrb[70].mxu1 %v19684_v15  ;;  %v15489_v40 = vand.u32 4294901760, %v15488_v36  ;;  %v18307_v20 = vpack.c.bf16 %v14900_v41, %v14888_v51 }
 0x369   : > { %14604 = vmatprep.mubr.f32.mxu1 %v19590_v2 }
 0x36a   : > { %14017 = vmatmul.mubr.f32.vlgmr.msra.gmra.mrb[66].mxu0 %v19656_v6 }
 0x36b   : > { %14022 = vmatprep.mubr.f32.mxu0 %v19590_v2  ;;  %18278 = vmatpush1.bf16.msra.mxu0 %v21870_v5  ;;  %v14784_v5 = vand.u32 4294901760, %v17667_v38 }
 0x36c   : > { %14606 = vmatmul.mubr.f32.vlgmr.msra.gmra.mrb[66].mxu1 %v19656_v6  ;;  %18304 = vmatprep.subr.bf16.mxu0 %v22023_v28 }
 0x36d   : > { %14611 = vmatprep.mubr.f32.mxu1 %v19590_v2  ;;  %18302 = vmatpush1.bf16.msra.mxu1 %v21880_v37  ;;  %v22059_v34 = vsub.f32 %v17667_v38, %v14784_v5  ;;  %v15373_v37 = vand.u32 4294901760, %v17669_v42  ;;  %v22073_v60 = vpack.c.bf16 %v14788_v30, %v14784_v5  ;;  %v18331_v38 = vpack.c.bf16 %v15489_v40, %v15477_v4 }
 0x36e   : > { %14024 = vmatmul.mubr.f32.gmra.mrb[68].mxu0 %v19658_v7  ;;  %18328 = vmatprep.subr.bf16.mxu1 %v22030_v19 }
 0x36f   : > { %14029 = vmatprep.mubr.f32.mxu0 %v19590_v2  ;;  %v22065_v54 = vsub.f32 %v17669_v42, %v15373_v37  ;;  %v14892_v57 = vand.u32 4294901760, %v22059_v34  ;;  %v22083_v55 = vpack.c.bf16 %v15377_v22, %v15373_v37  ;;  %v15494_v37 = vsub.f32 %v22067_v49, %v15493_v24 }
 0x370   : > { %14613 = vmatmul.mubr.f32.gmra.mrb[68].mxu1 %v19658_v7 }
 0x371   : > { %v10508_v29 = vpop.f32.mrb[48].mxu0  ;;  %14618 = vmatprep.mubr.f32.mxu1 %v19590_v2  ;;  %v15481_v35 = vand.u32 4294901760, %v22065_v54  ;;  %v14893_v18 = vsub.f32 %v22059_v34, %v14892_v57 }
 0x372   : > { %v18495_v62 = vadd.f32 %v10508_v29, %v20427_v45  ;;  %v10510_v1 = vpop.f32.mrb[49].mxu0  ;;  %14031 = vmatmul.mubr.f32.gmra.mrb[70].mxu0 %v19660_v9 }
 0x373   : > { %v11097_v46 = vpop.f32.mrb[48].mxu1  ;;  %v18496_v25 = vadd.f32 %v10510_v1, %v20427_v45  ;;  %14105 = vmatprep.mubr.f32.mxu0 %v19590_v2  ;;  %v15482_v36 = vsub.f32 %v22065_v54, %v15481_v35  ;;  %v14906_v1 = vand.u32 4294901760, %v14905_v31  ;;  %v17681_v31 = vld [vmem:[%s19681_s5 + $0x370] sm:$0x1] }
 0x374   : > { %17603 = vst [vmem:[%s20461_s17 + $0x300] sm:$0xff] %v18495_v62  ;;  %v18501_v27 = vadd.f32 %v11097_v46, %v20427_v45  ;;  %v11099_v43 = vpop.f32.mrb[49].mxu1  ;;  %14620 = vmatmul.mubr.f32.gmra.mrb[70].mxu1 %v19660_v9  ;;  %v14894_v62 = vand.u32 4294901760, %v14893_v18 }
 0x375   : > { %17604 = vst [vmem:[%s20461_s17 + $0x308] sm:$0xff] %v18496_v25  ;;  %v18502_v8 = vadd.f32 %v11099_v43, %v20427_v45  ;;  %v10515_v33 = vpop.f32.mrb[50].mxu0  ;;  %14694 = vmatprep.mubr.f32.mxu1 %v19590_v2  ;;  %v15483_v25 = vand.u32 4294901760, %v15482_v36 }
 0x376   : > { %17605 = vst [vmem:[%s20461_s17 + $0x310] sm:$0xff] %v18501_v27  ;;  %v18497_v58 = vadd.f32 %v10515_v33, %v20453_v52  ;;  %v10517_v17 = vpop.f32.mrb[51].mxu0  ;;  %14107 = vmatmul.mubr.f32.vlgmr.msra.gmra.mrb[66].mxu0 %v19656_v6  ;;  %v15495_v27 = vand.u32 4294901760, %v15494_v37  ;;  %v18309_v43 = vpack.c.bf16 %v14906_v1, %v14894_v62  ;;  %v18335_v33 = vpack.c.bf16 %v22018_v56, %v22016_v3  ;;  %v17682_v56 = vld [vmem:[%s19681_s5 + $0x378] sm:$0x1]  ;;  %v17673_v37 = vld [vmem:[%s19681_s5 + $0x330] sm:$0xff] }
 0x377   : > { %17606 = vst [vmem:[%s20461_s17 + $0x318] sm:$0xff] %v18502_v8  ;;  %v11104_v61 = vpop.f32.mrb[50].mxu1  ;;  %v18498_v42 = vadd.f32 %v10517_v17, %v20453_v52  ;;  %14112 = vmatprep.mubr.f32.mxu0 %v19590_v2  ;;  %18306 = vmatpush1.bf16.msra.mxu0 %v22073_v60  ;;  %v18337_v17 = vpack.c.bf16 %v22067_v49, %v22065_v54 }
 0x378   : > { %17611 = vst [vmem:[%s20461_s17 + $0x340] sm:$0xff] %v18497_v58  ;;  %v18503_v44 = vadd.f32 %v11104_v61, %v20453_v52  ;;  %v11106_v5 = vpop.f32.mrb[51].mxu1  ;;  %14696 = vmatmul.mubr.f32.vlgmr.msra.gmra.mrb[66].mxu1 %v19656_v6  ;;  %18308 = vmatprep.subr.bf16.mxu0 %v18307_v20  ;;  %v18311_v20 = vpack.c.bf16 %v22012_v23, %v22010_v39  ;;  %v17680_v23 = vld [vmem:[%s19681_s5 + $0x368] sm:$0x1] }
 0x379   : > { %17612 = vst [vmem:[%s20461_s17 + $0x348] sm:$0xff] %v18498_v42  ;;  %v18504_v30 = vadd.f32 %v11106_v5, %v20453_v52  ;;  %v10522_v47 = vpop.f32.mrb[52].mxu0  ;;  %14701 = vmatprep.mubr.f32.mxu1 %v19590_v2  ;;  %18330 = vmatpush1.bf16.msra.mxu1 %v22083_v55  ;;  %v18333_v8 = vpack.c.bf16 %v15495_v27, %v15483_v25  ;;  %v17671_v5 = vld [vmem:[%s19681_s5 + $0x320] sm:$0xff] }
 0x37a   : > { %17613 = vst [vmem:[%s20461_s17 + $0x350] sm:$0xff] %v18503_v44  ;;  %v18499_v22 = vadd.f32 %v10522_v47, %v20478_v16  ;;  %v10524_v51 = vpop.f32.mrb[53].mxu0  ;;  %14114 = vmatmul.mubr.f32.gmra.mrb[68].mxu0 %v19658_v7  ;;  %18332 = vmatprep.subr.bf16.mxu1 %v18331_v38  ;;  %v18313_v58 = vpack.c.bf16 %v22061_v21, %v22059_v34 }
 0x37b   : > { %17614 = vst [vmem:[%s20461_s17 + $0x358] sm:$0xff] %v18504_v30  ;;  %v11111_v41 = vpop.f32.mrb[52].mxu1  ;;  %v18500_v29 = vadd.f32 %v10524_v51, %v20478_v16  ;;  %14119 = vmatprep.mubr.f32.mxu0 %v19590_v2  ;;  %v18319_v38 = vpack.c.bf16 %v14898_v0, %v14886_v32  ;;  %v18343_v61 = vpack.c.bf16 %v15487_v59, %v15475_v53  ;;  %v17672_v32 = vld [vmem:[%s19681_s5 + $0x328] sm:$0xff]  ;;  %v14774_v0 = vsel %vm224_vm1, %v17680_v23, 0  ;;  %v17674_v53 = vld [vmem:[%s19681_s5 + $0x338] sm:$0xff] }
 0x37c   : > { %17619 = vst [vmem:[%s20461_s17 + $0x380] sm:$0xf] %v18499_v22  ;;  %v18505_v4 = vadd.f32 %v11111_v41, %v20478_v16  ;;  %v11113_v40 = vpop.f32.mrb[53].mxu1  ;;  %14703 = vmatmul.mubr.f32.gmra.mrb[68].mxu1 %v19658_v7  ;;  %v18321_v39 = vpack.c.bf16 %v14904_v63, %v14892_v57  ;;  %v18345_v3 = vpack.c.bf16 %v15493_v24, %v15481_v35  ;;  %v14780_v59 = vsel %vm224_vm1, %v17682_v56, 0  ;;  %v17679_v35 = vld [vmem:[%s19681_s5 + $0x360] sm:$0x1] }
 0x37d   : > { %17620 = vst [vmem:[%s20461_s17 + $0x388] sm:$0xf] %v18500_v29  ;;  %v18506_v46 = vadd.f32 %v11113_v40, %v20478_v16  ;;  %14708 = vmatprep.mubr.f32.mxu1 %v19590_v2  ;;  %v15960_v34 = vand.u32 4294901760, %v17672_v32  ;;  %v15964_v21 = vand.u32 4294901760, %v14774_v0  ;;  %v16549_v49 = vand.u32 4294901760, %v17674_v53 }
 0x37e   : > { %17621 = vst [vmem:[%s20461_s17 + $0x390] sm:$0xf] %v18505_v4  ;;  %14121 = vmatmul.mubr.f32.gmra.mrb[70].mxu0 %v19660_v9  ;;  %v16553_v57 = vand.u32 4294901760, %v14780_v59  ;;  %v14771_v30 = vsel %vm224_vm1, %v17679_v35, 0  ;;  %v14777_v22 = vsel %vm224_vm1, %v17681_v31, 0 }
 0x37f   : > { %17622 = vst [vmem:[%s20461_s17 + $0x398] sm:$0xf] %v18506_v46  ;;  %14850 = vmatprep.mubr.f32.mxu0 %v19590_v2  ;;  %v22210_v54 = vsub.f32 %v17672_v32, %v15960_v34  ;;  %v22216_v63 = vsub.f32 %v17674_v53, %v16549_v49  ;;  %v22223_v24 = vpack.c.bf16 %v15964_v21, %v15960_v34  ;;  %v15966_v29 = vand.u32 4294901760, %v14771_v30 }
 0x380   : > { %14710 = vmatmul.mubr.f32.gmra.mrb[70].mxu1 %v19660_v9  ;;  %v22230_v44 = vpack.c.bf16 %v16553_v57, %v16549_v49  ;;  %v16555_v46 = vand.u32 4294901760, %v14777_v22 }
 0x381   : > { %15439 = vmatprep.mubr.f32.mxu1 %v19590_v2  ;;  %v16064_v42 = vand.u32 4294901760, %v22210_v54  ;;  %v16653_v47 = vand.u32 4294901760, %v22216_v63  ;;  %v22261_v40 = vsub.f32 %v14771_v30, %v15966_v29 }
 0x382   : > { %14856 = vmatmul.mubr.f32.vlgmr.msra.gmra.mrb[72].mxu0 %v19723_v48 }
 0x383   : > { %14861 = vmatprep.mubr.f32.mxu0 %v19590_v2  ;;  %18310 = vmatpush1.bf16.msra.mxu0 %v18309_v43  ;;  %v16065_v51 = vsub.f32 %v22210_v54, %v16064_v42  ;;  %v16654_v62 = vsub.f32 %v22216_v63, %v16653_v47  ;;  %v16082_v56 = vand.u32 4294901760, %v22261_v40 }
 0x384   : > { %15445 = vmatmul.mubr.f32.vlgmr.msra.gmra.mrb[72].mxu1 %v19723_v48  ;;  %18312 = vmatprep.subr.bf16.mxu0 %v18311_v20 }
 0x385   : > { %15450 = vmatprep.mubr.f32.mxu1 %v19590_v2  ;;  %18334 = vmatpush1.bf16.msra.mxu1 %v18333_v8  ;;  %v16066_v25 = vand.u32 4294901760, %v16065_v51  ;;  %v22267_v8 = vsub.f32 %v14777_v22, %v16555_v46  ;;  %v16083_v51 = vsub.f32 %v22261_v40, %v16082_v56 }
 0x386   : > { %14867 = vmatmul.mubr.f32.gmra.mrb[74].mxu0 %v19728_v50  ;;  %18336 = vmatprep.subr.bf16.mxu1 %v18335_v33 }
 0x387   : > { %14872 = vmatprep.mubr.f32.mxu0 %v19590_v2 }
 0x388   : > { %15456 = vmatmul.mubr.f32.gmra.mrb[74].mxu1 %v19728_v50 }
 0x389   : > { %15461 = vmatprep.mubr.f32.mxu1 %v19590_v2 }
 0x38a   : > { %14878 = vmatmul.mubr.f32.gmra.mrb[76].mxu0 %v19773_v26 }
 0x38b   : > { %14968 = vmatprep.mubr.f32.mxu0 %v19590_v2 }
 0x38c   : > { %15467 = vmatmul.mubr.f32.gmra.mrb[76].mxu1 %v19773_v26 }
 0x38d   : > { %15557 = vmatprep.mubr.f32.mxu1 %v19590_v2 }
 0x38e   : > { %14970 = vmatmul.mubr.f32.vlgmr.msra.gmra.mrb[72].mxu0 %v19656_v6 }
 0x38f   : > { %14975 = vmatprep.mubr.f32.mxu0 %v19590_v2  ;;  %18314 = vmatpush1.bf16.msra.mxu0 %v18313_v58 }
 0x390   : > { %15559 = vmatmul.mubr.f32.vlgmr.msra.gmra.mrb[72].mxu1 %v19656_v6  ;;  %18316 = vmatprep.subr.bf16.mxu0 %v22023_v28 }
 0x391   : > { %15564 = vmatprep.mubr.f32.mxu1 %v19590_v2  ;;  %18338 = vmatpush1.bf16.msra.mxu1 %v18337_v17  ;;  %v16655_v17 = vand.u32 4294901760, %v16654_v62 }
 0x392   : > { %14977 = vmatmul.mubr.f32.gmra.mrb[74].mxu0 %v19658_v7  ;;  %18340 = vmatprep.subr.bf16.mxu1 %v22030_v19 }
 0x393   : > { %14982 = vmatprep.mubr.f32.mxu0 %v19590_v2 }
 0x394   : > { %15566 = vmatmul.mubr.f32.gmra.mrb[74].mxu1 %v19658_v7 }
 0x395   : > { %15571 = vmatprep.mubr.f32.mxu1 %v19590_v2 }
 0x396   : > { %14984 = vmatmul.mubr.f32.gmra.mrb[76].mxu0 %v19660_v9 }
 0x397   : > { %15062 = vmatprep.mubr.f32.mxu0 %v19590_v2 }
 0x398   : > { %15573 = vmatmul.mubr.f32.gmra.mrb[76].mxu1 %v19660_v9 }
 0x399   : > { %15651 = vmatprep.mubr.f32.mxu1 %v19590_v2 }
 0x39a   : > { %15065 = vmatmul.mubr.f32.vlgmr.msra.gmra.mrb[72].mxu0 %v19664_v10 }
 0x39b   : > { %15070 = vmatprep.mubr.f32.mxu0 %v19590_v2  ;;  %18318 = vmatpush1.bf16.msra.mxu0 %v22073_v60 }
 0x39c   : > { %15654 = vmatmul.mubr.f32.vlgmr.msra.gmra.mrb[72].mxu1 %v19664_v10  ;;  %18320 = vmatprep.subr.bf16.mxu0 %v18319_v38 }
 0x39d   : > { %15659 = vmatprep.mubr.f32.mxu1 %v19590_v2  ;;  %18342 = vmatpush1.bf16.msra.mxu1 %v22083_v55 }
 0x39e   : > { %15073 = vmatmul.mubr.f32.gmra.mrb[74].mxu0 %v19667_v11  ;;  %18344 = vmatprep.subr.bf16.mxu1 %v18343_v61 }
 0x39f   : > { %15078 = vmatprep.mubr.f32.mxu0 %v19590_v2 }
 0x3a0   : > { %15662 = vmatmul.mubr.f32.gmra.mrb[74].mxu1 %v19667_v11 }
 0x3a1   : > { %15667 = vmatprep.mubr.f32.mxu1 %v19590_v2 }
 0x3a2   : > { %15081 = vmatmul.mubr.f32.gmra.mrb[76].mxu0 %v19670_v12 }
 0x3a3   : > { %15155 = vmatprep.mubr.f32.mxu0 %v19590_v2 }
 0x3a4   : > { %15670 = vmatmul.mubr.f32.gmra.mrb[76].mxu1 %v19670_v12 }
 0x3a5   : > { %15744 = vmatprep.mubr.f32.mxu1 %v19590_v2 }
 0x3a6   : > { %15159 = vmatmul.mubr.f32.vlgmr.msra.gmra.mrb[72].mxu0 %v19673_v13 }
 0x3a7   : > { %15164 = vmatprep.mubr.f32.mxu0 %v19590_v2  ;;  %18322 = vmatpush1.bf16.msra.mxu0 %v18321_v39 }
 0x3a8   : > { %15748 = vmatmul.mubr.f32.vlgmr.msra.gmra.mrb[72].mxu1 %v19673_v13  ;;  %18324 = vmatprep.subr.bf16.mxu0 %v22023_v28  ;;  %v22212_v28 = vsub.f32 %v14774_v0, %v15964_v21 }
 0x3a9   : > { %15753 = vmatprep.mubr.f32.mxu1 %v19590_v2  ;;  %18346 = vmatpush1.bf16.msra.mxu1 %v18345_v3 }
 0x3aa   : > { %15168 = vmatmul.mubr.f32.gmra.mrb[74].mxu0 %v19676_v14  ;;  %18348 = vmatprep.subr.bf16.mxu1 %v22030_v19  ;;  %v22218_v19 = vsub.f32 %v14780_v59, %v16553_v57  ;;  %v16076_v18 = vand.u32 4294901760, %v22212_v28  ;;  %v16671_v57 = vand.u32 4294901760, %v22267_v8 }
 0x3ab   : > { %15173 = vmatprep.mubr.f32.mxu0 %v19590_v2 }
 0x3ac   : > { %15757 = vmatmul.mubr.f32.gmra.mrb[74].mxu1 %v19676_v14  ;;  %v16665_v36 = vand.u32 4294901760, %v22218_v19  ;;  %v16077_v41 = vsub.f32 %v22212_v28, %v16076_v18 }
 0x3ad   : > { %15762 = vmatprep.mubr.f32.mxu1 %v19590_v2 }
 0x3ae   : > { %15177 = vmatmul.mubr.f32.gmra.mrb[76].mxu0 %v19684_v15  ;;  %v16666_v1 = vsub.f32 %v22218_v19, %v16665_v36  ;;  %v16078_v27 = vand.u32 4294901760, %v16077_v41 }
 0x3af   : > { %15259 = vmatprep.mubr.f32.mxu0 %v19590_v2 }
 0x3b0   : > { %15766 = vmatmul.mubr.f32.gmra.mrb[76].mxu1 %v19684_v15  ;;  %v16667_v38 = vand.u32 4294901760, %v16666_v1  ;;  %v18355_v53 = vpack.c.bf16 %v16078_v27, %v16066_v25 }
 0x3b1   : > { %15848 = vmatprep.mubr.f32.mxu1 %v19590_v2 }
 0x3b2   : > { %15261 = vmatmul.mubr.f32.vlgmr.msra.gmra.mrb[72].mxu0 %v19656_v6 }
 0x3b3   : > { %15266 = vmatprep.mubr.f32.mxu0 %v19590_v2  ;;  %18326 = vmatpush1.bf16.msra.mxu0 %v22073_v60  ;;  %v15962_v60 = vand.u32 4294901760, %v17671_v5 }
 0x3b4   : > { %15850 = vmatmul.mubr.f32.vlgmr.msra.gmra.mrb[72].mxu1 %v19656_v6  ;;  %18352 = vmatprep.subr.bf16.mxu0 %v22223_v24 }
 0x3b5   : > { %15855 = vmatprep.mubr.f32.mxu1 %v19590_v2  ;;  %18350 = vmatpush1.bf16.msra.mxu1 %v22083_v55  ;;  %v22259_v4 = vsub.f32 %v17671_v5, %v15962_v60  ;;  %v16551_v55 = vand.u32 4294901760, %v17673_v37  ;;  %v22273_v23 = vpack.c.bf16 %v15966_v29, %v15962_v60  ;;  %v18379_v5 = vpack.c.bf16 %v16667_v38, %v16655_v17 }
 0x3b6   : > { %15268 = vmatmul.mubr.f32.gmra.mrb[74].mxu0 %v19658_v7  ;;  %18376 = vmatprep.subr.bf16.mxu1 %v22230_v44 }
 0x3b7   : > { %15273 = vmatprep.mubr.f32.mxu0 %v19590_v2  ;;  %v22265_v20 = vsub.f32 %v17673_v37, %v16551_v55  ;;  %v16070_v3 = vand.u32 4294901760, %v22259_v4  ;;  %v22283_v21 = vpack.c.bf16 %v16555_v46, %v16551_v55  ;;  %v16672_v55 = vsub.f32 %v22267_v8, %v16671_v57 }
 0x3b8   : > { %15857 = vmatmul.mubr.f32.gmra.mrb[74].mxu1 %v19658_v7 }
 0x3b9   : > { %v11686_v43 = vpop.f32.mrb[54].mxu0  ;;  %15862 = vmatprep.mubr.f32.mxu1 %v19590_v2  ;;  %v16659_v49 = vand.u32 4294901760, %v22265_v20  ;;  %v16071_v22 = vsub.f32 %v22259_v4, %v16070_v3 }
 0x3ba   : > { %v18507_v33 = vadd.f32 %v11686_v43, %v20427_v45  ;;  %v11688_v58 = vpop.f32.mrb[55].mxu0  ;;  %15275 = vmatmul.mubr.f32.gmra.mrb[76].mxu0 %v19660_v9 }
 0x3bb   : > { %v12275_v61 = vpop.f32.mrb[54].mxu1  ;;  %v18508_v39 = vadd.f32 %v11688_v58, %v20427_v45  ;;  %15349 = vmatprep.mubr.f32.mxu0 %v19590_v2  ;;  %v16660_v1 = vsub.f32 %v22265_v20, %v16659_v49  ;;  %v16084_v58 = vand.u32 4294901760, %v16083_v51 }
 0x3bc   : > { %17607 = vst [vmem:[%s20461_s17 + $0x320] sm:$0xff] %v18507_v33  ;;  %v18513_v32 = vadd.f32 %v12275_v61, %v20427_v45  ;;  %v12277_v0 = vpop.f32.mrb[55].mxu1  ;;  %15864 = vmatmul.mubr.f32.gmra.mrb[76].mxu1 %v19660_v9  ;;  %v16072_v33 = vand.u32 4294901760, %v16071_v22 }
 0x3bd   : > { %17608 = vst [vmem:[%s20461_s17 + $0x328] sm:$0xff] %v18508_v39  ;;  %v18514_v59 = vadd.f32 %v12277_v0, %v20427_v45  ;;  %v11693_v34 = vpop.f32.mrb[56].mxu0  ;;  %15938 = vmatprep.mubr.f32.mxu1 %v19590_v2  ;;  %v16661_v39 = vand.u32 4294901760, %v16660_v1 }
 0x3be   : > { %17609 = vst [vmem:[%s20461_s17 + $0x330] sm:$0xff] %v18513_v32  ;;  %v18509_v35 = vadd.f32 %v11693_v34, %v20453_v52  ;;  %v11695_v31 = vpop.f32.mrb[57].mxu0  ;;  %15351 = vmatmul.mubr.f32.vlgmr.msra.gmra.mrb[72].mxu0 %v19656_v6  ;;  %v16673_v32 = vand.u32 4294901760, %v16672_v55  ;;  %v18357_v0 = vpack.c.bf16 %v16084_v58, %v16072_v33  ;;  %v18383_v34 = vpack.c.bf16 %v22218_v19, %v22216_v63 }
 0x3bf   : > { %17610 = vst.msk [vmem:[%s20461_s17 + $0x338] sm:$0xff] %vm2612_vm2, %v18514_v59  ;;  %v12282_v30 = vpop.f32.mrb[56].mxu1  ;;  %v18510_v37 = vadd.f32 %v11695_v31, %v20453_v52  ;;  %15356 = vmatprep.mubr.f32.mxu0 %v19590_v2  ;;  %18354 = vmatpush1.bf16.msra.mxu0 %v22273_v23 }
 0x3c0   : > { %17615 = vst [vmem:[%s20461_s17 + $0x360] sm:$0xff] %v18509_v35  ;;  %v18515_v41 = vadd.f32 %v12282_v30, %v20453_v52  ;;  %v12284_v60 = vpop.f32.mrb[57].mxu1  ;;  %15940 = vmatmul.mubr.f32.vlgmr.msra.gmra.mrb[72].mxu1 %v19656_v6  ;;  %18356 = vmatprep.subr.bf16.mxu0 %v18355_v53  ;;  %v18359_v53 = vpack.c.bf16 %v22212_v28, %v22210_v54 }
 0x3c1   : > { %17616 = vst [vmem:[%s20461_s17 + $0x368] sm:$0xff] %v18510_v37  ;;  %v18516_v29 = vadd.f32 %v12284_v60, %v20453_v52  ;;  %v11700_v62 = vpop.f32.mrb[58].mxu0  ;;  %15945 = vmatprep.mubr.f32.mxu1 %v19590_v2  ;;  %18378 = vmatpush1.bf16.msra.mxu1 %v22283_v21  ;;  %v18381_v59 = vpack.c.bf16 %v16673_v32, %v16661_v39 }
 0x3c2   : > { %17617 = vst [vmem:[%s20461_s17 + $0x370] sm:$0xff] %v18515_v41  ;;  %v18511_v46 = vadd.f32 %v11700_v62, %v20478_v16  ;;  %v11702_v25 = vpop.f32.mrb[59].mxu0  ;;  %15358 = vmatmul.mubr.f32.gmra.mrb[74].mxu0 %v19658_v7  ;;  %18380 = vmatprep.subr.bf16.mxu1 %v18379_v5  ;;  %v18385_v35 = vpack.c.bf16 %v22267_v8, %v22265_v20 }
 0x3c3   : > { %17618 = vst.msk [vmem:[%s20461_s17 + $0x378] sm:$0xff] %vm2612_vm2, %v18516_v29  ;;  %v12289_v27 = vpop.f32.mrb[58].mxu1  ;;  %v18512_v43 = vadd.f32 %v11702_v25, %v20478_v16  ;;  %15363 = vmatprep.mubr.f32.mxu0 %v19590_v2 }
 0x3c4   : > { %17623 = vst [vmem:[%s20461_s17 + $0x3a0] sm:$0xf] %v18511_v46  ;;  %v18517_v17 = vadd.f32 %v12289_v27, %v20478_v16  ;;  %v12291_v38 = vpop.f32.mrb[59].mxu1  ;;  %15947 = vmatmul.mubr.f32.gmra.mrb[74].mxu1 %v19658_v7 }
 0x3c5   : > { %17624 = vst [vmem:[%s20461_s17 + $0x3a8] sm:$0xf] %v18512_v43  ;;  %v18518_v61 = vadd.f32 %v12291_v38, %v20478_v16  ;;  %15952 = vmatprep.mubr.f32.mxu1 %v19590_v2 }
 0x3c6   : > { %17625 = vst [vmem:[%s20461_s17 + $0x3b0] sm:$0xf] %v18517_v17  ;;  %15365 = vmatmul.mubr.f32.gmra.mrb[76].mxu0 %v19660_v9 }
 0x3c7   : > { %17626 = vst.msk [vmem:[%s20461_s17 + $0x3b8] sm:$0xf] %vm2629_vm3, %v18518_v61  ;;  %16028 = vmatprep.mubr.f32.mxu0 %v19590_v2 }
 0x3c8   : > { %15954 = vmatmul.mubr.f32.gmra.mrb[76].mxu1 %v19660_v9 }
 0x3c9   : > { %16617 = vmatprep.mubr.f32.mxu1 %v19590_v2 }
 0x3ca   : > { %16034 = vmatmul.mubr.f32.vlgmr.msra.gmra.mrb[78].mxu0 %v19723_v48 }
 0x3cb   : > { %16039 = vmatprep.mubr.f32.mxu0 %v19590_v2  ;;  %18358 = vmatpush1.bf16.msra.mxu0 %v18357_v0 }
 0x3cc   : > { %16623 = vmatmul.mubr.f32.vlgmr.msra.gmra.mrb[78].mxu1 %v19723_v48  ;;  %18360 = vmatprep.subr.bf16.mxu0 %v18359_v53  ;;  %v18361_v48 = vpack.c.bf16 %v22261_v40, %v22259_v4 }
 0x3cd   : > { %16628 = vmatprep.mubr.f32.mxu1 %v19590_v2  ;;  %18382 = vmatpush1.bf16.msra.mxu1 %v18381_v59 }
 0x3ce   : > { %16045 = vmatmul.mubr.f32.gmra.mrb[80].mxu0 %v19728_v50  ;;  %18384 = vmatprep.subr.bf16.mxu1 %v18383_v34 }
 0x3cf   : > { %16050 = vmatprep.mubr.f32.mxu0 %v19590_v2 }
 0x3d0   : > { %16634 = vmatmul.mubr.f32.gmra.mrb[80].mxu1 %v19728_v50  ;;  %v18367_v50 = vpack.c.bf16 %v16076_v18, %v16064_v42 }
 0x3d1   : > { %16639 = vmatprep.mubr.f32.mxu1 %v19590_v2 }
 0x3d2   : > { %16056 = vmatmul.mubr.f32.gmra.mrb[82].mxu0 %v19773_v26 }
 0x3d3   : > { %16146 = vmatprep.mubr.f32.mxu0 %v19590_v2 }
 0x3d4   : > { %16645 = vmatmul.mubr.f32.gmra.mrb[82].mxu1 %v19773_v26  ;;  %v18391_v26 = vpack.c.bf16 %v16665_v36, %v16653_v47 }
 0x3d5   : > { %16735 = vmatprep.mubr.f32.mxu1 %v19590_v2 }
 0x3d6   : > { %16148 = vmatmul.mubr.f32.vlgmr.msra.gmra.mrb[78].mxu0 %v19656_v6 }
 0x3d7   : > { %16153 = vmatprep.mubr.f32.mxu0 %v19590_v2  ;;  %18362 = vmatpush1.bf16.msra.mxu0 %v18361_v48 }
 0x3d8   : > { %16737 = vmatmul.mubr.f32.vlgmr.msra.gmra.mrb[78].mxu1 %v19656_v6  ;;  %18364 = vmatprep.subr.bf16.mxu0 %v22223_v24 }
 0x3d9   : > { %16742 = vmatprep.mubr.f32.mxu1 %v19590_v2  ;;  %18386 = vmatpush1.bf16.msra.mxu1 %v18385_v35 }
 0x3da   : > { %16155 = vmatmul.mubr.f32.gmra.mrb[80].mxu0 %v19658_v7  ;;  %18388 = vmatprep.subr.bf16.mxu1 %v22230_v44 }
 0x3db   : > { %16160 = vmatprep.mubr.f32.mxu0 %v19590_v2 }
 0x3dc   : > { %16744 = vmatmul.mubr.f32.gmra.mrb[80].mxu1 %v19658_v7 }
 0x3dd   : > { %16749 = vmatprep.mubr.f32.mxu1 %v19590_v2 }
 0x3de   : > { %16162 = vmatmul.mubr.f32.gmra.mrb[82].mxu0 %v19660_v9 }
 0x3df   : > { %16240 = vmatprep.mubr.f32.mxu0 %v19590_v2 }
 0x3e0   : > { %16751 = vmatmul.mubr.f32.gmra.mrb[82].mxu1 %v19660_v9 }
 0x3e1   : > { %16829 = vmatprep.mubr.f32.mxu1 %v19590_v2 }
 0x3e2   : > { %16243 = vmatmul.mubr.f32.vlgmr.msra.gmra.mrb[78].mxu0 %v19664_v10 }
 0x3e3   : > { %16248 = vmatprep.mubr.f32.mxu0 %v19590_v2  ;;  %18366 = vmatpush1.bf16.msra.mxu0 %v22273_v23 }
 0x3e4   : > { %16832 = vmatmul.mubr.f32.vlgmr.msra.gmra.mrb[78].mxu1 %v19664_v10  ;;  %18368 = vmatprep.subr.bf16.mxu0 %v18367_v50  ;;  %v18369_v10 = vpack.c.bf16 %v16082_v56, %v16070_v3 }
 0x3e5   : > { %16837 = vmatprep.mubr.f32.mxu1 %v19590_v2  ;;  %18390 = vmatpush1.bf16.msra.mxu1 %v22283_v21 }
 0x3e6   : > { %16251 = vmatmul.mubr.f32.gmra.mrb[80].mxu0 %v19667_v11  ;;  %18392 = vmatprep.subr.bf16.mxu1 %v18391_v26 }
 0x3e7   : > { %16256 = vmatprep.mubr.f32.mxu0 %v19590_v2 }
 0x3e8   : > { %16840 = vmatmul.mubr.f32.gmra.mrb[80].mxu1 %v19667_v11  ;;  %v18393_v11 = vpack.c.bf16 %v16671_v57, %v16659_v49 }
 0x3e9   : > { %16845 = vmatprep.mubr.f32.mxu1 %v19590_v2 }
 0x3ea   : > { %16259 = vmatmul.mubr.f32.gmra.mrb[82].mxu0 %v19670_v12 }
 0x3eb   : > { %16333 = vmatprep.mubr.f32.mxu0 %v19590_v2 }
 0x3ec   : > { %16848 = vmatmul.mubr.f32.gmra.mrb[82].mxu1 %v19670_v12 }
 0x3ed   : > { %16922 = vmatprep.mubr.f32.mxu1 %v19590_v2 }
 0x3ee   : > { %16337 = vmatmul.mubr.f32.vlgmr.msra.gmra.mrb[78].mxu0 %v19673_v13 }
 0x3ef   : > { %16342 = vmatprep.mubr.f32.mxu0 %v19590_v2  ;;  %18370 = vmatpush1.bf16.msra.mxu0 %v18369_v10 }
 0x3f0   : > { %16926 = vmatmul.mubr.f32.vlgmr.msra.gmra.mrb[78].mxu1 %v19673_v13  ;;  %18372 = vmatprep.subr.bf16.mxu0 %v22223_v24 }
 0x3f1   : > { %16931 = vmatprep.mubr.f32.mxu1 %v19590_v2  ;;  %18394 = vmatpush1.bf16.msra.mxu1 %v18393_v11 }
 0x3f2   : > { %16346 = vmatmul.mubr.f32.gmra.mrb[80].mxu0 %v19676_v14  ;;  %18396 = vmatprep.subr.bf16.mxu1 %v22230_v44 }
 0x3f3   : > { %16351 = vmatprep.mubr.f32.mxu0 %v19590_v2 }
 0x3f4   : > { %16935 = vmatmul.mubr.f32.gmra.mrb[80].mxu1 %v19676_v14 }
 0x3f5   : > { %16940 = vmatprep.mubr.f32.mxu1 %v19590_v2 }
 0x3f6   : > { %16355 = vmatmul.mubr.f32.gmra.mrb[82].mxu0 %v19684_v15 }
 0x3f7   : > { %16437 = vmatprep.mubr.f32.mxu0 %v19590_v2 }
 0x3f8   : > { %16944 = vmatmul.mubr.f32.gmra.mrb[82].mxu1 %v19684_v15 }
 0x3f9   : > { %17026 = vmatprep.mubr.f32.mxu1 %v19590_v2 }
 0x3fa   : > { %16439 = vmatmul.mubr.f32.vlgmr.msra.gmra.mrb[78].mxu0 %v19656_v6 }
 0x3fb   : > { %16444 = vmatprep.mubr.f32.mxu0 %v19590_v2  ;;  %18374 = vmatpush1.bf16.msra.mxu0 %v22273_v23 }
 0x3fc   : > { %17028 = vmatmul.mubr.f32.vlgmr.msra.gmra.mrb[78].mxu1 %v19656_v6 }
 0x3fd   : > { %17033 = vmatprep.mubr.f32.mxu1 %v19590_v2  ;;  %18398 = vmatpush1.bf16.msra.mxu1 %v22283_v21 }
 0x3fe   : > { %16446 = vmatmul.mubr.f32.gmra.mrb[80].mxu0 %v19658_v7 }
 0x3ff   : > { %16451 = vmatprep.mubr.f32.mxu0 %v19590_v2 }
 0x400   : > { %17035 = vmatmul.mubr.f32.gmra.mrb[80].mxu1 %v19658_v7 }
 0x401   : > { %v12930_v12 = vpop.f32.mrb[60].mxu0  ;;  %17040 = vmatprep.mubr.f32.mxu1 %v19590_v2 }
 0x402   : > { %v18519_v13 = vadd.f32 %v12930_v12, %v20427_v45  ;;  %v12932_v14 = vpop.f32.mrb[61].mxu0  ;;  %16453 = vmatmul.mubr.f32.gmra.mrb[82].mxu0 %v19660_v9 }
 0x403   : > { %v13519_v15 = vpop.f32.mrb[60].mxu1  ;;  %v18520_v54 = vadd.f32 %v12932_v14, %v20427_v45  ;;  %16527 = vmatprep.mubr.f32.mxu0 %v19590_v2 }
 0x404   : > { %17643 = vst [vmem:[%s20461_s17 + $0x3c0] sm:$0xff] %v18519_v13  ;;  %v18525_v28 = vadd.f32 %v13519_v15, %v20427_v45  ;;  %v13521_v63 = vpop.f32.mrb[61].mxu1  ;;  %17042 = vmatmul.mubr.f32.gmra.mrb[82].mxu1 %v19660_v9 }
 0x405   : > { %17644 = vst [vmem:[%s20461_s17 + $0x3c8] sm:$0xff] %v18520_v54  ;;  %v18526_v19 = vadd.f32 %v13521_v63, %v20427_v45  ;;  %v12937_v24 = vpop.f32.mrb[62].mxu0  ;;  %17116 = vmatprep.mubr.f32.mxu1 %v19590_v2 }
 0x406   : > { %17645 = vst [vmem:[%s20461_s17 + $0x3d0] sm:$0xff] %v18525_v28  ;;  %v18521_v42 = vadd.f32 %v12937_v24, %v20453_v52  ;;  %v12939_v18 = vpop.f32.mrb[63].mxu0  ;;  %16529 = vmatmul.mubr.f32.vlgmr.msra.gmra.mrb[78].mxu0 %v19656_v6 }
 0x407   : > { %17646 = vst [vmem:[%s20461_s17 + $0x3d8] sm:$0xff] %v18526_v19  ;;  %v13526_v44 = vpop.f32.mrb[62].mxu1  ;;  %v18522_v47 = vadd.f32 %v12939_v18, %v20453_v52  ;;  %16534 = vmatprep.mubr.f32.mxu0 %v19590_v2 }
 0x408   : > { %17651 = vst [vmem:[%s20461_s17 + $0x400] sm:$0xff] %v18521_v42  ;;  %v18527_v36 = vadd.f32 %v13526_v44, %v20453_v52  ;;  %v13528_v4 = vpop.f32.mrb[63].mxu1  ;;  %17118 = vmatmul.mubr.f32.vlgmr.msra.gmra.mrb[78].mxu1 %v19656_v6 }
 0x409   : > { %17652 = vst [vmem:[%s20461_s17 + $0x408] sm:$0xff] %v18522_v47  ;;  %v18528_v40 = vadd.f32 %v13528_v4, %v20453_v52  ;;  %v12944_v20 = vpop.f32.mrb[64].mxu0  ;;  %17123 = vmatprep.mubr.f32.mxu1 %v19590_v2 }
 0x40a   : > { %17653 = vst [vmem:[%s20461_s17 + $0x410] sm:$0xff] %v18527_v36  ;;  %v18523_v8 = vadd.f32 %v12944_v20, %v20478_v16  ;;  %v12946_v23 = vpop.f32.mrb[65].mxu0  ;;  %16536 = vmatmul.mubr.f32.gmra.mrb[80].mxu0 %v19658_v7 }
 0x40b   : > { %17654 = vst [vmem:[%s20461_s17 + $0x418] sm:$0xff] %v18528_v40  ;;  %v13533_v3 = vpop.f32.mrb[64].mxu1  ;;  %v18524_v56 = vadd.f32 %v12946_v23, %v20478_v16  ;;  %16541 = vmatprep.mubr.f32.mxu0 %v19590_v2 }
 0x40c   : > { %17659 = vst [vmem:[%s20461_s17 + $0x440] sm:$0xf] %v18523_v8  ;;  %v18529_v6 = vadd.f32 %v13533_v3, %v20478_v16  ;;  %v13535_v21 = vpop.f32.mrb[65].mxu1  ;;  %17125 = vmatmul.mubr.f32.gmra.mrb[80].mxu1 %v19658_v7 }
 0x40d   : > { %17660 = vst [vmem:[%s20461_s17 + $0x448] sm:$0xf] %v18524_v56  ;;  %v18530_v49 = vadd.f32 %v13535_v21, %v20478_v16  ;;  %17130 = vmatprep.mubr.f32.mxu1 %v19590_v2 }
 0x40e   : > { %17661 = vst [vmem:[%s20461_s17 + $0x450] sm:$0xf] %v18529_v6  ;;  %16543 = vmatmul.mubr.f32.gmra.mrb[82].mxu0 %v19660_v9 }
 0x40f   : > { %17662 = vst [vmem:[%s20461_s17 + $0x458] sm:$0xf] %v18530_v49 }
 0x410   : > { %17132 = vmatmul.mubr.f32.gmra.mrb[82].mxu1 %v19660_v9 }
 0x449   : > { %v14108_v57 = vpop.f32.mrb[66].mxu0 }
 0x44a   : > { %v18531_v31 = vadd.f32 %v14108_v57, %v20427_v45  ;;  %v14110_v5 = vpop.f32.mrb[67].mxu0 }
 0x44b   : > { %v14697_v7 = vpop.f32.mrb[66].mxu1  ;;  %v18532_v30 = vadd.f32 %v14110_v5, %v20427_v45 }
 0x44c   : > { %17647 = vst [vmem:[%s20461_s17 + $0x3e0] sm:$0xff] %v18531_v31  ;;  %v18537_v2 = vadd.f32 %v14697_v7, %v20427_v45  ;;  %v14699_v37 = vpop.f32.mrb[67].mxu1 }
 0x44d   : > { %17648 = vst [vmem:[%s20461_s17 + $0x3e8] sm:$0xff] %v18532_v30  ;;  %v18538_v22 = vadd.f32 %v14699_v37, %v20427_v45  ;;  %v14115_v51 = vpop.f32.mrb[68].mxu0 }
 0x44e   : > { %17649 = vst [vmem:[%s20461_s17 + $0x3f0] sm:$0xff] %v18537_v2  ;;  %v18533_v9 = vadd.f32 %v14115_v51, %v20453_v52  ;;  %v14117_v41 = vpop.f32.mrb[69].mxu0 }
 0x44f   : > { %17650 = vst.msk [vmem:[%s20461_s17 + $0x3f8] sm:$0xff] %vm2612_vm2, %v18538_v22  ;;  %v14704_v60 = vpop.f32.mrb[68].mxu1  ;;  %v18534_v29 = vadd.f32 %v14117_v41, %v20453_v52 }
 0x450   : > { %17655 = vst [vmem:[%s20461_s17 + $0x420] sm:$0xff] %v18533_v9  ;;  %v18539_v62 = vadd.f32 %v14704_v60, %v20453_v52  ;;  %v14706_v1 = vpop.f32.mrb[69].mxu1 }
 0x451   : > { %17656 = vst [vmem:[%s20461_s17 + $0x428] sm:$0xff] %v18534_v29  ;;  %v18540_v55 = vadd.f32 %v14706_v1, %v20453_v52  ;;  %v14122_v46 = vpop.f32.mrb[70].mxu0 }
 0x452   : > { %17657 = vst [vmem:[%s20461_s17 + $0x430] sm:$0xff] %v18539_v62  ;;  %v18535_v25 = vadd.f32 %v14122_v46, %v20478_v16  ;;  %v14124_v27 = vpop.f32.mrb[71].mxu0 }
 0x453   : > { %17658 = vst.msk [vmem:[%s20461_s17 + $0x438] sm:$0xff] %vm2612_vm2, %v18540_v55  ;;  %v14711_v43 = vpop.f32.mrb[70].mxu1  ;;  %v18536_v33 = vadd.f32 %v14124_v27, %v20478_v16 }
 0x454   : > { %17663 = vst [vmem:[%s20461_s17 + $0x460] sm:$0xf] %v18535_v25  ;;  %v18541_v58 = vadd.f32 %v14711_v43, %v20478_v16  ;;  %v14713_v17 = vpop.f32.mrb[71].mxu1 }
 0x455   : > { %17664 = vst [vmem:[%s20461_s17 + $0x468] sm:$0xf] %v18536_v33  ;;  %v18542_v38 = vadd.f32 %v14713_v17, %v20478_v16 }
 0x456   : > { %17665 = vst [vmem:[%s20461_s17 + $0x470] sm:$0xf] %v18541_v58 }
 0x457   : > { %17666 = vst.msk [vmem:[%s20461_s17 + $0x478] sm:$0xf] %vm2629_vm3, %v18542_v38 }
 0x491   : > { %v15352_v61 = vpop.f32.mrb[72].mxu0 }
 0x492   : > { %v18543_v39 = vadd.f32 %v15352_v61, %v20427_v45  ;;  %v15354_v32 = vpop.f32.mrb[73].mxu0 }
 0x493   : > { %v15941_v0 = vpop.f32.mrb[72].mxu1  ;;  %v18544_v53 = vadd.f32 %v15354_v32, %v20427_v45 }
 0x494   : > { %17683 = vst [vmem:[%s20461_s17 + $0x480] sm:$0xff] %v18543_v39  ;;  %v18549_v59 = vadd.f32 %v15941_v0, %v20427_v45  ;;  %v15943_v34 = vpop.f32.mrb[73].mxu1 }
 0x495   : > { %17684 = vst [vmem:[%s20461_s17 + $0x488] sm:$0xff] %v18544_v53  ;;  %v18550_v48 = vadd.f32 %v15943_v34, %v20427_v45  ;;  %v15359_v35 = vpop.f32.mrb[74].mxu0 }
 0x496   : > { %17685 = vst [vmem:[%s20461_s17 + $0x490] sm:$0xff] %v18549_v59  ;;  %v18545_v50 = vadd.f32 %v15359_v35, %v20453_v52  ;;  %v15361_v26 = vpop.f32.mrb[75].mxu0 }
 0x497   : > { %17686 = vst [vmem:[%s20461_s17 + $0x498] sm:$0xff] %v18550_v48  ;;  %v15948_v10 = vpop.f32.mrb[74].mxu1  ;;  %v18546_v11 = vadd.f32 %v15361_v26, %v20453_v52 }
 0x498   : > { %17691 = vst [vmem:[%s20461_s17 + $0x4c0] sm:$0xff] %v18545_v50  ;;  %v18551_v12 = vadd.f32 %v15948_v10, %v20453_v52  ;;  %v15950_v13 = vpop.f32.mrb[75].mxu1 }
 0x499   : > { %17692 = vst [vmem:[%s20461_s17 + $0x4c8] sm:$0xff] %v18546_v11  ;;  %v18552_v14 = vadd.f32 %v15950_v13, %v20453_v52  ;;  %v15366_v15 = vpop.f32.mrb[76].mxu0 }
 0x49a   : > { %17693 = vst [vmem:[%s20461_s17 + $0x4d0] sm:$0xff] %v18551_v12  ;;  %v18547_v54 = vadd.f32 %v15366_v15, %v20478_v16  ;;  %v15368_v28 = vpop.f32.mrb[77].mxu0 }
 0x49b   : > { %17694 = vst [vmem:[%s20461_s17 + $0x4d8] sm:$0xff] %v18552_v14  ;;  %v15955_v63 = vpop.f32.mrb[76].mxu1  ;;  %v18548_v19 = vadd.f32 %v15368_v28, %v20478_v16 }
 0x49c   : > { %17699 = vst [vmem:[%s20461_s17 + $0x500] sm:$0xf] %v18547_v54  ;;  %v18553_v24 = vadd.f32 %v15955_v63, %v20478_v16  ;;  %v15957_v42 = vpop.f32.mrb[77].mxu1 }
 0x49d   : > { %17700 = vst [vmem:[%s20461_s17 + $0x508] sm:$0xf] %v18548_v19  ;;  %v18554_v18 = vadd.f32 %v15957_v42, %v20478_v16 }
 0x49e   : > { %17701 = vst [vmem:[%s20461_s17 + $0x510] sm:$0xf] %v18553_v24 }
 0x49f   : > { %17702 = vst [vmem:[%s20461_s17 + $0x518] sm:$0xf] %v18554_v18 }
 0x4d9   : > { %v16530_v44 = vpop.f32.mrb[78].mxu0 }
 0x4da   : > { %v18555_v47 = vadd.f32 %v16530_v44, %v20427_v45  ;;  %v16532_v36 = vpop.f32.mrb[79].mxu0 }
 0x4db   : > { %v17119_v4 = vpop.f32.mrb[78].mxu1  ;;  %v18556_v40 = vadd.f32 %v16532_v36, %v20427_v45 }
 0x4dc   : > { %17687 = vst [vmem:[%s20461_s17 + $0x4a0] sm:$0xff] %v18555_v47  ;;  %v18561_v20 = vadd.f32 %v17119_v4, %v20427_v45  ;;  %v17121_v8 = vpop.f32.mrb[79].mxu1 }
 0x4dd   : > { %17688 = vst [vmem:[%s20461_s17 + $0x4a8] sm:$0xff] %v18556_v40  ;;  %v18562_v23 = vadd.f32 %v17121_v8, %v20427_v45  ;;  %v16537_v3 = vpop.f32.mrb[80].mxu0 }
 0x4de   : > { %17689 = vst [vmem:[%s20461_s17 + $0x4b0] sm:$0xff] %v18561_v20  ;;  %v18557_v56 = vadd.f32 %v16537_v3, %v20453_v52  ;;  %v16539_v6 = vpop.f32.mrb[81].mxu0 }
 0x4df   : > { %17690 = vst.msk [vmem:[%s20461_s17 + $0x4b8] sm:$0xff] %vm2612_vm2, %v18562_v23  ;;  %v17126_v21 = vpop.f32.mrb[80].mxu1  ;;  %v18558_v49 = vadd.f32 %v16539_v6, %v20453_v52 }
 0x4e0   : > { %17695 = vst [vmem:[%s20461_s17 + $0x4e0] sm:$0xff] %v18557_v56  ;;  %v18563_v57 = vadd.f32 %v17126_v21, %v20453_v52  ;;  %v17128_v31 = vpop.f32.mrb[81].mxu1 }
 0x4e1   : > { %17696 = vst [vmem:[%s20461_s17 + $0x4e8] sm:$0xff] %v18558_v49  ;;  %v18564_v45 = vadd.f32 %v17128_v31, %v20453_v52  ;;  %v16544_v5 = vpop.f32.mrb[82].mxu0  ;;  %17169 = sbr.rel (!%p19637_p4) target bundleno = 1329 (0x531), region = 36 }
 0x4e2   : > { %17697 = vst [vmem:[%s20461_s17 + $0x4f0] sm:$0xff] %v18563_v57  ;;  %v18559_v7 = vadd.f32 %v16544_v5, %v20478_v16  ;;  %v16546_v30 = vpop.f32.mrb[83].mxu0 }
 0x4e3   : > { %17698 = vst.msk [vmem:[%s20461_s17 + $0x4f8] sm:$0xff] %vm2612_vm2, %v18564_v45  ;;  %v17133_v2 = vpop.f32.mrb[82].mxu1  ;;  %v18560_v37 = vadd.f32 %v16546_v30, %v20478_v16 }
 0x4e4   : > { %17703 = vst [vmem:[%s20461_s17 + $0x520] sm:$0xf] %v18559_v7  ;;  %v18565_v22 = vadd.f32 %v17133_v2, %v20478_v16  ;;  %v17135_v51 = vpop.f32.mrb[83].mxu1 }
 0x4e5   : > { %17704 = vst [vmem:[%s20461_s17 + $0x528] sm:$0xf] %v18560_v37  ;;  %v18566_v9 = vadd.f32 %v17135_v51, %v20478_v16 }
 0x4e6   : > { %17705 = vst [vmem:[%s20461_s17 + $0x530] sm:$0xf] %v18565_v22 }
 0x4e7   : > { %17706 = vst.msk [vmem:[%s20461_s17 + $0x538] sm:$0xf] %vm2629_vm3, %v18566_v9 }
 0x4e8   : > { %s22792_s18 = smov (!%p17172_p8, %s17171_s18), 7 }
 0x4e9   : > { %s17709_s26 = smul.u32 3072, %s22792_s18 }
 0x4ea   : > { %s17181_s27 = smul.u32 3, %s22792_s18 }
 0x4eb   : > { %p17712_p9 = scmp.eq.s32.totalorder %s17709_s26, 0 }
 0x4ec   : > { %s22553_s20 = sshrl.u32 (!%p17712_p9), %s17181_s27, 3 }
 0x4ed   : > { %17184 = sbr.rel (%p17712_p9) target bundleno = 1329 (0x531), region = 40  ;;  %p17713_p10 = scmp.le.s32.totalorder (!%p17712_p9), %s22553_s20, 0 }
 0x4f4   : > { %17417 = sbr.rel (%p17713_p10) target bundleno = 1308 (0x51c), region = 100  ;;  %s22780_s15 = smov (!%p17713_p10), %s22545_s25 }
 0x4f5   : > { %s22781_s21 = smov (!%p17713_p10), %s20461_s17  ;;  %s22562_s28 = smov (!%p17713_p10), 0  }
 0x4f6   : > { %s22564_s29 = smov (!%p17713_p10), 0  }
 0x4fb LB: >> { %v17197_v52 = vld [vmem:[%s19564_s21] sm:$0xff]  ;;  %s17325_s30 = sadd.s32 1, %s19568_s28  ;;  %v17213_v46 = vld [vmem:[%s19564_s21 + $0x8] sm:$0xff]  ;;  %v17229_v61 = vld [vmem:[%s19564_s21 + $0x10] sm:$0xff]  ;;  %s17191_s29 = sadd.s32 1, %s19572_s29   ;;  %s19572_s29 = sphi %s22564_s29, %s17191_s29   ;;  %s19568_s28 = sphi %s22562_s28, %s22784_s28   ;;  %s19564_s21 = sphi %s22781_s21, %s22783_s21   ;;  %s19560_s15 = sphi %s22780_s15, %s22782_s15  }
 0x4fc   : >> { %v17199_v16 = vld [vmem:[%s19564_s21 + $0x40] sm:$0xff]  ;;  %17198 = vst [vmem:[%s19560_s15] sm:$0xff] %v17197_v52  ;;  %p17326_p11 = scmp.ge.s32.totalorder %s17325_s30, %s22553_s20  ;;  %17214 = vst [vmem:[%s19560_s15 + $0x8] sm:$0xff] %v17213_v46  ;;  %v17215_v25 = vld [vmem:[%s19564_s21 + $0x48] sm:$0xff]  ;;  %p17190_p12 = scmp.ge.s32.totalorder %s17191_s29, %s22553_s20 }
 0x4fd   : >> { %v17201_v41 = vld [vmem:[%s19564_s21 + $0x80] sm:$0xff]  ;;  %17200 = vst [vmem:[%s19560_s15 + $0x40] sm:$0xff] %v17199_v16  ;;  %v17217_v27 = vld [vmem:[%s19564_s21 + $0x88] sm:$0xff]  ;;  %17216 = vst [vmem:[%s19560_s15 + $0x48] sm:$0xff] %v17215_v25 }
 0x4fe   : >> { %17202 = vst [vmem:[%s19560_s15 + $0x80] sm:$0xff] %v17201_v41  ;;  %v17203_v60 = vld [vmem:[%s19564_s21 + $0xc0] sm:$0xff]  ;;  %v17219_v43 = vld [vmem:[%s19564_s21 + $0xc8] sm:$0xff]  ;;  %s22794_s30 = smov (%p17326_p11, %s17325_s30), 0  ;;  %17218 = vst [vmem:[%s19560_s15 + $0x88] sm:$0xff] %v17217_v27 }
 0x4ff   : >> { %v17205_v29 = vld [vmem:[%s19564_s21 + $0x100] sm:$0xff]  ;;  %17204 = vst [vmem:[%s19560_s15 + $0xc0] sm:$0xff] %v17203_v60  ;;  %17220 = vst [vmem:[%s19560_s15 + $0xc8] sm:$0xff] %v17219_v43  ;;  %v17221_v33 = vld [vmem:[%s19564_s21 + $0x108] sm:$0xff]  ;;  %s17714_s4 = sshll.u32 %s22794_s30, 9  ;;  %s22784_s28 = smov %s22794_s30 }
 0x500   : >> { %v17207_v62 = vld [vmem:[%s19564_s21 + $0x140] sm:$0xff]  ;;  %17206 = vst [vmem:[%s19560_s15 + $0x100] sm:$0xff] %v17205_v29  ;;  %v17223_v58 = vld [vmem:[%s19564_s21 + $0x148] sm:$0xff]  ;;  %17222 = vst [vmem:[%s19560_s15 + $0x108] sm:$0xff] %v17221_v33  ;;  %s22620_s5 = scalar_lea.vmem %s20461_s17, %s17714_s4 [#allocation2]   ;;  %s22623_s6 = scalar_lea.vmem %s22545_s25, %s17714_s4  }
 0x501   : >> { %17208 = vst [vmem:[%s19560_s15 + $0x140] sm:$0xff] %v17207_v62  ;;  %v17209_v1 = vld [vmem:[%s19564_s21 + $0x180] sm:$0xff]  ;;  %v17225_v17 = vld [vmem:[%s19564_s21 + $0x188] sm:$0xff]  ;;  %17224 = vst [vmem:[%s19560_s15 + $0x148] sm:$0xff] %v17223_v58 }
 0x502   : >> { %v17211_v55 = vld [vmem:[%s19564_s21 + $0x1c0] sm:$0xff]  ;;  %17210 = vst [vmem:[%s19560_s15 + $0x180] sm:$0xff] %v17209_v1  ;;  %17226 = vst [vmem:[%s19560_s15 + $0x188] sm:$0xff] %v17225_v17  ;;  %v17227_v38 = vld [vmem:[%s19564_s21 + $0x1c8] sm:$0xff] }
 0x503   : >> { %17212 = vst [vmem:[%s19560_s15 + $0x1c0] sm:$0xff] %v17211_v55  ;;  %v17231_v39 = vld [vmem:[%s19564_s21 + $0x50] sm:$0xff]  ;;  %17228 = vst [vmem:[%s19560_s15 + $0x1c8] sm:$0xff] %v17227_v38  ;;  %v17245_v35 = vld [vmem:[%s19564_s21 + $0x18] sm:$0xff] }
 0x504   : >> { %17230 = vst [vmem:[%s19560_s15 + $0x10] sm:$0xff] %v17229_v61  ;;  %17232 = vst [vmem:[%s19560_s15 + $0x50] sm:$0xff] %v17231_v39  ;;  %v17233_v32 = vld [vmem:[%s19564_s21 + $0x90] sm:$0xff]  ;;  %v17247_v50 = vld [vmem:[%s19564_s21 + $0x58] sm:$0xff] }
 0x505   : >> { %v17235_v0 = vld [vmem:[%s19564_s21 + $0xd0] sm:$0xff]  ;;  %17234 = vst [vmem:[%s19560_s15 + $0x90] sm:$0xff] %v17233_v32  ;;  %v17249_v26 = vld [vmem:[%s19564_s21 + $0x98] sm:$0xff]  ;;  %17246 = vst [vmem:[%s19560_s15 + $0x18] sm:$0xff] %v17245_v35 }
 0x506   : >> { %v17237_v53 = vld [vmem:[%s19564_s21 + $0x110] sm:$0xff]  ;;  %17236 = vst [vmem:[%s19560_s15 + $0xd0] sm:$0xff] %v17235_v0  ;;  %17248 = vst [vmem:[%s19560_s15 + $0x58] sm:$0xff] %v17247_v50  ;;  %v17251_v10 = vld [vmem:[%s19564_s21 + $0xd8] sm:$0xff] }
 0x507   : >> { %17238 = vst [vmem:[%s19560_s15 + $0x110] sm:$0xff] %v17237_v53  ;;  %v17239_v59 = vld [vmem:[%s19564_s21 + $0x150] sm:$0xff]  ;;  %17250 = vst [vmem:[%s19560_s15 + $0x98] sm:$0xff] %v17249_v26  ;;  %v17253_v11 = vld [vmem:[%s19564_s21 + $0x118] sm:$0xff] }
 0x508   : >> { %v17241_v34 = vld [vmem:[%s19564_s21 + $0x190] sm:$0xff]  ;;  %17240 = vst [vmem:[%s19560_s15 + $0x150] sm:$0xff] %v17239_v59  ;;  %v17255_v12 = vld [vmem:[%s19564_s21 + $0x158] sm:$0xff]  ;;  %17252 = vst [vmem:[%s19560_s15 + $0xd8] sm:$0xff] %v17251_v10 }
 0x509   : >> { %v17243_v48 = vld [vmem:[%s19564_s21 + $0x1d0] sm:$0xff]  ;;  %17242 = vst [vmem:[%s19560_s15 + $0x190] sm:$0xff] %v17241_v34  ;;  %17254 = vst [vmem:[%s19560_s15 + $0x118] sm:$0xff] %v17253_v11  ;;  %v17257_v13 = vld [vmem:[%s19564_s21 + $0x198] sm:$0xff] }
 0x50a   : >> { %17244 = vst [vmem:[%s19560_s15 + $0x1d0] sm:$0xff] %v17243_v48  ;;  %17256 = vst [vmem:[%s19560_s15 + $0x158] sm:$0xff] %v17255_v12  ;;  %v17259_v14 = vld [vmem:[%s19564_s21 + $0x1d8] sm:$0xff]  ;;  %v17261_v15 = vld [vmem:[%s19564_s21 + $0x20] sm:$0xff] }
 0x50b   : >> { %17258 = vst [vmem:[%s19560_s15 + $0x198] sm:$0xff] %v17257_v13  ;;  %17260 = vst [vmem:[%s19560_s15 + $0x1d8] sm:$0xff] %v17259_v14  ;;  %v17263_v54 = vld [vmem:[%s19564_s21 + $0x60] sm:$0xff]  ;;  %v17277_v44 = vld [vmem:[%s19564_s21 + $0x28] sm:$0xff] }
 0x50c   : >> { %17262 = vst [vmem:[%s19560_s15 + $0x20] sm:$0xff] %v17261_v15  ;;  %v17265_v28 = vld [vmem:[%s19564_s21 + $0xa0] sm:$0xff]  ;;  %17264 = vst [vmem:[%s19560_s15 + $0x60] sm:$0xff] %v17263_v54  ;;  %v17279_v47 = vld [vmem:[%s19564_s21 + $0x68] sm:$0xff] }
 0x50d   : >> { %v17267_v63 = vld [vmem:[%s19564_s21 + $0xe0] sm:$0xff]  ;;  %17266 = vst [vmem:[%s19560_s15 + $0xa0] sm:$0xff] %v17265_v28  ;;  %17278 = vst [vmem:[%s19560_s15 + $0x28] sm:$0xff] %v17277_v44  ;;  %v17281_v36 = vld [vmem:[%s19564_s21 + $0xa8] sm:$0xff] }
 0x50e   : >> { %17268 = vst [vmem:[%s19560_s15 + $0xe0] sm:$0xff] %v17267_v63  ;;  %v17269_v19 = vld [vmem:[%s19564_s21 + $0x120] sm:$0xff]  ;;  %17280 = vst [vmem:[%s19560_s15 + $0x68] sm:$0xff] %v17279_v47  ;;  %v17283_v4 = vld [vmem:[%s19564_s21 + $0xe8] sm:$0xff] }
 0x50f   : >> { %v17271_v24 = vld [vmem:[%s19564_s21 + $0x160] sm:$0xff]  ;;  %17270 = vst [vmem:[%s19560_s15 + $0x120] sm:$0xff] %v17269_v19  ;;  %v17285_v40 = vld [vmem:[%s19564_s21 + $0x128] sm:$0xff]  ;;  %17282 = vst [vmem:[%s19560_s15 + $0xa8] sm:$0xff] %v17281_v36 }
 0x510   : >> { %v17273_v42 = vld [vmem:[%s19564_s21 + $0x1a0] sm:$0xff]  ;;  %17272 = vst [vmem:[%s19560_s15 + $0x160] sm:$0xff] %v17271_v24  ;;  %17284 = vst [vmem:[%s19560_s15 + $0xe8] sm:$0xff] %v17283_v4  ;;  %v17287_v20 = vld [vmem:[%s19564_s21 + $0x168] sm:$0xff] }
 0x511   : >> { %17274 = vst [vmem:[%s19560_s15 + $0x1a0] sm:$0xff] %v17273_v42  ;;  %v17275_v18 = vld [vmem:[%s19564_s21 + $0x1e0] sm:$0xff]  ;;  %17286 = vst [vmem:[%s19560_s15 + $0x128] sm:$0xff] %v17285_v40  ;;  %v17289_v8 = vld [vmem:[%s19564_s21 + $0x1a8] sm:$0xff] }
 0x512   : >> { %17276 = vst [vmem:[%s19560_s15 + $0x1e0] sm:$0xff] %v17275_v18  ;;  %v17291_v23 = vld [vmem:[%s19564_s21 + $0x1e8] sm:$0xff]  ;;  %17288 = vst [vmem:[%s19560_s15 + $0x168] sm:$0xff] %v17287_v20  ;;  %v17293_v3 = vld [vmem:[%s19564_s21 + $0x30] sm:$0xff] }
 0x513   : >> { %17290 = vst [vmem:[%s19560_s15 + $0x1a8] sm:$0xff] %v17289_v8  ;;  %17292 = vst [vmem:[%s19560_s15 + $0x1e8] sm:$0xff] %v17291_v23  ;;  %v17295_v56 = vld [vmem:[%s19564_s21 + $0x70] sm:$0xff]  ;;  %v17309_v5 = vld [vmem:[%s19564_s21 + $0x38] sm:$0xff] }
 0x514   : >> { %v17297_v6 = vld [vmem:[%s19564_s21 + $0xb0] sm:$0xff]  ;;  %17294 = vst [vmem:[%s19560_s15 + $0x30] sm:$0xff] %v17293_v3  ;;  %17296 = vst [vmem:[%s19560_s15 + $0x70] sm:$0xff] %v17295_v56  ;;  %v17311_v7 = vld [vmem:[%s19564_s21 + $0x78] sm:$0xff] }
 0x515   : >> { %17298 = vst [vmem:[%s19560_s15 + $0xb0] sm:$0xff] %v17297_v6  ;;  %v17299_v21 = vld [vmem:[%s19564_s21 + $0xf0] sm:$0xff]  ;;  %17310 = vst [vmem:[%s19560_s15 + $0x38] sm:$0xff] %v17309_v5  ;;  %v17313_v30 = vld [vmem:[%s19564_s21 + $0xb8] sm:$0xff]  ;;  %17193 = sbr.rel (!%p17190_p12) target bundleno = 1275 (0x4fb), region = 106 }
 0x516   : >> { %v17301_v49 = vld [vmem:[%s19564_s21 + $0x130] sm:$0xff]  ;;  %17300 = vst [vmem:[%s19560_s15 + $0xf0] sm:$0xff] %v17299_v21  ;;  %v17315_v2 = vld [vmem:[%s19564_s21 + $0xf8] sm:$0xff]  ;;  %17312 = vst [vmem:[%s19560_s15 + $0x78] sm:$0xff] %v17311_v7 }
 0x517   : >> { %v17303_v57 = vld [vmem:[%s19564_s21 + $0x170] sm:$0xff]  ;;  %17302 = vst [vmem:[%s19560_s15 + $0x130] sm:$0xff] %v17301_v49  ;;  %17314 = vst [vmem:[%s19560_s15 + $0xb8] sm:$0xff] %v17313_v30  ;;  %v17317_v37 = vld [vmem:[%s19564_s21 + $0x138] sm:$0xff] }
 0x518   : >> { %17304 = vst [vmem:[%s19560_s15 + $0x170] sm:$0xff] %v17303_v57  ;;  %v17305_v31 = vld [vmem:[%s19564_s21 + $0x1b0] sm:$0xff]  ;;  %17316 = vst [vmem:[%s19560_s15 + $0xf8] sm:$0xff] %v17315_v2  ;;  %v17319_v22 = vld [vmem:[%s19564_s21 + $0x178] sm:$0xff] }
 0x519   : >> { %v17307_v45 = vld [vmem:[%s19564_s21 + $0x1f0] sm:$0xff]  ;;  %17306 = vst [vmem:[%s19560_s15 + $0x1b0] sm:$0xff] %v17305_v31  ;;  %v17321_v51 = vld [vmem:[%s19564_s21 + $0x1b8] sm:$0xff]  ;;  %17318 = vst [vmem:[%s19560_s15 + $0x138] sm:$0xff] %v17317_v37 }
 0x51a   : >> { %17308 = vst [vmem:[%s19560_s15 + $0x1f0] sm:$0xff] %v17307_v45  ;;  %17320 = vst [vmem:[%s19560_s15 + $0x178] sm:$0xff] %v17319_v22  ;;  %v17323_v9 = vld [vmem:[%s19564_s21 + $0x1f8] sm:$0xff]  ;;  %s22783_s21 = smov %s22620_s5 }
 0x51b   : >> { %17322 = vst [vmem:[%s19560_s15 + $0x1b8] sm:$0xff] %v17321_v51  ;;  %17324 = vst [vmem:[%s19560_s15 + $0x1f8] sm:$0xff] %v17323_v9  ;;  %s22782_s15 = smov %s22623_s6 }
 0x51c PF: > { %s22729_s7 = sand.u32 7, %s17181_s27   ;;  %s17725_s8 = sshll.u32 %s22553_s20, 9 }
 0x51d   : > { %s22733_s9 = scalar_lea.vmem %s20461_s17, %s17725_s8 [#allocation2]   ;;  %s22736_s10 = scalar_lea.vmem %s22545_s25, %s17725_s8  }
 0x51e   : > { %p17719_p13 = scmp.le.s32.totalorder %s22729_s7, 0 }
 0x51f   : > { %s22785_s11 = smov (!%p17719_p13), %s22736_s10  ;;  %s22786_s14 = smov (!%p17719_p13), %s22733_s9 }
 0x520   : > { %17431 = sbr.rel (%p17719_p13) target bundleno = 1329 (0x531), region = 111  ;;  %s22745_s12 = smov (!%p17719_p13), 0  }
 0x521   : > { %s22747_s18 = smov (!%p17719_p13), 0  }
 0x527 LB: >> { %v17348_v52 = vld [vmem:[%s19580_s14] sm:$0xff]  ;;  %v17350_v16 = vld [vmem:[%s19580_s14 + $0x8] sm:$0xff]  ;;  %v17352_v41 = vld [vmem:[%s19580_s14 + $0x10] sm:$0xff]  ;;  %s17364_s17 = sadd.s32 1, %s19584_s12  ;;  %s17342_s18 = sadd.s32 1, %s19588_s18   ;;  %s19588_s18 = sphi %s22747_s18, %s17342_s18   ;;  %s19584_s12 = sphi %s22745_s12, %s22787_s12   ;;  %s19580_s14 = sphi %s22786_s14, %s17369_s14   ;;  %s19576_s11 = sphi %s22785_s11, %s17370_s11  }
 0x528   : >> { %17349 = vst [vmem:[%s19576_s11] sm:$0xff] %v17348_v52  ;;  %17351 = vst [vmem:[%s19576_s11 + $0x8] sm:$0xff] %v17350_v16  ;;  %v17354_v60 = vld [vmem:[%s19580_s14 + $0x18] sm:$0xff]  ;;  %v17356_v29 = vld [vmem:[%s19580_s14 + $0x20] sm:$0xff]  ;;  %p17365_p0 = scmp.ge.s32.totalorder %s17364_s17, %s22729_s7  ;;  %p17341_p1 = scmp.ge.s32.totalorder %s17342_s18, %s22729_s7 }
 0x529   : >> { %17353 = vst [vmem:[%s19576_s11 + $0x10] sm:$0xff] %v17352_v41  ;;  %v17358_v62 = vld [vmem:[%s19580_s14 + $0x28] sm:$0xff]  ;;  %17355 = vst [vmem:[%s19576_s11 + $0x18] sm:$0xff] %v17354_v60  ;;  %v17360_v1 = vld [vmem:[%s19580_s14 + $0x30] sm:$0xff] }
 0x52a   : >> { %17357 = vst [vmem:[%s19576_s11 + $0x20] sm:$0xff] %v17356_v29  ;;  %17359 = vst [vmem:[%s19576_s11 + $0x28] sm:$0xff] %v17358_v62  ;;  %v17362_v55 = vld [vmem:[%s19580_s14 + $0x38] sm:$0xff]  ;;  %s22796_s17 = smov (%p17365_p0, %s17364_s17), 0  ;;  %17344 = sbr.rel (!%p17341_p1) target bundleno = 1319 (0x527), region = 117 }
 0x52b   : >> { %17361 = vst [vmem:[%s19576_s11 + $0x30] sm:$0xff] %v17360_v1  ;;  %17363 = vst [vmem:[%s19576_s11 + $0x38] sm:$0xff] %v17362_v55  ;;  %s17720_s22 = sshll.u32 %s22796_s17, 6  ;;  %s22787_s12 = smov %s22796_s17 }
 0x52c   : >> { %s17369_s14 = scalar_lea.vmem %s22733_s9, %s17720_s22 [#allocation2]   ;;  %s17370_s11 = scalar_lea.vmem %s22736_s10, %s17720_s22  }
 0x531 PF: > { %p10_p2 = scmp.ge.s32.totalorder %s19627_s16, 4   ;;  %s22788_s12 = smov %s19552_s13 }
 0x532   : > { %s22789_s13 = smov %s19635_s19  ;;  %s22790_s14 = smov %s19627_s16 }
 0x533   :  { %12 = sbr.rel (!%p10_p2) target bundleno = 2 (0x2), region = 128 }

</bundles_post_ra>
